<compile_context>
chip_gen: v7x
topology: tpu7x:2x2x1
jax: 0.10.0
libtpu: 0.0.40
codegen_flags: <defaults>
</compile_context>

<pallas_src>
import functools
import math

import jax
import jax.numpy as jnp
from jax.experimental import pallas as pl
from jax.experimental.pallas import tpu as pltpu

EPS = 1e-5
_TM_TARGET = 1024      # measured: tile 512 ~85% of HBM roofline, 1024 ~86%
_ATTN_TILE = 256       # q / kv tile target (fills v6e/v7x 256-wide MXU;
                       # at small N it falls back to a divisor of N)

_PAR1 = pltpu.CompilerParams(dimension_semantics=("parallel",))


def _vmem_limit_bytes():
    """Per-generation scoped-VMEM budget for the attention kernel."""
    try:
        cap = pltpu.get_tpu_info().vmem_capacity_bytes
    except Exception:                        # pragma: no cover - emulator etc.
        return None
    if cap >= (96 << 20):                    # v5e / v6e: 128 MiB physical
        return 100 << 20
    return 48 << 20                          # v7x: 64 MiB physical


# ---------------------------------------------------------------------------
# Small helpers
# ---------------------------------------------------------------------------
def _round_up(x, m):
    return ((x + m - 1) // m) * m


def _choose_tile(M, target=_TM_TARGET):
    """Pick (TM, padded_M).  Prefers large exact divisors; never TM=M for big
    non-divisible M (pads instead; pad rows masked out of BN stats)."""
    for tm in (target, 512, 256, 128):
        if tm <= M and M % tm == 0:
            return tm, M
    if M <= target:
        tm = _round_up(M, 8)
        return tm, tm
    return 512, _round_up(M, 512)


def _choose_div(n, target):
    for t in (target, 256, 128, 64, 32, 16, 8):
        if t <= n and n % t == 0:
            return t
    return n


def _pad_rows(a, Mp):
    M = a.shape[0]
    return a if Mp == M else jnp.pad(a, ((0, Mp - M), (0, 0)))


def _bn_from_partials(stats, count):
    """stats: (..., 2, C) partial [sum, sumsq] -> (mean, invstd) as (1, C)."""
    s = jnp.sum(stats.reshape(-1, 2, stats.shape[-1]), axis=0)
    mean = s[0] / count
    var = jnp.maximum(s[1] / count - mean * mean, 0.0)
    invstd = jax.lax.rsqrt(var + EPS)
    return mean[None, :], invstd[None, :]


def _stats_block(y, m_valid):
    """Single lane-dense (2, C) [sum, sumsq] block; pad rows masked if needed."""
    if m_valid is not None:
        row = (pl.program_id(0) * y.shape[0]
               + jax.lax.broadcasted_iota(jnp.int32, (y.shape[0], 1), 0))
        y = jnp.where(row < m_valid, y, 0.0)
    return jnp.concatenate([jnp.sum(y, axis=0, keepdims=True),
                            jnp.sum(y * y, axis=0, keepdims=True)], axis=0)


# ---------------------------------------------------------------------------
# Pallas kernel bodies
# ---------------------------------------------------------------------------
def _mm_stats_kernel(x_ref, w_ref, b_ref, y_ref, s_ref, *, m_valid):
    y = jnp.dot(x_ref[...].astype(jnp.bfloat16), w_ref[...],
                preferred_element_type=jnp.float32) + b_ref[...]
    y_ref[...] = y.astype(y_ref.dtype)
    s_ref[0] = _stats_block(y, m_valid)


def _mm2_stats_kernel(xa_ref, wa_ref, xb_ref, wb_ref, b_ref, y_ref, s_ref,
                      *, m_valid):
    """y = xa @ wa + xb @ wb + b (channel-concat folded into split weights)."""
    y = (jnp.dot(xa_ref[...].astype(jnp.bfloat16), wa_ref[...],
                 preferred_element_type=jnp.float32)
         + jnp.dot(xb_ref[...].astype(jnp.bfloat16), wb_ref[...],
                   preferred_element_type=jnp.float32)
         + b_ref[...])
    y_ref[...] = y.astype(y_ref.dtype)
    s_ref[0] = _stats_block(y, m_valid)


def _mm_dual_stats_kernel(x_ref, wa_ref, ba_ref, wb_ref, bb_ref,
                          ya_ref, sa_ref, yb_ref, sb_ref, *, m_valid):
    """Two branch heads (conv_desc[0], conv_offset[0]) share one x read."""
    xb = x_ref[...].astype(jnp.bfloat16)
    ya = jnp.dot(xb, wa_ref[...], preferred_element_type=jnp.float32) + ba_ref[...]
    yb = jnp.dot(xb, wb_ref[...], preferred_element_type=jnp.float32) + bb_ref[...]
    ya_ref[...] = ya.astype(ya_ref.dtype)
    yb_ref[...] = yb.astype(yb_ref.dtype)
    sa_ref[0] = _stats_block(ya, m_valid)
    sb_ref[0] = _stats_block(yb, m_valid)


def _bn_relu_mm_kernel(x_ref, mu_ref, si_ref, w_ref, b_ref, *rest,
                       with_stats, with_residual, post_act, m_valid):
    """y = relu((x - mu) * invstd) @ w + b  [+ residual] [post-act] [+ stats]."""
    refs = list(rest)
    res_ref = refs.pop(0) if with_residual else None
    y_ref = refs.pop(0)
    s_ref = refs.pop(0) if with_stats else None

    xn = jnp.maximum((x_ref[...].astype(jnp.float32) - mu_ref[...]) * si_ref[...],
                     0.0)
    y = jnp.dot(xn.astype(jnp.bfloat16), w_ref[...],
                preferred_element_type=jnp.float32) + b_ref[...]
    if with_residual:
        y = y + res_ref[...].astype(jnp.float32)
    if post_act == "hardtanh":
        y = jnp.clip(y, -1.0, 1.0)
    y_ref[...] = y.astype(y_ref.dtype)
    if with_stats:
        s_ref[0] = _stats_block(y, m_valid)


def _bn_relu_kernel(x_ref, mu_ref, si_ref, y_ref):
    y_ref[...] = jnp.maximum(
        (x_ref[...].astype(jnp.float32) - mu_ref[...]) * si_ref[...], 0.0)


def _qkv_kernel(x_ref, wq_ref, bq_ref, wkv_ref, bkv_ref, q_ref, kv_ref):
    """q = x @ Wq + bq (softmax scale pre-folded), kv = x @ Wkv + bkv; bf16."""
    xb = x_ref[...].astype(jnp.bfloat16)
    q_ref[...] = (jnp.dot(xb, wq_ref[...], preferred_element_type=jnp.float32)
                  + bq_ref[...]).astype(q_ref.dtype)
    kv_ref[...] = (jnp.dot(xb, wkv_ref[...], preferred_element_type=jnp.float32)
                   + bkv_ref[...]).astype(kv_ref.dtype)


def _attn_mlp0_kernel(x_ref, q_ref, kv_ref, wm_ref, bm_ref,
                      w0x_ref, w0m_ref, b0_ref, h_ref, s_ref,
                      *, num_heads, tkv):
    """Flash attention (online softmax over KV tiles) + per-head merge
    accumulation + mlp0 matmul, for one (batch, q-tile) grid cell.

    x_ref : (1, TQ, C)   f32  residual-stream rows (needed for mlp0's x term)
    q_ref : (1, TQ, C)   bf16 (scale folded in), heads contiguous on lanes
    kv_ref: (1, N, 2C)   bf16 full-sequence K|V for this batch (VMEM-resident)
    Emits pre-BN mlp0 output (bf16) and f32 BN partial stats.
    """
    x = x_ref[0]                      # (TQ, C) f32
    q = q_ref[0]                      # (TQ, C) bf16
    TQ, C = x.shape
    N = kv_ref.shape[1]
    D = C // num_heads
    nkv = N // tkv

    m0 = jnp.full((TQ, 1), -1e30, jnp.float32)
    l0 = jnp.zeros((TQ, 1), jnp.float32)
    carries = tuple((m0, l0, jnp.zeros((TQ, D), jnp.float32))
                    for _ in range(num_heads))

    def kv_step(start, carry):
        kvt = kv_ref[0, pl.ds(start, tkv), :]            # (tkv, 2C) bf16
        new = []
        for h in range(num_heads):
            m_i, l_i, acc = carry[h]
            qh = q[:, h * D:(h + 1) * D]                 # (TQ, D) bf16
            kh = kvt[:, h * D:(h + 1) * D]               # (tkv, D) bf16
            vh = kvt[:, C + h * D:C + (h + 1) * D]       # (tkv, D) bf16
            # q @ k^T (scale already folded into q) -- NT dot_general.
            sc = jax.lax.dot_general(qh, kh, (((1,), (1,)), ((), ())),
                                     preferred_element_type=jnp.float32)
            m_new = jnp.maximum(m_i, jnp.max(sc, axis=-1, keepdims=True))
            alpha = jnp.exp(m_i - m_new)
            p = jnp.exp(sc - m_new)
            l_new = alpha * l_i + jnp.sum(p, axis=-1, keepdims=True)
            acc_new = alpha * acc + jnp.dot(p.astype(jnp.bfloat16), vh,
                                            preferred_element_type=jnp.float32)
            new.append((m_new, l_new, acc_new))
        return tuple(new)

    if nkv == 1:
        carries = kv_step(0, carries)
    else:
        def body(j, c):
            return kv_step(pl.multiple_of(j * tkv, tkv), c)
        carries = jax.lax.fori_loop(0, nkv, body, carries)

    # Per-head merge accumulation (no lane-axis concat relayout).
    msg = jnp.zeros((TQ, C), jnp.float32)
    for h in range(num_heads):
        m_i, l_i, acc = carries[h]
        head_out = acc * pl.reciprocal(l_i, approx=True)          # (TQ, D)
        msg = msg + jnp.dot(head_out.astype(jnp.bfloat16),
                            wm_ref[h * D:(h + 1) * D, :],
                            preferred_element_type=jnp.float32)
    msg = msg + bm_ref[...]

    # mlp0 on concat([x, message]) == x @ W_top + message @ W_bot (+ bias).
    h_pre = (jnp.dot(x.astype(jnp.bfloat16), w0x_ref[...],
                     preferred_element_type=jnp.float32)
             + jnp.dot(msg.astype(jnp.bfloat16), w0m_ref[...],
                       preferred_element_type=jnp.float32)
             + b0_ref[...])                                        # (TQ, 2C) f32
    h_ref[0] = h_pre.astype(h_ref.dtype)
    s_ref[0, 0] = jnp.concatenate(
        [jnp.sum(h_pre, axis=0, keepdims=True),
         jnp.sum(h_pre * h_pre, axis=0, keepdims=True)], axis=0)


# ---------------------------------------------------------------------------
# Pallas wrappers
# ---------------------------------------------------------------------------
def mm_stats(x2d, w, b, x2=None, w2=None, *, out_dtype=jnp.bfloat16):
    M, Cin = x2d.shape
    Cout = w.shape[1]
    TM, Mp = _choose_tile(M)
    nt = Mp // TM
    m_valid = None if Mp == M else M
    xp = _pad_rows(x2d, Mp)
    if x2 is None:
        kern = functools.partial(_mm_stats_kernel, m_valid=m_valid)
        ins = (xp, w, b)
        in_specs = [
            pl.BlockSpec((TM, Cin), lambda i: (i, 0)),
            pl.BlockSpec((Cin, Cout), lambda i: (0, 0)),
            pl.BlockSpec((1, Cout), lambda i: (0, 0)),
        ]
    else:
        kern = functools.partial(_mm2_stats_kernel, m_valid=m_valid)
        Cin2 = x2.shape[1]
        ins = (xp, w, _pad_rows(x2, Mp), w2, b)
        in_specs = [
            pl.BlockSpec((TM, Cin), lambda i: (i, 0)),
            pl.BlockSpec((Cin, Cout), lambda i: (0, 0)),
            pl.BlockSpec((TM, Cin2), lambda i: (i, 0)),
            pl.BlockSpec((Cin2, Cout), lambda i: (0, 0)),
            pl.BlockSpec((1, Cout), lambda i: (0, 0)),
        ]
    y, stats = pl.pallas_call(
        kern, grid=(nt,), in_specs=in_specs,
        out_specs=(pl.BlockSpec((TM, Cout), lambda i: (i, 0)),
                   pl.BlockSpec((1, 2, Cout), lambda i: (i, 0, 0))),
        out_shape=(jax.ShapeDtypeStruct((Mp, Cout), out_dtype),
                   jax.ShapeDtypeStruct((nt, 2, Cout), jnp.float32)),
        compiler_params=_PAR1,
    )(*ins)
    return (y if Mp == M else y[:M]), stats


def mm_dual_stats(x2d, wa, ba, wb, bb, *, out_dtype=jnp.bfloat16):
    M, Cin = x2d.shape
    Ca, Cb = wa.shape[1], wb.shape[1]
    TM, Mp = _choose_tile(M)
    nt = Mp // TM
    m_valid = None if Mp == M else M
    xp = _pad_rows(x2d, Mp)
    kern = functools.partial(_mm_dual_stats_kernel, m_valid=m_valid)
    ya, sa, yb, sb = pl.pallas_call(
        kern, grid=(nt,),
        in_specs=[pl.BlockSpec((TM, Cin), lambda i: (i, 0)),
                  pl.BlockSpec((Cin, Ca), lambda i: (0, 0)),
                  pl.BlockSpec((1, Ca), lambda i: (0, 0)),
                  pl.BlockSpec((Cin, Cb), lambda i: (0, 0)),
                  pl.BlockSpec((1, Cb), lambda i: (0, 0))],
        out_specs=(pl.BlockSpec((TM, Ca), lambda i: (i, 0)),
                   pl.BlockSpec((1, 2, Ca), lambda i: (i, 0, 0)),
                   pl.BlockSpec((TM, Cb), lambda i: (i, 0)),
                   pl.BlockSpec((1, 2, Cb), lambda i: (i, 0, 0))),
        out_shape=(jax.ShapeDtypeStruct((Mp, Ca), out_dtype),
                   jax.ShapeDtypeStruct((nt, 2, Ca), jnp.float32),
                   jax.ShapeDtypeStruct((Mp, Cb), out_dtype),
                   jax.ShapeDtypeStruct((nt, 2, Cb), jnp.float32)),
        compiler_params=_PAR1,
    )(xp, wa, ba, wb, bb)
    if Mp != M:
        ya, yb = ya[:M], yb[:M]
    return ya, sa, yb, sb


def bn_relu_mm(x2d, mean, invstd, w, b, *, residual=None, stats=False,
               post_act=None, out_dtype=jnp.bfloat16):
    M, Cin = x2d.shape
    Cout = w.shape[1]
    TM, Mp = _choose_tile(M)
    nt = Mp // TM
    m_valid = None if Mp == M else M
    kern = functools.partial(_bn_relu_mm_kernel, with_stats=stats,
                             with_residual=residual is not None,
                             post_act=post_act, m_valid=m_valid)
    ins = [_pad_rows(x2d, Mp), mean, invstd, w, b]
    in_specs = [
        pl.BlockSpec((TM, Cin), lambda i: (i, 0)),
        pl.BlockSpec((1, Cin), lambda i: (0, 0)),
        pl.BlockSpec((1, Cin), lambda i: (0, 0)),
        pl.BlockSpec((Cin, Cout), lambda i: (0, 0)),
        pl.BlockSpec((1, Cout), lambda i: (0, 0)),
    ]
    if residual is not None:
        ins.append(_pad_rows(residual, Mp))
        in_specs.append(pl.BlockSpec((TM, Cout), lambda i: (i, 0)))
    if stats:
        out_specs = (pl.BlockSpec((TM, Cout), lambda i: (i, 0)),
                     pl.BlockSpec((1, 2, Cout), lambda i: (i, 0, 0)))
        out_shape = (jax.ShapeDtypeStruct((Mp, Cout), out_dtype),
                     jax.ShapeDtypeStruct((nt, 2, Cout), jnp.float32))
    else:
        out_specs = pl.BlockSpec((TM, Cout), lambda i: (i, 0))
        out_shape = jax.ShapeDtypeStruct((Mp, Cout), out_dtype)
    out = pl.pallas_call(
        kern, grid=(nt,), in_specs=in_specs, out_specs=out_specs,
        out_shape=out_shape, compiler_params=_PAR1,
    )(*ins)
    if stats:
        y, s = out
        return (y if Mp == M else y[:M]), s
    return out if Mp == M else out[:M]


def bn_relu(x2d, mean, invstd):
    M, Cin = x2d.shape
    TM, Mp = _choose_tile(M)
    nt = Mp // TM
    y = pl.pallas_call(
        _bn_relu_kernel, grid=(nt,),
        in_specs=[pl.BlockSpec((TM, Cin), lambda i: (i, 0)),
                  pl.BlockSpec((1, Cin), lambda i: (0, 0)),
                  pl.BlockSpec((1, Cin), lambda i: (0, 0))],
        out_specs=pl.BlockSpec((TM, Cin), lambda i: (i, 0)),
        out_shape=jax.ShapeDtypeStruct((Mp, Cin), jnp.float32),
        compiler_params=_PAR1,
    )(_pad_rows(x2d, Mp), mean, invstd)
    return y if Mp == M else y[:M]


def qkv_project(x2d, lp, B, N):
    """q (scale folded) and kv projections, bf16, shared x read."""
    M, C = x2d.shape
    TM, Mp = _choose_tile(M)
    nt = Mp // TM
    q, kv = pl.pallas_call(
        _qkv_kernel, grid=(nt,),
        in_specs=[pl.BlockSpec((TM, C), lambda i: (i, 0)),
                  pl.BlockSpec((C, C), lambda i: (0, 0)),
                  pl.BlockSpec((1, C), lambda i: (0, 0)),
                  pl.BlockSpec((C, 2 * C), lambda i: (0, 0)),
                  pl.BlockSpec((1, 2 * C), lambda i: (0, 0))],
        out_specs=(pl.BlockSpec((TM, C), lambda i: (i, 0)),
                   pl.BlockSpec((TM, 2 * C), lambda i: (i, 0))),
        out_shape=(jax.ShapeDtypeStruct((Mp, C), jnp.bfloat16),
                   jax.ShapeDtypeStruct((Mp, 2 * C), jnp.bfloat16)),
        compiler_params=_PAR1,
    )(_pad_rows(x2d, Mp), lp["wq"], lp["bq"], lp["wkv"], lp["bkv"])
    if Mp != M:
        q, kv = q[:M], kv[:M]
    return q.reshape(B, N, C), kv.reshape(B, N, 2 * C)


def attn_mlp0_stage(x3d, q3d, kv3d, lp, num_heads):
    """grid=(B, N//TQ) both parallel; inner fori over KV tiles (flash)."""
    B, N, C = x3d.shape
    TQ = _choose_div(N, _ATTN_TILE)
    TKV = _choose_div(N, _ATTN_TILE)
    nq = N // TQ
    kern = functools.partial(_attn_mlp0_kernel, num_heads=num_heads, tkv=TKV)
    h, s = pl.pallas_call(
        kern,
        grid=(B, nq),
        in_specs=[
            pl.BlockSpec((1, TQ, C), lambda b, qi: (b, qi, 0)),
            pl.BlockSpec((1, TQ, C), lambda b, qi: (b, qi, 0)),
            pl.BlockSpec((1, N, 2 * C), lambda b, qi: (b, 0, 0)),
            pl.BlockSpec((C, C), lambda b, qi: (0, 0)),
            pl.BlockSpec((1, C), lambda b, qi: (0, 0)),
            pl.BlockSpec((C, 2 * C), lambda b, qi: (0, 0)),
            pl.BlockSpec((C, 2 * C), lambda b, qi: (0, 0)),
            pl.BlockSpec((1, 2 * C), lambda b, qi: (0, 0)),
        ],
        out_specs=(
            pl.BlockSpec((1, TQ, 2 * C), lambda b, qi: (b, qi, 0)),
            pl.BlockSpec((1, 1, 2, 2 * C), lambda b, qi: (b, qi, 0, 0)),
        ),
        out_shape=(
            jax.ShapeDtypeStruct((B, N, 2 * C), jnp.bfloat16),
            jax.ShapeDtypeStruct((B, nq, 2, 2 * C), jnp.float32),
        ),
        compiler_params=pltpu.CompilerParams(
            dimension_semantics=("parallel", "parallel"),
            vmem_limit_bytes=_vmem_limit_bytes()),
    )(x3d, q3d, kv3d, lp["wmerge"], lp["bmerge"],
      lp["w0x"], lp["w0m"], lp["b0"])
    return h, s


# ---------------------------------------------------------------------------
# Parameters (deterministic, synthetic) + kernel-layout preparation
# ---------------------------------------------------------------------------
def _init_conv(key, cin, cout, zero_bias=False):
    kw, kb = jax.random.split(key)
    bound = 1.0 / math.sqrt(cin)
    w = jax.random.uniform(kw, (cin, cout), jnp.float32, -bound, bound)
    if zero_bias:
        b = jnp.zeros((1, cout), jnp.float32)
    else:
        b = jax.random.uniform(kb, (1, cout), jnp.float32, -bound, bound)
    return {"w": w, "b": b}


def init_params(key, feature_dim, num_layers):
    keys = iter(jax.random.split(key, 3 + 6 * num_layers + 5))
    p = {"conv_init": [
            _init_conv(next(keys), feature_dim + 2, feature_dim),
            _init_conv(next(keys), feature_dim, feature_dim),
            _init_conv(next(keys), feature_dim, feature_dim)],
         "layers": []}
    for _ in range(num_layers):
        p["layers"].append({
            "proj_q": _init_conv(next(keys), feature_dim, feature_dim),
            "proj_k": _init_conv(next(keys), feature_dim, feature_dim),
            "proj_v": _init_conv(next(keys), feature_dim, feature_dim),
            "merge":  _init_conv(next(keys), feature_dim, feature_dim),
            "mlp0":   _init_conv(next(keys), 2 * feature_dim, 2 * feature_dim),
            # nn.init.constant_(self.mlp[-1].bias, 0.0)
            "mlp1":   _init_conv(next(keys), 2 * feature_dim, feature_dim,
                                 zero_bias=True),
        })
    p["conv_desc"] = [_init_conv(next(keys), feature_dim, feature_dim),
                      _init_conv(next(keys), feature_dim, feature_dim)]
    p["conv_offset"] = [_init_conv(next(keys), feature_dim, feature_dim),
                        _init_conv(next(keys), feature_dim, feature_dim),
                        _init_conv(next(keys), feature_dim, 2)]
    return p


def prepare_params(p, feature_dim, num_heads):
    """Reference layout -> fused / head-permuted / scale-folded / bf16 layout."""
    C = feature_dim
    D = C // num_heads
    scale = 1.0 / math.sqrt(D)
    # torch channel c = d*H + h  ->  kernel channel c' = h*D + d (heads contiguous)
    perm = (jnp.arange(D)[None, :] * num_heads
            + jnp.arange(num_heads)[:, None]).reshape(-1)
    bf = lambda w: w.astype(jnp.bfloat16)

    kp = {}
    ci = p["conv_init"]
    kp["init0_wf"] = bf(ci[0]["w"][:C, :])       # feat rows of the C+2 input
    kp["init0_wg"] = bf(ci[0]["w"][C:, :])       # graph rows (2, C)
    kp["init0_b"] = ci[0]["b"]
    kp["init1_w"], kp["init1_b"] = bf(ci[1]["w"]), ci[1]["b"]
    kp["init2_w"], kp["init2_b"] = bf(ci[2]["w"]), ci[2]["b"]

    kp["layers"] = []
    for lp in p["layers"]:
        # softmax scale folded into the q projection (weights AND bias)
        wq = lp["proj_q"]["w"][:, perm] * scale
        bq = lp["proj_q"]["b"][:, perm] * scale
        wk, bk = lp["proj_k"]["w"][:, perm], lp["proj_k"]["b"][:, perm]
        wv, bv = lp["proj_v"]["w"][:, perm], lp["proj_v"]["b"][:, perm]
        kp["layers"].append({
            "wq": bf(wq), "bq": bq,
            "wkv": bf(jnp.concatenate([wk, wv], axis=1)),           # (C, 2C)
            "bkv": jnp.concatenate([bk, bv], axis=1),               # (1, 2C)
            "wmerge": bf(lp["merge"]["w"][perm, :]),                # rows permuted
            "bmerge": lp["merge"]["b"],
            "w0x": bf(lp["mlp0"]["w"][:C, :]),                      # concat split
            "w0m": bf(lp["mlp0"]["w"][C:, :]),
            "b0": lp["mlp0"]["b"],
            "w1": bf(lp["mlp1"]["w"]), "b1": lp["mlp1"]["b"],
        })

    cd = p["conv_desc"]
    kp["desc0_w"], kp["desc0_b"] = bf(cd[0]["w"]), cd[0]["b"]
    kp["desc1_w"], kp["desc1_b"] = bf(cd[1]["w"]), cd[1]["b"]

    co = p["conv_offset"]
    kp["off0_w"], kp["off0_b"] = bf(co[0]["w"]), co[0]["b"]
    kp["off1_w"], kp["off1_b"] = bf(co[1]["w"]), co[1]["b"]
    # Pad the Cout=2 conv to 128 lanes (lane-dense stores); slice in the wrapper.
    pad = 128
    w2 = jnp.zeros((C, pad), jnp.float32).at[:, :2].set(co[2]["w"])
    b2 = jnp.zeros((1, pad), jnp.float32).at[:, :2].set(co[2]["b"])
    kp["off2_w"], kp["off2_b"] = bf(w2), b2
    return kp


# ---------------------------------------------------------------------------
# Forward pass
# ---------------------------------------------------------------------------
def attentional_gnn_forward(kp, feat, graph, num_heads=4):
    # feat: (B, C, N) (PyTorch convention), graph: (B, N, 2)
    B, C, N = feat.shape
    M = B * N
    # TODO(synk): fuse this transpose (and the desc output transpose) into the
    # first / last kernels via an in-kernel XLU transpose of (1, C, TN) blocks.
    feat2d = jnp.transpose(feat, (0, 2, 1)).reshape(M, C)   # channels-last
    graph2d = graph.reshape(M, 2)

    # conv_init: conv(+2ch) -> BN -> ReLU -> conv -> BN -> ReLU -> conv
    y, s = mm_stats(feat2d, kp["init0_wf"], kp["init0_b"],
                    x2=graph2d, w2=kp["init0_wg"])
    mu, si = _bn_from_partials(s, M)
    y, s = bn_relu_mm(y, mu, si, kp["init1_w"], kp["init1_b"], stats=True)
    mu, si = _bn_from_partials(s, M)
    # residual stream stays f32
    x2d = bn_relu_mm(y, mu, si, kp["init2_w"], kp["init2_b"],
                     out_dtype=jnp.float32)

    # GNN layers: x = x + mlp(cat(x, attn(x, x, x)))
    for lp in kp["layers"]:
        q3d, kv3d = qkv_project(x2d, lp, B, N)
        h_pre, s = attn_mlp0_stage(x2d.reshape(B, N, C), q3d, kv3d, lp,
                                   num_heads)
        mu, si = _bn_from_partials(s, M)
        x2d = bn_relu_mm(h_pre.reshape(M, 2 * C), mu, si, lp["w1"], lp["b1"],
                         residual=x2d, out_dtype=jnp.float32)

    # Branch heads: conv_desc[0] and conv_offset[0] share one x2d read.
    yd, sd, yo, so = mm_dual_stats(x2d, kp["desc0_w"], kp["desc0_b"],
                                   kp["off0_w"], kp["off0_b"])

    # conv_desc: ... -> BN -> ReLU -> conv -> BN -> ReLU
    mud, sid = _bn_from_partials(sd, M)
    yd, sd = bn_relu_mm(yd, mud, sid, kp["desc1_w"], kp["desc1_b"], stats=True)
    mud, sid = _bn_from_partials(sd, M)
    d2d = bn_relu(yd, mud, sid)                              # f32 final
    desc = jnp.transpose(d2d.reshape(B, N, C), (0, 2, 1))    # (B, C, N)

    # conv_offset: ... -> BN -> ReLU -> conv -> BN -> ReLU -> conv(C->2) -> Hardtanh
    muo, sio = _bn_from_partials(so, M)
    yo, so = bn_relu_mm(yo, muo, sio, kp["off1_w"], kp["off1_b"], stats=True)
    muo, sio = _bn_from_partials(so, M)
    opad = bn_relu_mm(yo, muo, sio, kp["off2_w"], kp["off2_b"],
                      post_act="hardtanh", out_dtype=jnp.float32)
    offset = opad[:, :2].reshape(B, N, 2)   # == torch .permute(0, 2, 1) output
    return desc, offset


# ---------------------------------------------------------------------------
if __name__ == "__main__":
    B, N, FEATURE_DIM, NUM_LAYERS, NUM_HEADS = 2, 16, 32, 2, 4

    key = jax.random.PRNGKey(0)
    kp_key, kf, kg = jax.random.split(key, 3)
    ref_params = init_params(kp_key, FEATURE_DIM, NUM_LAYERS)
    kparams = prepare_params(ref_params, FEATURE_DIM, NUM_HEADS)

    feat = jax.random.normal(kf, (B, FEATURE_DIM, N), jnp.float32)   # (B, C, N)
    graph = jax.random.normal(kg, (B, N, 2), jnp.float32)            # (B, N, 2)

    fwd = jax.jit(functools.partial(attentional_gnn_forward,
                                    num_heads=NUM_HEADS))
    desc, offset = fwd(kparams, feat, graph)
    jax.block_until_ready((desc, offset))

    assert desc.shape == (B, FEATURE_DIM, N), desc.shape
    assert offset.shape == (B, N, 2), offset.shape
    assert bool(jnp.all(jnp.isfinite(desc))) and bool(jnp.all(jnp.isfinite(offset)))
    print("KERNEL_OK")
</pallas_src>

<mosaic_0001>
module attributes {stable_mosaic.version = 11 : i64} {
  func.func @_mm2_stats_kernel(%arg0: i32, %arg1: memref<32x32xf32, #tpu.memory_space<vmem>>, %arg2: memref<32x32xbf16, #tpu.memory_space<vmem>>, %arg3: memref<32x2xf32, #tpu.memory_space<vmem>>, %arg4: memref<2x32xbf16, #tpu.memory_space<vmem>>, %arg5: memref<1x32xf32, #tpu.memory_space<vmem>>, %arg6: memref<32x32xbf16, #tpu.memory_space<vmem>>, %arg7: memref<1x2x32xf32, #tpu.memory_space<vmem>>) attributes {dimension_semantics = [#tpu.dimension_semantics<parallel>], iteration_bounds = array<i64: 1>, scalar_prefetch = 0 : i64, scratch_operands = 0 : i64, tpu.core_type = #tpu.core_type<tc>, window_params = [{transform_indices = @transform_0, window_bounds = array<i64: 32, 32>}, {pipeline_mode = #tpu.pipeline_mode<synchronous>, transform_indices = @transform_1, window_bounds = array<i64: 32, 32>}, {transform_indices = @transform_2, window_bounds = array<i64: 32, 2>}, {pipeline_mode = #tpu.pipeline_mode<synchronous>, transform_indices = @transform_3, window_bounds = array<i64: 2, 32>}, {pipeline_mode = #tpu.pipeline_mode<synchronous>, transform_indices = @transform_4, window_bounds = array<i64: 1, 32>}, {transform_indices = @transform_5, window_bounds = array<i64: 32, 32>}, {transform_indices = @transform_6, window_bounds = array<i64: 1, 2, 32>}]} {
    %c0 = arith.constant 0 : index
    %c0_0 = arith.constant 0 : index
    %0 = vector.load %arg1[%c0, %c0_0] : memref<32x32xf32, #tpu.memory_space<vmem>>, vector<32x32xf32>
    %1 = arith.truncf %0 : vector<32x32xf32> to vector<32x32xbf16>
    %c0_1 = arith.constant 0 : index
    %c0_2 = arith.constant 0 : index
    %2 = vector.load %arg2[%c0_1, %c0_2] : memref<32x32xbf16, #tpu.memory_space<vmem>>, vector<32x32xbf16>
    %cst = arith.constant dense<0.000000e+00> : vector<32x32xf32>
    %3 = tpu.matmul %1, %2, %cst {dimension_numbers = #tpu.dot_dimension_numbers<[1], [0], [0], [1], [0, 0, 1, 1], [], []>} : vector<32x32xbf16>, vector<32x32xbf16>, vector<32x32xf32> -> vector<32x32xf32>
    %c0_3 = arith.constant 0 : index
    %c0_4 = arith.constant 0 : index
    %4 = vector.load %arg3[%c0_3, %c0_4] : memref<32x2xf32, #tpu.memory_space<vmem>>, vector<32x2xf32>
    %5 = arith.truncf %4 : vector<32x2xf32> to vector<32x2xbf16>
    %c0_5 = arith.constant 0 : index
    %c0_6 = arith.constant 0 : index
    %6 = vector.load %arg4[%c0_5, %c0_6] : memref<2x32xbf16, #tpu.memory_space<vmem>>, vector<2x32xbf16>
    %cst_7 = arith.constant dense<0.000000e+00> : vector<32x32xf32>
    %7 = tpu.matmul %5, %6, %cst_7 {dimension_numbers = #tpu.dot_dimension_numbers<[1], [0], [0], [1], [0, 0, 1, 1], [], []>} : vector<32x2xbf16>, vector<2x32xbf16>, vector<32x32xf32> -> vector<32x32xf32>
    %8 = arith.addf %3, %7 : vector<32x32xf32>
    %c0_8 = arith.constant 0 : index
    %c0_9 = arith.constant 0 : index
    %9 = vector.load %arg5[%c0_8, %c0_9] : memref<1x32xf32, #tpu.memory_space<vmem>>, vector<1x32xf32>
    %10 = vector.broadcast %9 : vector<1x32xf32> to vector<32x32xf32>
    %11 = arith.addf %8, %10 : vector<32x32xf32>
    %12 = arith.truncf %11 : vector<32x32xf32> to vector<32x32xbf16>
    %c0_10 = arith.constant 0 : index
    %c0_11 = arith.constant 0 : index
    %13 = vector.load %arg6[%c0_10, %c0_11] : memref<32x32xbf16, #tpu.memory_space<vmem>>, vector<32x32xbf16>
    tpu.vector_store %arg6[%c0_10, %c0_11], %12 {strides = array<i32>} : memref<32x32xbf16, #tpu.memory_space<vmem>>, vector<32x32xbf16>,
    %cst_12 = arith.constant dense<0.000000e+00> : vector<32xf32>
    %14 = vector.multi_reduction <add>, %11, %cst_12 [0] : vector<32x32xf32> to vector<32xf32>
    %15 = vector.shape_cast %14 : vector<32xf32> to vector<1x32xf32>
    %16 = arith.mulf %11, %11 : vector<32x32xf32>
    %cst_13 = arith.constant dense<0.000000e+00> : vector<32xf32>
    %17 = vector.multi_reduction <add>, %16, %cst_13 [0] : vector<32x32xf32> to vector<32xf32>
    %18 = vector.shape_cast %17 : vector<32xf32> to vector<1x32xf32>
    %19 = tpu.concatenate %15, %18 in 0 : vector<1x32xf32>, vector<1x32xf32> -> vector<2x32xf32>
    %c0_14 = arith.constant 0 : index
    %c0_15 = arith.constant 0 : index
    %c0_16 = arith.constant 0 : index
    %20 = vector.load %arg7[%c0_14, %c0_15, %c0_16] : memref<1x2x32xf32, #tpu.memory_space<vmem>>, vector<1x2x32xf32>
    %21 = vector.shape_cast %20 : vector<1x2x32xf32> to vector<2x32xf32>
    %22 = vector.shape_cast %19 : vector<2x32xf32> to vector<1x2x32xf32>
    tpu.vector_store %arg7[%c0_14, %c0_15, %c0_16], %22 {strides = array<i32>} : memref<1x2x32xf32, #tpu.memory_space<vmem>>, vector<1x2x32xf32>,
    return
  }
  func.func @transform_0(%arg0: i32) -> (i32, i32) {
    %c0_i32 = arith.constant 0 : i32
    %c0_i32_0 = arith.constant 0 : i32
    return %arg0, %c0_i32 : i32, i32
  }
  func.func @transform_1(%arg0: i32) -> (i32, i32) {
    %c0_i32 = arith.constant 0 : i32
    %c0_i32_0 = arith.constant 0 : i32
    %c0_i32_1 = arith.constant 0 : i32
    return %c0_i32, %c0_i32_0 : i32, i32
  }
  func.func @transform_2(%arg0: i32) -> (i32, i32) {
    %c0_i32 = arith.constant 0 : i32
    %c0_i32_0 = arith.constant 0 : i32
    return %arg0, %c0_i32 : i32, i32
  }
  func.func @transform_3(%arg0: i32) -> (i32, i32) {
    %c0_i32 = arith.constant 0 : i32
    %c0_i32_0 = arith.constant 0 : i32
    %c0_i32_1 = arith.constant 0 : i32
    return %c0_i32, %c0_i32_0 : i32, i32
  }
  func.func @transform_4(%arg0: i32) -> (i32, i32) {
    %c0_i32 = arith.constant 0 : i32
    %c0_i32_0 = arith.constant 0 : i32
    %c0_i32_1 = arith.constant 0 : i32
    return %c0_i32, %c0_i32_0 : i32, i32
  }
  func.func @transform_5(%arg0: i32) -> (i32, i32) {
    %c0_i32 = arith.constant 0 : i32
    %c0_i32_0 = arith.constant 0 : i32
    return %arg0, %c0_i32 : i32, i32
  }
  func.func @transform_6(%arg0: i32) -> (i32, i32, i32) {
    %c0_i32 = arith.constant 0 : i32
    %c0_i32_0 = arith.constant 0 : i32
    %c0_i32_1 = arith.constant 0 : i32
    return %arg0, %c0_i32, %c0_i32_0 : i32, i32, i32
  }
}

module attributes {stable_mosaic.version = 11 : i64} {
  func.func @_bn_relu_mm_kernel(%arg0: i32, %arg1: memref<32x32xbf16, #tpu.memory_space<vmem>>, %arg2: memref<1x32xf32, #tpu.memory_space<vmem>>, %arg3: memref<1x32xf32, #tpu.memory_space<vmem>>, %arg4: memref<32x32xbf16, #tpu.memory_space<vmem>>, %arg5: memref<1x32xf32, #tpu.memory_space<vmem>>, %arg6: memref<32x32xbf16, #tpu.memory_space<vmem>>, %arg7: memref<1x2x32xf32, #tpu.memory_space<vmem>>) attributes {dimension_semantics = [#tpu.dimension_semantics<parallel>], iteration_bounds = array<i64: 1>, scalar_prefetch = 0 : i64, scratch_operands = 0 : i64, tpu.core_type = #tpu.core_type<tc>, window_params = [{transform_indices = @transform_0, window_bounds = array<i64: 32, 32>}, {pipeline_mode = #tpu.pipeline_mode<synchronous>, transform_indices = @transform_1, window_bounds = array<i64: 1, 32>}, {pipeline_mode = #tpu.pipeline_mode<synchronous>, transform_indices = @transform_2, window_bounds = array<i64: 1, 32>}, {pipeline_mode = #tpu.pipeline_mode<synchronous>, transform_indices = @transform_3, window_bounds = array<i64: 32, 32>}, {pipeline_mode = #tpu.pipeline_mode<synchronous>, transform_indices = @transform_4, window_bounds = array<i64: 1, 32>}, {transform_indices = @transform_5, window_bounds = array<i64: 32, 32>}, {transform_indices = @transform_6, window_bounds = array<i64: 1, 2, 32>}]} {
    %c0 = arith.constant 0 : index
    %c0_0 = arith.constant 0 : index
    %0 = vector.load %arg1[%c0, %c0_0] : memref<32x32xbf16, #tpu.memory_space<vmem>>, vector<32x32xbf16>
    %1 = arith.extf %0 : vector<32x32xbf16> to vector<32x32xf32>
    %c0_1 = arith.constant 0 : index
    %c0_2 = arith.constant 0 : index
    %2 = vector.load %arg2[%c0_1, %c0_2] : memref<1x32xf32, #tpu.memory_space<vmem>>, vector<1x32xf32>
    %3 = vector.broadcast %2 : vector<1x32xf32> to vector<32x32xf32>
    %4 = arith.subf %1, %3 : vector<32x32xf32>
    %c0_3 = arith.constant 0 : index
    %c0_4 = arith.constant 0 : index
    %5 = vector.load %arg3[%c0_3, %c0_4] : memref<1x32xf32, #tpu.memory_space<vmem>>, vector<1x32xf32>
    %6 = vector.broadcast %5 : vector<1x32xf32> to vector<32x32xf32>
    %7 = arith.mulf %4, %6 : vector<32x32xf32>
    %cst = arith.constant 0.000000e+00 : f32
    %8 = vector.broadcast %cst : f32 to vector<32x32xf32>
    %9 = arith.maximumf %7, %8 : vector<32x32xf32>
    %10 = arith.truncf %9 : vector<32x32xf32> to vector<32x32xbf16>
    %c0_5 = arith.constant 0 : index
    %c0_6 = arith.constant 0 : index
    %11 = vector.load %arg4[%c0_5, %c0_6] : memref<32x32xbf16, #tpu.memory_space<vmem>>, vector<32x32xbf16>
    %cst_7 = arith.constant dense<0.000000e+00> : vector<32x32xf32>
    %12 = tpu.matmul %10, %11, %cst_7 {dimension_numbers = #tpu.dot_dimension_numbers<[1], [0], [0], [1], [0, 0, 1, 1], [], []>} : vector<32x32xbf16>, vector<32x32xbf16>, vector<32x32xf32> -> vector<32x32xf32>
    %c0_8 = arith.constant 0 : index
    %c0_9 = arith.constant 0 : index
    %13 = vector.load %arg5[%c0_8, %c0_9] : memref<1x32xf32, #tpu.memory_space<vmem>>, vector<1x32xf32>
    %14 = vector.broadcast %13 : vector<1x32xf32> to vector<32x32xf32>
    %15 = arith.addf %12, %14 : vector<32x32xf32>
    %16 = arith.truncf %15 : vector<32x32xf32> to vector<32x32xbf16>
    %c0_10 = arith.constant 0 : index
    %c0_11 = arith.constant 0 : index
    %17 = vector.load %arg6[%c0_10, %c0_11] : memref<32x32xbf16, #tpu.memory_space<vmem>>, vector<32x32xbf16>
    tpu.vector_store %arg6[%c0_10, %c0_11], %16 {strides = array<i32>} : memref<32x32xbf16, #tpu.memory_space<vmem>>, vector<32x32xbf16>,
    %cst_12 = arith.constant dense<0.000000e+00> : vector<32xf32>
    %18 = vector.multi_reduction <add>, %15, %cst_12 [0] : vector<32x32xf32> to vector<32xf32>
    %19 = vector.shape_cast %18 : vector<32xf32> to vector<1x32xf32>
    %20 = arith.mulf %15, %15 : vector<32x32xf32>
    %cst_13 = arith.constant dense<0.000000e+00> : vector<32xf32>
    %21 = vector.multi_reduction <add>, %20, %cst_13 [0] : vector<32x32xf32> to vector<32xf32>
    %22 = vector.shape_cast %21 : vector<32xf32> to vector<1x32xf32>
    %23 = tpu.concatenate %19, %22 in 0 : vector<1x32xf32>, vector<1x32xf32> -> vector<2x32xf32>
    %c0_14 = arith.constant 0 : index
    %c0_15 = arith.constant 0 : index
    %c0_16 = arith.constant 0 : index
    %24 = vector.load %arg7[%c0_14, %c0_15, %c0_16] : memref<1x2x32xf32, #tpu.memory_space<vmem>>, vector<1x2x32xf32>
    %25 = vector.shape_cast %24 : vector<1x2x32xf32> to vector<2x32xf32>
    %26 = vector.shape_cast %23 : vector<2x32xf32> to vector<1x2x32xf32>
    tpu.vector_store %arg7[%c0_14, %c0_15, %c0_16], %26 {strides = array<i32>} : memref<1x2x32xf32, #tpu.memory_space<vmem>>, vector<1x2x32xf32>,
    return
  }
  func.func @transform_0(%arg0: i32) -> (i32, i32) {
    %c0_i32 = arith.constant 0 : i32
    %c0_i32_0 = arith.constant 0 : i32
    return %arg0, %c0_i32 : i32, i32
  }
  func.func @transform_1(%arg0: i32) -> (i32, i32) {
    %c0_i32 = arith.constant 0 : i32
    %c0_i32_0 = arith.constant 0 : i32
    %c0_i32_1 = arith.constant 0 : i32
    return %c0_i32, %c0_i32_0 : i32, i32
  }
  func.func @transform_2(%arg0: i32) -> (i32, i32) {
    %c0_i32 = arith.constant 0 : i32
    %c0_i32_0 = arith.constant 0 : i32
    %c0_i32_1 = arith.constant 0 : i32
    return %c0_i32, %c0_i32_0 : i32, i32
  }
  func.func @transform_3(%arg0: i32) -> (i32, i32) {
    %c0_i32 = arith.constant 0 : i32
    %c0_i32_0 = arith.constant 0 : i32
    %c0_i32_1 = arith.constant 0 : i32
    return %c0_i32, %c0_i32_0 : i32, i32
  }
  func.func @transform_4(%arg0: i32) -> (i32, i32) {
    %c0_i32 = arith.constant 0 : i32
    %c0_i32_0 = arith.constant 0 : i32
    %c0_i32_1 = arith.constant 0 : i32
    return %c0_i32, %c0_i32_0 : i32, i32
  }
  func.func @transform_5(%arg0: i32) -> (i32, i32) {
    %c0_i32 = arith.constant 0 : i32
    %c0_i32_0 = arith.constant 0 : i32
    return %arg0, %c0_i32 : i32, i32
  }
  func.func @transform_6(%arg0: i32) -> (i32, i32, i32) {
    %c0_i32 = arith.constant 0 : i32
    %c0_i32_0 = arith.constant 0 : i32
    %c0_i32_1 = arith.constant 0 : i32
    return %arg0, %c0_i32, %c0_i32_0 : i32, i32, i32
  }
}

module attributes {stable_mosaic.version = 11 : i64} {
  func.func @_bn_relu_mm_kernel(%arg0: i32, %arg1: memref<32x32xbf16, #tpu.memory_space<vmem>>, %arg2: memref<1x32xf32, #tpu.memory_space<vmem>>, %arg3: memref<1x32xf32, #tpu.memory_space<vmem>>, %arg4: memref<32x32xbf16, #tpu.memory_space<vmem>>, %arg5: memref<1x32xf32, #tpu.memory_space<vmem>>, %arg6: memref<32x32xf32, #tpu.memory_space<vmem>>) attributes {dimension_semantics = [#tpu.dimension_semantics<parallel>], iteration_bounds = array<i64: 1>, scalar_prefetch = 0 : i64, scratch_operands = 0 : i64, tpu.core_type = #tpu.core_type<tc>, window_params = [{transform_indices = @transform_0, window_bounds = array<i64: 32, 32>}, {pipeline_mode = #tpu.pipeline_mode<synchronous>, transform_indices = @transform_1, window_bounds = array<i64: 1, 32>}, {pipeline_mode = #tpu.pipeline_mode<synchronous>, transform_indices = @transform_2, window_bounds = array<i64: 1, 32>}, {pipeline_mode = #tpu.pipeline_mode<synchronous>, transform_indices = @transform_3, window_bounds = array<i64: 32, 32>}, {pipeline_mode = #tpu.pipeline_mode<synchronous>, transform_indices = @transform_4, window_bounds = array<i64: 1, 32>}, {transform_indices = @transform_5, window_bounds = array<i64: 32, 32>}]} {
    %c0 = arith.constant 0 : index
    %c0_0 = arith.constant 0 : index
    %0 = vector.load %arg1[%c0, %c0_0] : memref<32x32xbf16, #tpu.memory_space<vmem>>, vector<32x32xbf16>
    %1 = arith.extf %0 : vector<32x32xbf16> to vector<32x32xf32>
    %c0_1 = arith.constant 0 : index
    %c0_2 = arith.constant 0 : index
    %2 = vector.load %arg2[%c0_1, %c0_2] : memref<1x32xf32, #tpu.memory_space<vmem>>, vector<1x32xf32>
    %3 = vector.broadcast %2 : vector<1x32xf32> to vector<32x32xf32>
    %4 = arith.subf %1, %3 : vector<32x32xf32>
    %c0_3 = arith.constant 0 : index
    %c0_4 = arith.constant 0 : index
    %5 = vector.load %arg3[%c0_3, %c0_4] : memref<1x32xf32, #tpu.memory_space<vmem>>, vector<1x32xf32>
    %6 = vector.broadcast %5 : vector<1x32xf32> to vector<32x32xf32>
    %7 = arith.mulf %4, %6 : vector<32x32xf32>
    %cst = arith.constant 0.000000e+00 : f32
    %8 = vector.broadcast %cst : f32 to vector<32x32xf32>
    %9 = arith.maximumf %7, %8 : vector<32x32xf32>
    %10 = arith.truncf %9 : vector<32x32xf32> to vector<32x32xbf16>
    %c0_5 = arith.constant 0 : index
    %c0_6 = arith.constant 0 : index
    %11 = vector.load %arg4[%c0_5, %c0_6] : memref<32x32xbf16, #tpu.memory_space<vmem>>, vector<32x32xbf16>
    %cst_7 = arith.constant dense<0.000000e+00> : vector<32x32xf32>
    %12 = tpu.matmul %10, %11, %cst_7 {dimension_numbers = #tpu.dot_dimension_numbers<[1], [0], [0], [1], [0, 0, 1, 1], [], []>} : vector<32x32xbf16>, vector<32x32xbf16>, vector<32x32xf32> -> vector<32x32xf32>
    %c0_8 = arith.constant 0 : index
    %c0_9 = arith.constant 0 : index
    %13 = vector.load %arg5[%c0_8, %c0_9] : memref<1x32xf32, #tpu.memory_space<vmem>>, vector<1x32xf32>
    %14 = vector.broadcast %13 : vector<1x32xf32> to vector<32x32xf32>
    %15 = arith.addf %12, %14 : vector<32x32xf32>
    %c0_10 = arith.constant 0 : index
    %c0_11 = arith.constant 0 : index
    %16 = vector.load %arg6[%c0_10, %c0_11] : memref<32x32xf32, #tpu.memory_space<vmem>>, vector<32x32xf32>
    tpu.vector_store %arg6[%c0_10, %c0_11], %15 {strides = array<i32>} : memref<32x32xf32, #tpu.memory_space<vmem>>, vector<32x32xf32>,
    return
  }
  func.func @transform_0(%arg0: i32) -> (i32, i32) {
    %c0_i32 = arith.constant 0 : i32
    %c0_i32_0 = arith.constant 0 : i32
    return %arg0, %c0_i32 : i32, i32
  }
  func.func @transform_1(%arg0: i32) -> (i32, i32) {
    %c0_i32 = arith.constant 0 : i32
    %c0_i32_0 = arith.constant 0 : i32
    %c0_i32_1 = arith.constant 0 : i32
    return %c0_i32, %c0_i32_0 : i32, i32
  }
  func.func @transform_2(%arg0: i32) -> (i32, i32) {
    %c0_i32 = arith.constant 0 : i32
    %c0_i32_0 = arith.constant 0 : i32
    %c0_i32_1 = arith.constant 0 : i32
    return %c0_i32, %c0_i32_0 : i32, i32
  }
  func.func @transform_3(%arg0: i32) -> (i32, i32) {
    %c0_i32 = arith.constant 0 : i32
    %c0_i32_0 = arith.constant 0 : i32
    %c0_i32_1 = arith.constant 0 : i32
    return %c0_i32, %c0_i32_0 : i32, i32
  }
  func.func @transform_4(%arg0: i32) -> (i32, i32) {
    %c0_i32 = arith.constant 0 : i32
    %c0_i32_0 = arith.constant 0 : i32
    %c0_i32_1 = arith.constant 0 : i32
    return %c0_i32, %c0_i32_0 : i32, i32
  }
  func.func @transform_5(%arg0: i32) -> (i32, i32) {
    %c0_i32 = arith.constant 0 : i32
    %c0_i32_0 = arith.constant 0 : i32
    return %arg0, %c0_i32 : i32, i32
  }
}

module attributes {stable_mosaic.version = 11 : i64} {
  func.func @_qkv_kernel(%arg0: i32, %arg1: memref<32x32xf32, #tpu.memory_space<vmem>>, %arg2: memref<32x32xbf16, #tpu.memory_space<vmem>>, %arg3: memref<1x32xf32, #tpu.memory_space<vmem>>, %arg4: memref<32x64xbf16, #tpu.memory_space<vmem>>, %arg5: memref<1x64xf32, #tpu.memory_space<vmem>>, %arg6: memref<32x32xbf16, #tpu.memory_space<vmem>>, %arg7: memref<32x64xbf16, #tpu.memory_space<vmem>>) attributes {dimension_semantics = [#tpu.dimension_semantics<parallel>], iteration_bounds = array<i64: 1>, scalar_prefetch = 0 : i64, scratch_operands = 0 : i64, tpu.core_type = #tpu.core_type<tc>, window_params = [{transform_indices = @transform_0, window_bounds = array<i64: 32, 32>}, {pipeline_mode = #tpu.pipeline_mode<synchronous>, transform_indices = @transform_1, window_bounds = array<i64: 32, 32>}, {pipeline_mode = #tpu.pipeline_mode<synchronous>, transform_indices = @transform_2, window_bounds = array<i64: 1, 32>}, {pipeline_mode = #tpu.pipeline_mode<synchronous>, transform_indices = @transform_3, window_bounds = array<i64: 32, 64>}, {pipeline_mode = #tpu.pipeline_mode<synchronous>, transform_indices = @transform_4, window_bounds = array<i64: 1, 64>}, {transform_indices = @transform_5, window_bounds = array<i64: 32, 32>}, {transform_indices = @transform_6, window_bounds = array<i64: 32, 64>}]} {
    %c0 = arith.constant 0 : index
    %c0_0 = arith.constant 0 : index
    %0 = vector.load %arg1[%c0, %c0_0] : memref<32x32xf32, #tpu.memory_space<vmem>>, vector<32x32xf32>
    %1 = arith.truncf %0 : vector<32x32xf32> to vector<32x32xbf16>
    %c0_1 = arith.constant 0 : index
    %c0_2 = arith.constant 0 : index
    %2 = vector.load %arg2[%c0_1, %c0_2] : memref<32x32xbf16, #tpu.memory_space<vmem>>, vector<32x32xbf16>
    %cst = arith.constant dense<0.000000e+00> : vector<32x32xf32>
    %3 = tpu.matmul %1, %2, %cst {dimension_numbers = #tpu.dot_dimension_numbers<[1], [0], [0], [1], [0, 0, 1, 1], [], []>} : vector<32x32xbf16>, vector<32x32xbf16>, vector<32x32xf32> -> vector<32x32xf32>
    %c0_3 = arith.constant 0 : index
    %c0_4 = arith.constant 0 : index
    %4 = vector.load %arg3[%c0_3, %c0_4] : memref<1x32xf32, #tpu.memory_space<vmem>>, vector<1x32xf32>
    %5 = vector.broadcast %4 : vector<1x32xf32> to vector<32x32xf32>
    %6 = arith.addf %3, %5 : vector<32x32xf32>
    %7 = arith.truncf %6 : vector<32x32xf32> to vector<32x32xbf16>
    %c0_5 = arith.constant 0 : index
    %c0_6 = arith.constant 0 : index
    %8 = vector.load %arg6[%c0_5, %c0_6] : memref<32x32xbf16, #tpu.memory_space<vmem>>, vector<32x32xbf16>
    tpu.vector_store %arg6[%c0_5, %c0_6], %7 {strides = array<i32>} : memref<32x32xbf16, #tpu.memory_space<vmem>>, vector<32x32xbf16>,
    %c0_7 = arith.constant 0 : index
    %c0_8 = arith.constant 0 : index
    %9 = vector.load %arg4[%c0_7, %c0_8] : memref<32x64xbf16, #tpu.memory_space<vmem>>, vector<32x64xbf16>
    %cst_9 = arith.constant dense<0.000000e+00> : vector<32x64xf32>
    %10 = tpu.matmul %1, %9, %cst_9 {dimension_numbers = #tpu.dot_dimension_numbers<[1], [0], [0], [1], [0, 0, 1, 1], [], []>} : vector<32x32xbf16>, vector<32x64xbf16>, vector<32x64xf32> -> vector<32x64xf32>
    %c0_10 = arith.constant 0 : index
    %c0_11 = arith.constant 0 : index
    %11 = vector.load %arg5[%c0_10, %c0_11] : memref<1x64xf32, #tpu.memory_space<vmem>>, vector<1x64xf32>
    %12 = vector.broadcast %11 : vector<1x64xf32> to vector<32x64xf32>
    %13 = arith.addf %10, %12 : vector<32x64xf32>
    %14 = arith.truncf %13 : vector<32x64xf32> to vector<32x64xbf16>
    %c0_12 = arith.constant 0 : index
    %c0_13 = arith.constant 0 : index
    %15 = vector.load %arg7[%c0_12, %c0_13] : memref<32x64xbf16, #tpu.memory_space<vmem>>, vector<32x64xbf16>
    tpu.vector_store %arg7[%c0_12, %c0_13], %14 {strides = array<i32>} : memref<32x64xbf16, #tpu.memory_space<vmem>>, vector<32x64xbf16>,
    return
  }
  func.func @transform_0(%arg0: i32) -> (i32, i32) {
    %c0_i32 = arith.constant 0 : i32
    %c0_i32_0 = arith.constant 0 : i32
    return %arg0, %c0_i32 : i32, i32
  }
  func.func @transform_1(%arg0: i32) -> (i32, i32) {
    %c0_i32 = arith.constant 0 : i32
    %c0_i32_0 = arith.constant 0 : i32
    %c0_i32_1 = arith.constant 0 : i32
    return %c0_i32, %c0_i32_0 : i32, i32
  }
  func.func @transform_2(%arg0: i32) -> (i32, i32) {
    %c0_i32 = arith.constant 0 : i32
    %c0_i32_0 = arith.constant 0 : i32
    %c0_i32_1 = arith.constant 0 : i32
    return %c0_i32, %c0_i32_0 : i32, i32
  }
  func.func @transform_3(%arg0: i32) -> (i32, i32) {
    %c0_i32 = arith.constant 0 : i32
    %c0_i32_0 = arith.constant 0 : i32
    %c0_i32_1 = arith.constant 0 : i32
    return %c0_i32, %c0_i32_0 : i32, i32
  }
  func.func @transform_4(%arg0: i32) -> (i32, i32) {
    %c0_i32 = arith.constant 0 : i32
    %c0_i32_0 = arith.constant 0 : i32
    %c0_i32_1 = arith.constant 0 : i32
    return %c0_i32, %c0_i32_0 : i32, i32
  }
  func.func @transform_5(%arg0: i32) -> (i32, i32) {
    %c0_i32 = arith.constant 0 : i32
    %c0_i32_0 = arith.constant 0 : i32
    return %arg0, %c0_i32 : i32, i32
  }
  func.func @transform_6(%arg0: i32) -> (i32, i32) {
    %c0_i32 = arith.constant 0 : i32
    %c0_i32_0 = arith.constant 0 : i32
    return %arg0, %c0_i32 : i32, i32
  }
}

module attributes {stable_mosaic.version = 11 : i64} {
  func.func @_bn_relu_mm_kernel(%arg0: i32, %arg1: memref<32x64xbf16, #tpu.memory_space<vmem>>, %arg2: memref<1x64xf32, #tpu.memory_space<vmem>>, %arg3: memref<1x64xf32, #tpu.memory_space<vmem>>, %arg4: memref<64x32xbf16, #tpu.memory_space<vmem>>, %arg5: memref<1x32xf32, #tpu.memory_space<vmem>>, %arg6: memref<32x32xf32, #tpu.memory_space<vmem>>, %arg7: memref<32x32xf32, #tpu.memory_space<vmem>>) attributes {dimension_semantics = [#tpu.dimension_semantics<parallel>], iteration_bounds = array<i64: 1>, scalar_prefetch = 0 : i64, scratch_operands = 0 : i64, tpu.core_type = #tpu.core_type<tc>, window_params = [{transform_indices = @transform_0, window_bounds = array<i64: 32, 64>}, {pipeline_mode = #tpu.pipeline_mode<synchronous>, transform_indices = @transform_1, window_bounds = array<i64: 1, 64>}, {pipeline_mode = #tpu.pipeline_mode<synchronous>, transform_indices = @transform_2, window_bounds = array<i64: 1, 64>}, {pipeline_mode = #tpu.pipeline_mode<synchronous>, transform_indices = @transform_3, window_bounds = array<i64: 64, 32>}, {pipeline_mode = #tpu.pipeline_mode<synchronous>, transform_indices = @transform_4, window_bounds = array<i64: 1, 32>}, {transform_indices = @transform_5, window_bounds = array<i64: 32, 32>}, {transform_indices = @transform_6, window_bounds = array<i64: 32, 32>}]} {
    %c0 = arith.constant 0 : index
    %c0_0 = arith.constant 0 : index
    %0 = vector.load %arg1[%c0, %c0_0] : memref<32x64xbf16, #tpu.memory_space<vmem>>, vector<32x64xbf16>
    %1 = arith.extf %0 : vector<32x64xbf16> to vector<32x64xf32>
    %c0_1 = arith.constant 0 : index
    %c0_2 = arith.constant 0 : index
    %2 = vector.load %arg2[%c0_1, %c0_2] : memref<1x64xf32, #tpu.memory_space<vmem>>, vector<1x64xf32>
    %3 = vector.broadcast %2 : vector<1x64xf32> to vector<32x64xf32>
    %4 = arith.subf %1, %3 : vector<32x64xf32>
    %c0_3 = arith.constant 0 : index
    %c0_4 = arith.constant 0 : index
    %5 = vector.load %arg3[%c0_3, %c0_4] : memref<1x64xf32, #tpu.memory_space<vmem>>, vector<1x64xf32>
    %6 = vector.broadcast %5 : vector<1x64xf32> to vector<32x64xf32>
    %7 = arith.mulf %4, %6 : vector<32x64xf32>
    %cst = arith.constant 0.000000e+00 : f32
    %8 = vector.broadcast %cst : f32 to vector<32x64xf32>
    %9 = arith.maximumf %7, %8 : vector<32x64xf32>
    %10 = arith.truncf %9 : vector<32x64xf32> to vector<32x64xbf16>
    %c0_5 = arith.constant 0 : index
    %c0_6 = arith.constant 0 : index
    %11 = vector.load %arg4[%c0_5, %c0_6] : memref<64x32xbf16, #tpu.memory_space<vmem>>, vector<64x32xbf16>
    %cst_7 = arith.constant dense<0.000000e+00> : vector<32x32xf32>
    %12 = tpu.matmul %10, %11, %cst_7 {dimension_numbers = #tpu.dot_dimension_numbers<[1], [0], [0], [1], [0, 0, 1, 1], [], []>} : vector<32x64xbf16>, vector<64x32xbf16>, vector<32x32xf32> -> vector<32x32xf32>
    %c0_8 = arith.constant 0 : index
    %c0_9 = arith.constant 0 : index
    %13 = vector.load %arg5[%c0_8, %c0_9] : memref<1x32xf32, #tpu.memory_space<vmem>>, vector<1x32xf32>
    %14 = vector.broadcast %13 : vector<1x32xf32> to vector<32x32xf32>
    %15 = arith.addf %12, %14 : vector<32x32xf32>
    %c0_10 = arith.constant 0 : index
    %c0_11 = arith.constant 0 : index
    %16 = vector.load %arg6[%c0_10, %c0_11] : memref<32x32xf32, #tpu.memory_space<vmem>>, vector<32x32xf32>
    %17 = arith.addf %15, %16 : vector<32x32xf32>
    %c0_12 = arith.constant 0 : index
    %c0_13 = arith.constant 0 : index
    %18 = vector.load %arg7[%c0_12, %c0_13] : memref<32x32xf32, #tpu.memory_space<vmem>>, vector<32x32xf32>
    tpu.vector_store %arg7[%c0_12, %c0_13], %17 {strides = array<i32>} : memref<32x32xf32, #tpu.memory_space<vmem>>, vector<32x32xf32>,
    return
  }
  func.func @transform_0(%arg0: i32) -> (i32, i32) {
    %c0_i32 = arith.constant 0 : i32
    %c0_i32_0 = arith.constant 0 : i32
    return %arg0, %c0_i32 : i32, i32
  }
  func.func @transform_1(%arg0: i32) -> (i32, i32) {
    %c0_i32 = arith.constant 0 : i32
    %c0_i32_0 = arith.constant 0 : i32
    %c0_i32_1 = arith.constant 0 : i32
    return %c0_i32, %c0_i32_0 : i32, i32
  }
  func.func @transform_2(%arg0: i32) -> (i32, i32) {
    %c0_i32 = arith.constant 0 : i32
    %c0_i32_0 = arith.constant 0 : i32
    %c0_i32_1 = arith.constant 0 : i32
    return %c0_i32, %c0_i32_0 : i32, i32
  }
  func.func @transform_3(%arg0: i32) -> (i32, i32) {
    %c0_i32 = arith.constant 0 : i32
    %c0_i32_0 = arith.constant 0 : i32
    %c0_i32_1 = arith.constant 0 : i32
    return %c0_i32, %c0_i32_0 : i32, i32
  }
  func.func @transform_4(%arg0: i32) -> (i32, i32) {
    %c0_i32 = arith.constant 0 : i32
    %c0_i32_0 = arith.constant 0 : i32
    %c0_i32_1 = arith.constant 0 : i32
    return %c0_i32, %c0_i32_0 : i32, i32
  }
  func.func @transform_5(%arg0: i32) -> (i32, i32) {
    %c0_i32 = arith.constant 0 : i32
    %c0_i32_0 = arith.constant 0 : i32
    return %arg0, %c0_i32 : i32, i32
  }
  func.func @transform_6(%arg0: i32) -> (i32, i32) {
    %c0_i32 = arith.constant 0 : i32
    %c0_i32_0 = arith.constant 0 : i32
    return %arg0, %c0_i32 : i32, i32
  }
}

module attributes {stable_mosaic.version = 11 : i64} {
  func.func @_attn_mlp0_kernel(%arg0: i32, %arg1: i32, %arg2: memref<1x16x32xf32, #tpu.memory_space<vmem>>, %arg3: memref<1x16x32xbf16, #tpu.memory_space<vmem>>, %arg4: memref<1x16x64xbf16, #tpu.memory_space<vmem>>, %arg5: memref<32x32xbf16, #tpu.memory_space<vmem>>, %arg6: memref<1x32xf32, #tpu.memory_space<vmem>>, %arg7: memref<32x64xbf16, #tpu.memory_space<vmem>>, %arg8: memref<32x64xbf16, #tpu.memory_space<vmem>>, %arg9: memref<1x64xf32, #tpu.memory_space<vmem>>, %arg10: memref<1x16x64xbf16, #tpu.memory_space<vmem>>, %arg11: memref<1x1x2x64xf32, #tpu.memory_space<vmem>>) attributes {dimension_semantics = [#tpu.dimension_semantics<parallel>, #tpu.dimension_semantics<parallel>], iteration_bounds = array<i64: 2, 1>, scalar_prefetch = 0 : i64, scratch_operands = 0 : i64, tpu.core_type = #tpu.core_type<tc>, window_params = [{transform_indices = @transform_0, window_bounds = array<i64: 1, 16, 32>}, {transform_indices = @transform_1, window_bounds = array<i64: 1, 16, 32>}, {transform_indices = @transform_2, window_bounds = array<i64: 1, 16, 64>}, {pipeline_mode = #tpu.pipeline_mode<synchronous>, transform_indices = @transform_3, window_bounds = array<i64: 32, 32>}, {pipeline_mode = #tpu.pipeline_mode<synchronous>, transform_indices = @transform_4, window_bounds = array<i64: 1, 32>}, {pipeline_mode = #tpu.pipeline_mode<synchronous>, transform_indices = @transform_5, window_bounds = array<i64: 32, 64>}, {pipeline_mode = #tpu.pipeline_mode<synchronous>, transform_indices = @transform_6, window_bounds = array<i64: 32, 64>}, {pipeline_mode = #tpu.pipeline_mode<synchronous>, transform_indices = @transform_7, window_bounds = array<i64: 1, 64>}, {transform_indices = @transform_8, window_bounds = array<i64: 1, 16, 64>}, {transform_indices = @transform_9, window_bounds = array<i64: 1, 1, 2, 64>}]} {
    %c0 = arith.constant 0 : index
    %c0_0 = arith.constant 0 : index
    %c0_1 = arith.constant 0 : index
    %0 = vector.load %arg2[%c0, %c0_0, %c0_1] : memref<1x16x32xf32, #tpu.memory_space<vmem>>, vector<1x16x32xf32>
    %1 = vector.shape_cast %0 : vector<1x16x32xf32> to vector<16x32xf32>
    %c0_2 = arith.constant 0 : index
    %c0_3 = arith.constant 0 : index
    %c0_4 = arith.constant 0 : index
    %2 = vector.load %arg3[%c0_2, %c0_3, %c0_4] : memref<1x16x32xbf16, #tpu.memory_space<vmem>>, vector<1x16x32xbf16>
    %3 = vector.shape_cast %2 : vector<1x16x32xbf16> to vector<16x32xbf16>
    %cst = arith.constant -1.000000e+30 : f32
    %4 = vector.broadcast %cst : f32 to vector<16x1xf32>
    %cst_5 = arith.constant 0.000000e+00 : f32
    %5 = vector.broadcast %cst_5 : f32 to vector<16x1xf32>
    %cst_6 = arith.constant 0.000000e+00 : f32
    %6 = vector.broadcast %cst_6 : f32 to vector<16x8xf32>
    %cst_7 = arith.constant 0.000000e+00 : f32
    %7 = vector.broadcast %cst_7 : f32 to vector<16x8xf32>
    %cst_8 = arith.constant 0.000000e+00 : f32
    %8 = vector.broadcast %cst_8 : f32 to vector<16x8xf32>
    %cst_9 = arith.constant 0.000000e+00 : f32
    %9 = vector.broadcast %cst_9 : f32 to vector<16x8xf32>
    %c0_10 = arith.constant 0 : index
    %c0_11 = arith.constant 0 : index
    %c0_12 = arith.constant 0 : index
    %10 = vector.load %arg4[%c0_10, %c0_11, %c0_12] : memref<1x16x64xbf16, #tpu.memory_space<vmem>>, vector<1x16x64xbf16>
    %11 = vector.shape_cast %10 : vector<1x16x64xbf16> to vector<16x64xbf16>
    %12 = vector.extract_strided_slice %3 {offsets = [0, 0], sizes = [16, 8], strides = [1, 1]} : vector<16x32xbf16> to vector<16x8xbf16>
    %13 = vector.extract_strided_slice %11 {offsets = [0, 0], sizes = [16, 8], strides = [1, 1]} : vector<16x64xbf16> to vector<16x8xbf16>
    %14 = vector.extract_strided_slice %11 {offsets = [0, 32], sizes = [16, 8], strides = [1, 1]} : vector<16x64xbf16> to vector<16x8xbf16>
    %cst_13 = arith.constant dense<0.000000e+00> : vector<16x16xf32>
    %15 = tpu.matmul %12, %13, %cst_13 {dimension_numbers = #tpu.dot_dimension_numbers<[1], [1], [0], [0], [0, 0, 1, 0], [], []>} : vector<16x8xbf16>, vector<16x8xbf16>, vector<16x16xf32> -> vector<16x16xf32>
    %cst_14 = arith.constant dense<0xFF800000> : vector<16xf32>
    %16 = vector.multi_reduction <maximumf>, %15, %cst_14 [1] : vector<16x16xf32> to vector<16xf32>
    %17 = vector.shape_cast %16 : vector<16xf32> to vector<16x1xf32>
    %18 = arith.maximumf %4, %17 : vector<16x1xf32>
    %19 = arith.subf %4, %18 : vector<16x1xf32>
    %20 = math.exp %19 : vector<16x1xf32>
    %21 = vector.broadcast %18 : vector<16x1xf32> to vector<16x16xf32>
    %22 = arith.subf %15, %21 : vector<16x16xf32>
    %23 = math.exp %22 : vector<16x16xf32>
    %24 = arith.mulf %20, %5 : vector<16x1xf32>
    %cst_15 = arith.constant dense<0.000000e+00> : vector<16xf32>
    %25 = vector.multi_reduction <add>, %23, %cst_15 [1] : vector<16x16xf32> to vector<16xf32>
    %26 = vector.shape_cast %25 : vector<16xf32> to vector<16x1xf32>
    %27 = arith.addf %24, %26 : vector<16x1xf32>
    %28 = vector.broadcast %20 : vector<16x1xf32> to vector<16x8xf32>
    %29 = arith.mulf %28, %6 : vector<16x8xf32>
    %30 = arith.truncf %23 : vector<16x16xf32> to vector<16x16xbf16>
    %cst_16 = arith.constant dense<0.000000e+00> : vector<16x8xf32>
    %31 = tpu.matmul %30, %14, %cst_16 {dimension_numbers = #tpu.dot_dimension_numbers<[1], [0], [0], [1], [0, 0, 1, 1], [], []>} : vector<16x16xbf16>, vector<16x8xbf16>, vector<16x8xf32> -> vector<16x8xf32>
    %32 = arith.addf %29, %31 : vector<16x8xf32>
    %33 = vector.extract_strided_slice %3 {offsets = [0, 8], sizes = [16, 8], strides = [1, 1]} : vector<16x32xbf16> to vector<16x8xbf16>
    %34 = vector.extract_strided_slice %11 {offsets = [0, 8], sizes = [16, 8], strides = [1, 1]} : vector<16x64xbf16> to vector<16x8xbf16>
    %35 = vector.extract_strided_slice %11 {offsets = [0, 40], sizes = [16, 8], strides = [1, 1]} : vector<16x64xbf16> to vector<16x8xbf16>
    %cst_17 = arith.constant dense<0.000000e+00> : vector<16x16xf32>
    %36 = tpu.matmul %33, %34, %cst_17 {dimension_numbers = #tpu.dot_dimension_numbers<[1], [1], [0], [0], [0, 0, 1, 0], [], []>} : vector<16x8xbf16>, vector<16x8xbf16>, vector<16x16xf32> -> vector<16x16xf32>
    %cst_18 = arith.constant dense<0xFF800000> : vector<16xf32>
    %37 = vector.multi_reduction <maximumf>, %36, %cst_18 [1] : vector<16x16xf32> to vector<16xf32>
    %38 = vector.shape_cast %37 : vector<16xf32> to vector<16x1xf32>
    %39 = arith.maximumf %4, %38 : vector<16x1xf32>
    %40 = arith.subf %4, %39 : vector<16x1xf32>
    %41 = math.exp %40 : vector<16x1xf32>
    %42 = vector.broadcast %39 : vector<16x1xf32> to vector<16x16xf32>
    %43 = arith.subf %36, %42 : vector<16x16xf32>
    %44 = math.exp %43 : vector<16x16xf32>
    %45 = arith.mulf %41, %5 : vector<16x1xf32>
    %cst_19 = arith.constant dense<0.000000e+00> : vector<16xf32>
    %46 = vector.multi_reduction <add>, %44, %cst_19 [1] : vector<16x16xf32> to vector<16xf32>
    %47 = vector.shape_cast %46 : vector<16xf32> to vector<16x1xf32>
    %48 = arith.addf %45, %47 : vector<16x1xf32>
    %49 = vector.broadcast %41 : vector<16x1xf32> to vector<16x8xf32>
    %50 = arith.mulf %49, %7 : vector<16x8xf32>
    %51 = arith.truncf %44 : vector<16x16xf32> to vector<16x16xbf16>
    %cst_20 = arith.constant dense<0.000000e+00> : vector<16x8xf32>
    %52 = tpu.matmul %51, %35, %cst_20 {dimension_numbers = #tpu.dot_dimension_numbers<[1], [0], [0], [1], [0, 0, 1, 1], [], []>} : vector<16x16xbf16>, vector<16x8xbf16>, vector<16x8xf32> -> vector<16x8xf32>
    %53 = arith.addf %50, %52 : vector<16x8xf32>
    %54 = vector.extract_strided_slice %3 {offsets = [0, 16], sizes = [16, 8], strides = [1, 1]} : vector<16x32xbf16> to vector<16x8xbf16>
    %55 = vector.extract_strided_slice %11 {offsets = [0, 16], sizes = [16, 8], strides = [1, 1]} : vector<16x64xbf16> to vector<16x8xbf16>
    %56 = vector.extract_strided_slice %11 {offsets = [0, 48], sizes = [16, 8], strides = [1, 1]} : vector<16x64xbf16> to vector<16x8xbf16>
    %cst_21 = arith.constant dense<0.000000e+00> : vector<16x16xf32>
    %57 = tpu.matmul %54, %55, %cst_21 {dimension_numbers = #tpu.dot_dimension_numbers<[1], [1], [0], [0], [0, 0, 1, 0], [], []>} : vector<16x8xbf16>, vector<16x8xbf16>, vector<16x16xf32> -> vector<16x16xf32>
    %cst_22 = arith.constant dense<0xFF800000> : vector<16xf32>
    %58 = vector.multi_reduction <maximumf>, %57, %cst_22 [1] : vector<16x16xf32> to vector<16xf32>
    %59 = vector.shape_cast %58 : vector<16xf32> to vector<16x1xf32>
    %60 = arith.maximumf %4, %59 : vector<16x1xf32>
    %61 = arith.subf %4, %60 : vector<16x1xf32>
    %62 = math.exp %61 : vector<16x1xf32>
    %63 = vector.broadcast %60 : vector<16x1xf32> to vector<16x16xf32>
    %64 = arith.subf %57, %63 : vector<16x16xf32>
    %65 = math.exp %64 : vector<16x16xf32>
    %66 = arith.mulf %62, %5 : vector<16x1xf32>
    %cst_23 = arith.constant dense<0.000000e+00> : vector<16xf32>
    %67 = vector.multi_reduction <add>, %65, %cst_23 [1] : vector<16x16xf32> to vector<16xf32>
    %68 = vector.shape_cast %67 : vector<16xf32> to vector<16x1xf32>
    %69 = arith.addf %66, %68 : vector<16x1xf32>
    %70 = vector.broadcast %62 : vector<16x1xf32> to vector<16x8xf32>
    %71 = arith.mulf %70, %8 : vector<16x8xf32>
    %72 = arith.truncf %65 : vector<16x16xf32> to vector<16x16xbf16>
    %cst_24 = arith.constant dense<0.000000e+00> : vector<16x8xf32>
    %73 = tpu.matmul %72, %56, %cst_24 {dimension_numbers = #tpu.dot_dimension_numbers<[1], [0], [0], [1], [0, 0, 1, 1], [], []>} : vector<16x16xbf16>, vector<16x8xbf16>, vector<16x8xf32> -> vector<16x8xf32>
    %74 = arith.addf %71, %73 : vector<16x8xf32>
    %75 = vector.extract_strided_slice %3 {offsets = [0, 24], sizes = [16, 8], strides = [1, 1]} : vector<16x32xbf16> to vector<16x8xbf16>
    %76 = vector.extract_strided_slice %11 {offsets = [0, 24], sizes = [16, 8], strides = [1, 1]} : vector<16x64xbf16> to vector<16x8xbf16>
    %77 = vector.extract_strided_slice %11 {offsets = [0, 56], sizes = [16, 8], strides = [1, 1]} : vector<16x64xbf16> to vector<16x8xbf16>
    %cst_25 = arith.constant dense<0.000000e+00> : vector<16x16xf32>
    %78 = tpu.matmul %75, %76, %cst_25 {dimension_numbers = #tpu.dot_dimension_numbers<[1], [1], [0], [0], [0, 0, 1, 0], [], []>} : vector<16x8xbf16>, vector<16x8xbf16>, vector<16x16xf32> -> vector<16x16xf32>
    %cst_26 = arith.constant dense<0xFF800000> : vector<16xf32>
    %79 = vector.multi_reduction <maximumf>, %78, %cst_26 [1] : vector<16x16xf32> to vector<16xf32>
    %80 = vector.shape_cast %79 : vector<16xf32> to vector<16x1xf32>
    %81 = arith.maximumf %4, %80 : vector<16x1xf32>
    %82 = arith.subf %4, %81 : vector<16x1xf32>
    %83 = math.exp %82 : vector<16x1xf32>
    %84 = vector.broadcast %81 : vector<16x1xf32> to vector<16x16xf32>
    %85 = arith.subf %78, %84 : vector<16x16xf32>
    %86 = math.exp %85 : vector<16x16xf32>
    %87 = arith.mulf %83, %5 : vector<16x1xf32>
    %cst_27 = arith.constant dense<0.000000e+00> : vector<16xf32>
    %88 = vector.multi_reduction <add>, %86, %cst_27 [1] : vector<16x16xf32> to vector<16xf32>
    %89 = vector.shape_cast %88 : vector<16xf32> to vector<16x1xf32>
    %90 = arith.addf %87, %89 : vector<16x1xf32>
    %91 = vector.broadcast %83 : vector<16x1xf32> to vector<16x8xf32>
    %92 = arith.mulf %91, %9 : vector<16x8xf32>
    %93 = arith.truncf %86 : vector<16x16xf32> to vector<16x16xbf16>
    %cst_28 = arith.constant dense<0.000000e+00> : vector<16x8xf32>
    %94 = tpu.matmul %93, %77, %cst_28 {dimension_numbers = #tpu.dot_dimension_numbers<[1], [0], [0], [1], [0, 0, 1, 1], [], []>} : vector<16x16xbf16>, vector<16x8xbf16>, vector<16x8xf32> -> vector<16x8xf32>
    %95 = arith.addf %92, %94 : vector<16x8xf32>
    %cst_29 = arith.constant 0.000000e+00 : f32
    %96 = vector.broadcast %cst_29 : f32 to vector<16x32xf32>
    %97 = tpu.reciprocal %27 {approx = true} : vector<16x1xf32> -> vector<16x1xf32>
    %98 = vector.broadcast %97 : vector<16x1xf32> to vector<16x8xf32>
    %99 = arith.mulf %32, %98 : vector<16x8xf32>
    %100 = arith.truncf %99 : vector<16x8xf32> to vector<16x8xbf16>
    %c0_30 = arith.constant 0 : index
    %c0_31 = arith.constant 0 : index
    %101 = vector.load %arg5[%c0_30, %c0_31] : memref<32x32xbf16, #tpu.memory_space<vmem>>, vector<8x32xbf16>
    %cst_32 = arith.constant dense<0.000000e+00> : vector<16x32xf32>
    %102 = tpu.matmul %100, %101, %cst_32 {dimension_numbers = #tpu.dot_dimension_numbers<[1], [0], [0], [1], [0, 0, 1, 1], [], []>} : vector<16x8xbf16>, vector<8x32xbf16>, vector<16x32xf32> -> vector<16x32xf32>
    %103 = arith.addf %96, %102 : vector<16x32xf32>
    %104 = tpu.reciprocal %48 {approx = true} : vector<16x1xf32> -> vector<16x1xf32>
    %105 = vector.broadcast %104 : vector<16x1xf32> to vector<16x8xf32>
    %106 = arith.mulf %53, %105 : vector<16x8xf32>
    %107 = arith.truncf %106 : vector<16x8xf32> to vector<16x8xbf16>
    %c8 = arith.constant 8 : index
    %c0_33 = arith.constant 0 : index
    %108 = vector.load %arg5[%c8, %c0_33] : memref<32x32xbf16, #tpu.memory_space<vmem>>, vector<8x32xbf16>
    %cst_34 = arith.constant dense<0.000000e+00> : vector<16x32xf32>
    %109 = tpu.matmul %107, %108, %cst_34 {dimension_numbers = #tpu.dot_dimension_numbers<[1], [0], [0], [1], [0, 0, 1, 1], [], []>} : vector<16x8xbf16>, vector<8x32xbf16>, vector<16x32xf32> -> vector<16x32xf32>
    %110 = arith.addf %103, %109 : vector<16x32xf32>
    %111 = tpu.reciprocal %69 {approx = true} : vector<16x1xf32> -> vector<16x1xf32>
    %112 = vector.broadcast %111 : vector<16x1xf32> to vector<16x8xf32>
    %113 = arith.mulf %74, %112 : vector<16x8xf32>
    %114 = arith.truncf %113 : vector<16x8xf32> to vector<16x8xbf16>
    %c16 = arith.constant 16 : index
    %c0_35 = arith.constant 0 : index
    %115 = vector.load %arg5[%c16, %c0_35] : memref<32x32xbf16, #tpu.memory_space<vmem>>, vector<8x32xbf16>
    %cst_36 = arith.constant dense<0.000000e+00> : vector<16x32xf32>
    %116 = tpu.matmul %114, %115, %cst_36 {dimension_numbers = #tpu.dot_dimension_numbers<[1], [0], [0], [1], [0, 0, 1, 1], [], []>} : vector<16x8xbf16>, vector<8x32xbf16>, vector<16x32xf32> -> vector<16x32xf32>
    %117 = arith.addf %110, %116 : vector<16x32xf32>
    %118 = tpu.reciprocal %90 {approx = true} : vector<16x1xf32> -> vector<16x1xf32>
    %119 = vector.broadcast %118 : vector<16x1xf32> to vector<16x8xf32>
    %120 = arith.mulf %95, %119 : vector<16x8xf32>
    %121 = arith.truncf %120 : vector<16x8xf32> to vector<16x8xbf16>
    %c24 = arith.constant 24 : index
    %c0_37 = arith.constant 0 : index
    %122 = vector.load %arg5[%c24, %c0_37] : memref<32x32xbf16, #tpu.memory_space<vmem>>, vector<8x32xbf16>
    %cst_38 = arith.constant dense<0.000000e+00> : vector<16x32xf32>
    %123 = tpu.matmul %121, %122, %cst_38 {dimension_numbers = #tpu.dot_dimension_numbers<[1], [0], [0], [1], [0, 0, 1, 1], [], []>} : vector<16x8xbf16>, vector<8x32xbf16>, vector<16x32xf32> -> vector<16x32xf32>
    %124 = arith.addf %117, %123 : vector<16x32xf32>
    %c0_39 = arith.constant 0 : index
    %c0_40 = arith.constant 0 : index
    %125 = vector.load %arg6[%c0_39, %c0_40] : memref<1x32xf32, #tpu.memory_space<vmem>>, vector<1x32xf32>
    %126 = vector.broadcast %125 : vector<1x32xf32> to vector<16x32xf32>
    %127 = arith.addf %124, %126 : vector<16x32xf32>
    %128 = arith.truncf %1 : vector<16x32xf32> to vector<16x32xbf16>
    %c0_41 = arith.constant 0 : index
    %c0_42 = arith.constant 0 : index
    %129 = vector.load %arg7[%c0_41, %c0_42] : memref<32x64xbf16, #tpu.memory_space<vmem>>, vector<32x64xbf16>
    %cst_43 = arith.constant dense<0.000000e+00> : vector<16x64xf32>
    %130 = tpu.matmul %128, %129, %cst_43 {dimension_numbers = #tpu.dot_dimension_numbers<[1], [0], [0], [1], [0, 0, 1, 1], [], []>} : vector<16x32xbf16>, vector<32x64xbf16>, vector<16x64xf32> -> vector<16x64xf32>
    %131 = arith.truncf %127 : vector<16x32xf32> to vector<16x32xbf16>
    %c0_44 = arith.constant 0 : index
    %c0_45 = arith.constant 0 : index
    %132 = vector.load %arg8[%c0_44, %c0_45] : memref<32x64xbf16, #tpu.memory_space<vmem>>, vector<32x64xbf16>
    %cst_46 = arith.constant dense<0.000000e+00> : vector<16x64xf32>
    %133 = tpu.matmul %131, %132, %cst_46 {dimension_numbers = #tpu.dot_dimension_numbers<[1], [0], [0], [1], [0, 0, 1, 1], [], []>} : vector<16x32xbf16>, vector<32x64xbf16>, vector<16x64xf32> -> vector<16x64xf32>
    %134 = arith.addf %130, %133 : vector<16x64xf32>
    %c0_47 = arith.constant 0 : index
    %c0_48 = arith.constant 0 : index
    %135 = vector.load %arg9[%c0_47, %c0_48] : memref<1x64xf32, #tpu.memory_space<vmem>>, vector<1x64xf32>
    %136 = vector.broadcast %135 : vector<1x64xf32> to vector<16x64xf32>
    %137 = arith.addf %134, %136 : vector<16x64xf32>
    %138 = arith.truncf %137 : vector<16x64xf32> to vector<16x64xbf16>
    %c0_49 = arith.constant 0 : index
    %c0_50 = arith.constant 0 : index
    %c0_51 = arith.constant 0 : index
    %139 = vector.load %arg10[%c0_49, %c0_50, %c0_51] : memref<1x16x64xbf16, #tpu.memory_space<vmem>>, vector<1x16x64xbf16>
    %140 = vector.shape_cast %139 : vector<1x16x64xbf16> to vector<16x64xbf16>
    %141 = vector.shape_cast %138 : vector<16x64xbf16> to vector<1x16x64xbf16>
    tpu.vector_store %arg10[%c0_49, %c0_50, %c0_51], %141 {strides = array<i32>} : memref<1x16x64xbf16, #tpu.memory_space<vmem>>, vector<1x16x64xbf16>,
    %cst_52 = arith.constant dense<0.000000e+00> : vector<64xf32>
    %142 = vector.multi_reduction <add>, %137, %cst_52 [0] : vector<16x64xf32> to vector<64xf32>
    %143 = vector.shape_cast %142 : vector<64xf32> to vector<1x64xf32>
    %144 = arith.mulf %137, %137 : vector<16x64xf32>
    %cst_53 = arith.constant dense<0.000000e+00> : vector<64xf32>
    %145 = vector.multi_reduction <add>, %144, %cst_53 [0] : vector<16x64xf32> to vector<64xf32>
    %146 = vector.shape_cast %145 : vector<64xf32> to vector<1x64xf32>
    %147 = tpu.concatenate %143, %146 in 0 : vector<1x64xf32>, vector<1x64xf32> -> vector<2x64xf32>
    %c0_54 = arith.constant 0 : index
    %c0_55 = arith.constant 0 : index
    %c0_56 = arith.constant 0 : index
    %c0_57 = arith.constant 0 : index
    %148 = vector.load %arg11[%c0_54, %c0_55, %c0_56, %c0_57] : memref<1x1x2x64xf32, #tpu.memory_space<vmem>>, vector<1x1x2x64xf32>
    %149 = vector.shape_cast %148 : vector<1x1x2x64xf32> to vector<2x64xf32>
    %150 = vector.shape_cast %147 : vector<2x64xf32> to vector<1x1x2x64xf32>
    tpu.vector_store %arg11[%c0_54, %c0_55, %c0_56, %c0_57], %150 {strides = array<i32>} : memref<1x1x2x64xf32, #tpu.memory_space<vmem>>, vector<1x1x2x64xf32>,
    return
  }
  func.func @transform_0(%arg0: i32, %arg1: i32) -> (i32, i32, i32) {
    %c0_i32 = arith.constant 0 : i32
    %c0_i32_0 = arith.constant 0 : i32
    return %arg0, %arg1, %c0_i32 : i32, i32, i32
  }
  func.func @transform_1(%arg0: i32, %arg1: i32) -> (i32, i32, i32) {
    %c0_i32 = arith.constant 0 : i32
    %c0_i32_0 = arith.constant 0 : i32
    return %arg0, %arg1, %c0_i32 : i32, i32, i32
  }
  func.func @transform_2(%arg0: i32, %arg1: i32) -> (i32, i32, i32) {
    %c0_i32 = arith.constant 0 : i32
    %c0_i32_0 = arith.constant 0 : i32
    %c0_i32_1 = arith.constant 0 : i32
    return %arg0, %c0_i32, %c0_i32_0 : i32, i32, i32
  }
  func.func @transform_3(%arg0: i32, %arg1: i32) -> (i32, i32) {
    %c0_i32 = arith.constant 0 : i32
    %c0_i32_0 = arith.constant 0 : i32
    %c0_i32_1 = arith.constant 0 : i32
    return %c0_i32, %c0_i32_0 : i32, i32
  }
  func.func @transform_4(%arg0: i32, %arg1: i32) -> (i32, i32) {
    %c0_i32 = arith.constant 0 : i32
    %c0_i32_0 = arith.constant 0 : i32
    %c0_i32_1 = arith.constant 0 : i32
    return %c0_i32, %c0_i32_0 : i32, i32
  }
  func.func @transform_5(%arg0: i32, %arg1: i32) -> (i32, i32) {
    %c0_i32 = arith.constant 0 : i32
    %c0_i32_0 = arith.constant 0 : i32
    %c0_i32_1 = arith.constant 0 : i32
    return %c0_i32, %c0_i32_0 : i32, i32
  }
  func.func @transform_6(%arg0: i32, %arg1: i32) -> (i32, i32) {
    %c0_i32 = arith.constant 0 : i32
    %c0_i32_0 = arith.constant 0 : i32
    %c0_i32_1 = arith.constant 0 : i32
    return %c0_i32, %c0_i32_0 : i32, i32
  }
  func.func @transform_7(%arg0: i32, %arg1: i32) -> (i32, i32) {
    %c0_i32 = arith.constant 0 : i32
    %c0_i32_0 = arith.constant 0 : i32
    %c0_i32_1 = arith.constant 0 : i32
    return %c0_i32, %c0_i32_0 : i32, i32
  }
  func.func @transform_8(%arg0: i32, %arg1: i32) -> (i32, i32, i32) {
    %c0_i32 = arith.constant 0 : i32
    %c0_i32_0 = arith.constant 0 : i32
    return %arg0, %arg1, %c0_i32 : i32, i32, i32
  }
  func.func @transform_9(%arg0: i32, %arg1: i32) -> (i32, i32, i32, i32) {
    %c0_i32 = arith.constant 0 : i32
    %c0_i32_0 = arith.constant 0 : i32
    %c0_i32_1 = arith.constant 0 : i32
    return %arg0, %arg1, %c0_i32, %c0_i32_0 : i32, i32, i32, i32
  }
}

module attributes {stable_mosaic.version = 11 : i64} {
  func.func @_mm_dual_stats_kernel(%arg0: i32, %arg1: memref<32x32xf32, #tpu.memory_space<vmem>>, %arg2: memref<32x32xbf16, #tpu.memory_space<vmem>>, %arg3: memref<1x32xf32, #tpu.memory_space<vmem>>, %arg4: memref<32x32xbf16, #tpu.memory_space<vmem>>, %arg5: memref<1x32xf32, #tpu.memory_space<vmem>>, %arg6: memref<32x32xbf16, #tpu.memory_space<vmem>>, %arg7: memref<1x2x32xf32, #tpu.memory_space<vmem>>, %arg8: memref<32x32xbf16, #tpu.memory_space<vmem>>, %arg9: memref<1x2x32xf32, #tpu.memory_space<vmem>>) attributes {dimension_semantics = [#tpu.dimension_semantics<parallel>], iteration_bounds = array<i64: 1>, scalar_prefetch = 0 : i64, scratch_operands = 0 : i64, tpu.core_type = #tpu.core_type<tc>, window_params = [{transform_indices = @transform_0, window_bounds = array<i64: 32, 32>}, {pipeline_mode = #tpu.pipeline_mode<synchronous>, transform_indices = @transform_1, window_bounds = array<i64: 32, 32>}, {pipeline_mode = #tpu.pipeline_mode<synchronous>, transform_indices = @transform_2, window_bounds = array<i64: 1, 32>}, {pipeline_mode = #tpu.pipeline_mode<synchronous>, transform_indices = @transform_3, window_bounds = array<i64: 32, 32>}, {pipeline_mode = #tpu.pipeline_mode<synchronous>, transform_indices = @transform_4, window_bounds = array<i64: 1, 32>}, {transform_indices = @transform_5, window_bounds = array<i64: 32, 32>}, {transform_indices = @transform_6, window_bounds = array<i64: 1, 2, 32>}, {transform_indices = @transform_7, window_bounds = array<i64: 32, 32>}, {transform_indices = @transform_8, window_bounds = array<i64: 1, 2, 32>}]} {
    %c0 = arith.constant 0 : index
    %c0_0 = arith.constant 0 : index
    %0 = vector.load %arg1[%c0, %c0_0] : memref<32x32xf32, #tpu.memory_space<vmem>>, vector<32x32xf32>
    %1 = arith.truncf %0 : vector<32x32xf32> to vector<32x32xbf16>
    %c0_1 = arith.constant 0 : index
    %c0_2 = arith.constant 0 : index
    %2 = vector.load %arg2[%c0_1, %c0_2] : memref<32x32xbf16, #tpu.memory_space<vmem>>, vector<32x32xbf16>
    %cst = arith.constant dense<0.000000e+00> : vector<32x32xf32>
    %3 = tpu.matmul %1, %2, %cst {dimension_numbers = #tpu.dot_dimension_numbers<[1], [0], [0], [1], [0, 0, 1, 1], [], []>} : vector<32x32xbf16>, vector<32x32xbf16>, vector<32x32xf32> -> vector<32x32xf32>
    %c0_3 = arith.constant 0 : index
    %c0_4 = arith.constant 0 : index
    %4 = vector.load %arg3[%c0_3, %c0_4] : memref<1x32xf32, #tpu.memory_space<vmem>>, vector<1x32xf32>
    %5 = vector.broadcast %4 : vector<1x32xf32> to vector<32x32xf32>
    %6 = arith.addf %3, %5 : vector<32x32xf32>
    %c0_5 = arith.constant 0 : index
    %c0_6 = arith.constant 0 : index
    %7 = vector.load %arg4[%c0_5, %c0_6] : memref<32x32xbf16, #tpu.memory_space<vmem>>, vector<32x32xbf16>
    %cst_7 = arith.constant dense<0.000000e+00> : vector<32x32xf32>
    %8 = tpu.matmul %1, %7, %cst_7 {dimension_numbers = #tpu.dot_dimension_numbers<[1], [0], [0], [1], [0, 0, 1, 1], [], []>} : vector<32x32xbf16>, vector<32x32xbf16>, vector<32x32xf32> -> vector<32x32xf32>
    %c0_8 = arith.constant 0 : index
    %c0_9 = arith.constant 0 : index
    %9 = vector.load %arg5[%c0_8, %c0_9] : memref<1x32xf32, #tpu.memory_space<vmem>>, vector<1x32xf32>
    %10 = vector.broadcast %9 : vector<1x32xf32> to vector<32x32xf32>
    %11 = arith.addf %8, %10 : vector<32x32xf32>
    %12 = arith.truncf %6 : vector<32x32xf32> to vector<32x32xbf16>
    %c0_10 = arith.constant 0 : index
    %c0_11 = arith.constant 0 : index
    %13 = vector.load %arg6[%c0_10, %c0_11] : memref<32x32xbf16, #tpu.memory_space<vmem>>, vector<32x32xbf16>
    tpu.vector_store %arg6[%c0_10, %c0_11], %12 {strides = array<i32>} : memref<32x32xbf16, #tpu.memory_space<vmem>>, vector<32x32xbf16>,
    %14 = arith.truncf %11 : vector<32x32xf32> to vector<32x32xbf16>
    %c0_12 = arith.constant 0 : index
    %c0_13 = arith.constant 0 : index
    %15 = vector.load %arg8[%c0_12, %c0_13] : memref<32x32xbf16, #tpu.memory_space<vmem>>, vector<32x32xbf16>
    tpu.vector_store %arg8[%c0_12, %c0_13], %14 {strides = array<i32>} : memref<32x32xbf16, #tpu.memory_space<vmem>>, vector<32x32xbf16>,
    %cst_14 = arith.constant dense<0.000000e+00> : vector<32xf32>
    %16 = vector.multi_reduction <add>, %6, %cst_14 [0] : vector<32x32xf32> to vector<32xf32>
    %17 = vector.shape_cast %16 : vector<32xf32> to vector<1x32xf32>
    %18 = arith.mulf %6, %6 : vector<32x32xf32>
    %cst_15 = arith.constant dense<0.000000e+00> : vector<32xf32>
    %19 = vector.multi_reduction <add>, %18, %cst_15 [0] : vector<32x32xf32> to vector<32xf32>
    %20 = vector.shape_cast %19 : vector<32xf32> to vector<1x32xf32>
    %21 = tpu.concatenate %17, %20 in 0 : vector<1x32xf32>, vector<1x32xf32> -> vector<2x32xf32>
    %c0_16 = arith.constant 0 : index
    %c0_17 = arith.constant 0 : index
    %c0_18 = arith.constant 0 : index
    %22 = vector.load %arg7[%c0_16, %c0_17, %c0_18] : memref<1x2x32xf32, #tpu.memory_space<vmem>>, vector<1x2x32xf32>
    %23 = vector.shape_cast %22 : vector<1x2x32xf32> to vector<2x32xf32>
    %24 = vector.shape_cast %21 : vector<2x32xf32> to vector<1x2x32xf32>
    tpu.vector_store %arg7[%c0_16, %c0_17, %c0_18], %24 {strides = array<i32>} : memref<1x2x32xf32, #tpu.memory_space<vmem>>, vector<1x2x32xf32>,
    %cst_19 = arith.constant dense<0.000000e+00> : vector<32xf32>
    %25 = vector.multi_reduction <add>, %11, %cst_19 [0] : vector<32x32xf32> to vector<32xf32>
    %26 = vector.shape_cast %25 : vector<32xf32> to vector<1x32xf32>
    %27 = arith.mulf %11, %11 : vector<32x32xf32>
    %cst_20 = arith.constant dense<0.000000e+00> : vector<32xf32>
    %28 = vector.multi_reduction <add>, %27, %cst_20 [0] : vector<32x32xf32> to vector<32xf32>
    %29 = vector.shape_cast %28 : vector<32xf32> to vector<1x32xf32>
    %30 = tpu.concatenate %26, %29 in 0 : vector<1x32xf32>, vector<1x32xf32> -> vector<2x32xf32>
    %c0_21 = arith.constant 0 : index
    %c0_22 = arith.constant 0 : index
    %c0_23 = arith.constant 0 : index
    %31 = vector.load %arg9[%c0_21, %c0_22, %c0_23] : memref<1x2x32xf32, #tpu.memory_space<vmem>>, vector<1x2x32xf32>
    %32 = vector.shape_cast %31 : vector<1x2x32xf32> to vector<2x32xf32>
    %33 = vector.shape_cast %30 : vector<2x32xf32> to vector<1x2x32xf32>
    tpu.vector_store %arg9[%c0_21, %c0_22, %c0_23], %33 {strides = array<i32>} : memref<1x2x32xf32, #tpu.memory_space<vmem>>, vector<1x2x32xf32>,
    return
  }
  func.func @transform_0(%arg0: i32) -> (i32, i32) {
    %c0_i32 = arith.constant 0 : i32
    %c0_i32_0 = arith.constant 0 : i32
    return %arg0, %c0_i32 : i32, i32
  }
  func.func @transform_1(%arg0: i32) -> (i32, i32) {
    %c0_i32 = arith.constant 0 : i32
    %c0_i32_0 = arith.constant 0 : i32
    %c0_i32_1 = arith.constant 0 : i32
    return %c0_i32, %c0_i32_0 : i32, i32
  }
  func.func @transform_2(%arg0: i32) -> (i32, i32) {
    %c0_i32 = arith.constant 0 : i32
    %c0_i32_0 = arith.constant 0 : i32
    %c0_i32_1 = arith.constant 0 : i32
    return %c0_i32, %c0_i32_0 : i32, i32
  }
  func.func @transform_3(%arg0: i32) -> (i32, i32) {
    %c0_i32 = arith.constant 0 : i32
    %c0_i32_0 = arith.constant 0 : i32
    %c0_i32_1 = arith.constant 0 : i32
    return %c0_i32, %c0_i32_0 : i32, i32
  }
  func.func @transform_4(%arg0: i32) -> (i32, i32) {
    %c0_i32 = arith.constant 0 : i32
    %c0_i32_0 = arith.constant 0 : i32
    %c0_i32_1 = arith.constant 0 : i32
    return %c0_i32, %c0_i32_0 : i32, i32
  }
  func.func @transform_5(%arg0: i32) -> (i32, i32) {
    %c0_i32 = arith.constant 0 : i32
    %c0_i32_0 = arith.constant 0 : i32
    return %arg0, %c0_i32 : i32, i32
  }
  func.func @transform_6(%arg0: i32) -> (i32, i32, i32) {
    %c0_i32 = arith.constant 0 : i32
    %c0_i32_0 = arith.constant 0 : i32
    %c0_i32_1 = arith.constant 0 : i32
    return %arg0, %c0_i32, %c0_i32_0 : i32, i32, i32
  }
  func.func @transform_7(%arg0: i32) -> (i32, i32) {
    %c0_i32 = arith.constant 0 : i32
    %c0_i32_0 = arith.constant 0 : i32
    return %arg0, %c0_i32 : i32, i32
  }
  func.func @transform_8(%arg0: i32) -> (i32, i32, i32) {
    %c0_i32 = arith.constant 0 : i32
    %c0_i32_0 = arith.constant 0 : i32
    %c0_i32_1 = arith.constant 0 : i32
    return %arg0, %c0_i32, %c0_i32_0 : i32, i32, i32
  }
}

module attributes {stable_mosaic.version = 11 : i64} {
  func.func @_bn_relu_mm_kernel(%arg0: i32, %arg1: memref<32x32xbf16, #tpu.memory_space<vmem>>, %arg2: memref<1x32xf32, #tpu.memory_space<vmem>>, %arg3: memref<1x32xf32, #tpu.memory_space<vmem>>, %arg4: memref<32x128xbf16, #tpu.memory_space<vmem>>, %arg5: memref<1x128xf32, #tpu.memory_space<vmem>>, %arg6: memref<32x128xf32, #tpu.memory_space<vmem>>) attributes {dimension_semantics = [#tpu.dimension_semantics<parallel>], iteration_bounds = array<i64: 1>, scalar_prefetch = 0 : i64, scratch_operands = 0 : i64, tpu.core_type = #tpu.core_type<tc>, window_params = [{transform_indices = @transform_0, window_bounds = array<i64: 32, 32>}, {pipeline_mode = #tpu.pipeline_mode<synchronous>, transform_indices = @transform_1, window_bounds = array<i64: 1, 32>}, {pipeline_mode = #tpu.pipeline_mode<synchronous>, transform_indices = @transform_2, window_bounds = array<i64: 1, 32>}, {pipeline_mode = #tpu.pipeline_mode<synchronous>, transform_indices = @transform_3, window_bounds = array<i64: 32, 128>}, {pipeline_mode = #tpu.pipeline_mode<synchronous>, transform_indices = @transform_4, window_bounds = array<i64: 1, 128>}, {transform_indices = @transform_5, window_bounds = array<i64: 32, 128>}]} {
    %c0 = arith.constant 0 : index
    %c0_0 = arith.constant 0 : index
    %0 = vector.load %arg1[%c0, %c0_0] : memref<32x32xbf16, #tpu.memory_space<vmem>>, vector<32x32xbf16>
    %1 = arith.extf %0 : vector<32x32xbf16> to vector<32x32xf32>
    %c0_1 = arith.constant 0 : index
    %c0_2 = arith.constant 0 : index
    %2 = vector.load %arg2[%c0_1, %c0_2] : memref<1x32xf32, #tpu.memory_space<vmem>>, vector<1x32xf32>
    %3 = vector.broadcast %2 : vector<1x32xf32> to vector<32x32xf32>
    %4 = arith.subf %1, %3 : vector<32x32xf32>
    %c0_3 = arith.constant 0 : index
    %c0_4 = arith.constant 0 : index
    %5 = vector.load %arg3[%c0_3, %c0_4] : memref<1x32xf32, #tpu.memory_space<vmem>>, vector<1x32xf32>
    %6 = vector.broadcast %5 : vector<1x32xf32> to vector<32x32xf32>
    %7 = arith.mulf %4, %6 : vector<32x32xf32>
    %cst = arith.constant 0.000000e+00 : f32
    %8 = vector.broadcast %cst : f32 to vector<32x32xf32>
    %9 = arith.maximumf %7, %8 : vector<32x32xf32>
    %10 = arith.truncf %9 : vector<32x32xf32> to vector<32x32xbf16>
    %c0_5 = arith.constant 0 : index
    %c0_6 = arith.constant 0 : index
    %11 = vector.load %arg4[%c0_5, %c0_6] : memref<32x128xbf16, #tpu.memory_space<vmem>>, vector<32x128xbf16>
    %cst_7 = arith.constant dense<0.000000e+00> : vector<32x128xf32>
    %12 = tpu.matmul %10, %11, %cst_7 {dimension_numbers = #tpu.dot_dimension_numbers<[1], [0], [0], [1], [0, 0, 1, 1], [], []>} : vector<32x32xbf16>, vector<32x128xbf16>, vector<32x128xf32> -> vector<32x128xf32>
    %c0_8 = arith.constant 0 : index
    %c0_9 = arith.constant 0 : index
    %13 = vector.load %arg5[%c0_8, %c0_9] : memref<1x128xf32, #tpu.memory_space<vmem>>, vector<1x128xf32>
    %14 = vector.broadcast %13 : vector<1x128xf32> to vector<32x128xf32>
    %15 = arith.addf %12, %14 : vector<32x128xf32>
    %cst_10 = arith.constant -1.000000e+00 : f32
    %cst_11 = arith.constant 1.000000e+00 : f32
    %16 = vector.broadcast %cst_10 : f32 to vector<32x128xf32>
    %17 = arith.maximumf %16, %15 : vector<32x128xf32>
    %18 = vector.broadcast %cst_11 : f32 to vector<32x128xf32>
    %19 = arith.minimumf %18, %17 : vector<32x128xf32>
    %c0_12 = arith.constant 0 : index
    %c0_13 = arith.constant 0 : index
    %20 = vector.load %arg6[%c0_12, %c0_13] : memref<32x128xf32, #tpu.memory_space<vmem>>, vector<32x128xf32>
    tpu.vector_store %arg6[%c0_12, %c0_13], %19 {strides = array<i32>} : memref<32x128xf32, #tpu.memory_space<vmem>>, vector<32x128xf32>,
    return
  }
  func.func @transform_0(%arg0: i32) -> (i32, i32) {
    %c0_i32 = arith.constant 0 : i32
    %c0_i32_0 = arith.constant 0 : i32
    return %arg0, %c0_i32 : i32, i32
  }
  func.func @transform_1(%arg0: i32) -> (i32, i32) {
    %c0_i32 = arith.constant 0 : i32
    %c0_i32_0 = arith.constant 0 : i32
    %c0_i32_1 = arith.constant 0 : i32
    return %c0_i32, %c0_i32_0 : i32, i32
  }
  func.func @transform_2(%arg0: i32) -> (i32, i32) {
    %c0_i32 = arith.constant 0 : i32
    %c0_i32_0 = arith.constant 0 : i32
    %c0_i32_1 = arith.constant 0 : i32
    return %c0_i32, %c0_i32_0 : i32, i32
  }
  func.func @transform_3(%arg0: i32) -> (i32, i32) {
    %c0_i32 = arith.constant 0 : i32
    %c0_i32_0 = arith.constant 0 : i32
    %c0_i32_1 = arith.constant 0 : i32
    return %c0_i32, %c0_i32_0 : i32, i32
  }
  func.func @transform_4(%arg0: i32) -> (i32, i32) {
    %c0_i32 = arith.constant 0 : i32
    %c0_i32_0 = arith.constant 0 : i32
    %c0_i32_1 = arith.constant 0 : i32
    return %c0_i32, %c0_i32_0 : i32, i32
  }
  func.func @transform_5(%arg0: i32) -> (i32, i32) {
    %c0_i32 = arith.constant 0 : i32
    %c0_i32_0 = arith.constant 0 : i32
    return %arg0, %c0_i32 : i32, i32
  }
}

module attributes {stable_mosaic.version = 11 : i64} {
  func.func @_bn_relu_kernel(%arg0: i32, %arg1: memref<32x32xbf16, #tpu.memory_space<vmem>>, %arg2: memref<1x32xf32, #tpu.memory_space<vmem>>, %arg3: memref<1x32xf32, #tpu.memory_space<vmem>>, %arg4: memref<32x32xf32, #tpu.memory_space<vmem>>) attributes {dimension_semantics = [#tpu.dimension_semantics<parallel>], iteration_bounds = array<i64: 1>, scalar_prefetch = 0 : i64, scratch_operands = 0 : i64, tpu.core_type = #tpu.core_type<tc>, window_params = [{transform_indices = @transform_0, window_bounds = array<i64: 32, 32>}, {pipeline_mode = #tpu.pipeline_mode<synchronous>, transform_indices = @transform_1, window_bounds = array<i64: 1, 32>}, {pipeline_mode = #tpu.pipeline_mode<synchronous>, transform_indices = @transform_2, window_bounds = array<i64: 1, 32>}, {transform_indices = @transform_3, window_bounds = array<i64: 32, 32>}]} {
    %c0 = arith.constant 0 : index
    %c0_0 = arith.constant 0 : index
    %0 = vector.load %arg1[%c0, %c0_0] : memref<32x32xbf16, #tpu.memory_space<vmem>>, vector<32x32xbf16>
    %1 = arith.extf %0 : vector<32x32xbf16> to vector<32x32xf32>
    %c0_1 = arith.constant 0 : index
    %c0_2 = arith.constant 0 : index
    %2 = vector.load %arg2[%c0_1, %c0_2] : memref<1x32xf32, #tpu.memory_space<vmem>>, vector<1x32xf32>
    %3 = vector.broadcast %2 : vector<1x32xf32> to vector<32x32xf32>
    %4 = arith.subf %1, %3 : vector<32x32xf32>
    %c0_3 = arith.constant 0 : index
    %c0_4 = arith.constant 0 : index
    %5 = vector.load %arg3[%c0_3, %c0_4] : memref<1x32xf32, #tpu.memory_space<vmem>>, vector<1x32xf32>
    %6 = vector.broadcast %5 : vector<1x32xf32> to vector<32x32xf32>
    %7 = arith.mulf %4, %6 : vector<32x32xf32>
    %cst = arith.constant 0.000000e+00 : f32
    %8 = vector.broadcast %cst : f32 to vector<32x32xf32>
    %9 = arith.maximumf %7, %8 : vector<32x32xf32>
    %c0_5 = arith.constant 0 : index
    %c0_6 = arith.constant 0 : index
    %10 = vector.load %arg4[%c0_5, %c0_6] : memref<32x32xf32, #tpu.memory_space<vmem>>, vector<32x32xf32>
    tpu.vector_store %arg4[%c0_5, %c0_6], %9 {strides = array<i32>} : memref<32x32xf32, #tpu.memory_space<vmem>>, vector<32x32xf32>,
    return
  }
  func.func @transform_0(%arg0: i32) -> (i32, i32) {
    %c0_i32 = arith.constant 0 : i32
    %c0_i32_0 = arith.constant 0 : i32
    return %arg0, %c0_i32 : i32, i32
  }
  func.func @transform_1(%arg0: i32) -> (i32, i32) {
    %c0_i32 = arith.constant 0 : i32
    %c0_i32_0 = arith.constant 0 : i32
    %c0_i32_1 = arith.constant 0 : i32
    return %c0_i32, %c0_i32_0 : i32, i32
  }
  func.func @transform_2(%arg0: i32) -> (i32, i32) {
    %c0_i32 = arith.constant 0 : i32
    %c0_i32_0 = arith.constant 0 : i32
    %c0_i32_1 = arith.constant 0 : i32
    return %c0_i32, %c0_i32_0 : i32, i32
  }
  func.func @transform_3(%arg0: i32) -> (i32, i32) {
    %c0_i32 = arith.constant 0 : i32
    %c0_i32_0 = arith.constant 0 : i32
    return %arg0, %c0_i32 : i32, i32
  }
}

</mosaic_0001>

<bundles_post_ra>
// kernel: attentional_gnn_forward.15
= control target key start
LH: loop header
LB: loop body
LE: loop exit
PB: predicated region body
PF: predicated region fallthrough
CT: control target
= control target key end

     0   :  { %vm82_vm0 = vcmask 261120   ;;  %vm154_vm1 = vcmask 257024   ;;  %vm189_vm2 = vcmask 1040384   ;;  %vm191_vm3 = vcmask 254976   ;;  %s324_s3 = inlined_call_operand.vmem [shape: bf16[32,32], index: 3, kind: input, shape index: {}]   ;;  %s325_s0 = inlined_call_operand.vmem [shape: bf16[32,32], index: 0, kind: input, shape index: {}]   ;;  %s326_s1 = inlined_call_operand.vmem [shape: f32[1,32], index: 1, kind: input, shape index: {}]   ;;  %s327_s2 = inlined_call_operand.vmem [shape: f32[1,32], index: 2, kind: input, shape index: {}]   ;;  %s328_s4 = inlined_call_operand.vmem [shape: f32[1,32], index: 4, kind: input, shape index: {}]   ;;  %s329_s5 = inlined_call_operand.vmem [shape: bf16[32,32], index: 5, kind: output, shape index: {0}]   ;;  %s330_s6 = inlined_call_operand.vmem [shape: f32[1,2,32], index: 6, kind: output, shape index: {1}]  }
   0x1   :  { %v237_v0 = vld [vmem:[%s324_s3] sm:$0xff]   ;;  %v238_v1 = vld [vmem:[%s324_s3 + $0x8] sm:$0xff]  }
   0x2   :  { %229 = vmatprep.subr.bf16.mxu0 %v237_v0  ;;  %v217_v2 = vld [vmem:[%s325_s0] sm:$0xff]   ;;  %v224_v3 = vld [vmem:[%s325_s0 + $0x8] sm:$0xff]  }
   0x3   :  { %v201_v4 = vld [vmem:[%s326_s1] ss:$0 sm:$0xff]  ;;  %230 = vmatpush3.bf16.msra.mxu0 %v237_v0  ;;  %v218_v5 = vunpack.c.l.bf16 %v217_v2  ;;  %v219_v6 = vunpack.c.h.bf16 %v217_v2  ;;  %v222_v7 = vunpack.c.l.bf16 %v224_v3  ;;  %v223_v8 = vunpack.c.h.bf16 %v224_v3 }
   0x4   :  { %231 = vmatprep.subr.bf16.mxu0 %v238_v1  ;;  %v202_v9 = vld [vmem:[%s327_s2] ss:$0 sm:$0xff] }
   0x5   :  { %v38_v10 = vsub.f32 %v218_v5, %v201_v4  ;;  %v39_v11 = vsub.f32 %v219_v6, %v201_v4  ;;  %v40_v12 = vsub.f32 %v222_v7, %v201_v4  ;;  %v41_v13 = vsub.f32 %v223_v8, %v201_v4  ;;  %v203_v24 = vld [vmem:[%s328_s4] ss:$0 sm:$0xff] }
   0x7   :  { %232 = vmatpush3.bf16.msra.mxu0 %v238_v1  ;;  %v49_v14 = vmul.f32 %v202_v9, %v38_v10  ;;  %v50_v15 = vmul.f32 %v202_v9, %v39_v11  ;;  %v51_v16 = vmul.f32 %v202_v9, %v40_v12  ;;  %v52_v17 = vmul.f32 %v202_v9, %v41_v13 }
   0x9   :  { %v53_v18 = vmax.f32 %v49_v14, 0.0  ;;  %v54_v19 = vmax.f32 %v50_v15, 0.0  ;;  %v55_v20 = vmax.f32 %v51_v16, 0.0  ;;  %v56_v21 = vmax.f32 %v52_v17, 0.0 }
   0xb   :  { %v57_v22 = vpack.c.bf16 %v54_v19, %v53_v18  ;;  %v58_v23 = vpack.c.bf16 %v56_v21, %v55_v20 }
   0xd   :  { %233 = vmatprep.mubr.msk.bf16.mxu0 %vm82_vm0, %v57_v22 }
   0xe   :  { %234 = vmatmul.mubr.msk.bf16.vlgmr.msra.gmra.mrb[0].mxu0 %vm82_vm0, %v58_v23 }
  0xe1   :  { %v235_v25 = vpop.f32.mrb[0].mxu0 }
  0xe2   :  { %v132_v26 = vadd.f32 %v235_v25, %v203_v24  ;;  %v123_v27 = vpop.f32.mrb[1].mxu0 }
  0xe3   :  { %v124_v28 = vadd.f32 %v203_v24, %v123_v27  ;;  %v236_v29 = vpop.f32.mrb[2].mxu0 }
  0xe4   :  { %v214_v30 = vpack.c.bf16 %v132_v26, %v132_v26  ;;  %v135_v31 = vadd.f32 %v236_v29, %v203_v24  ;;  %v126_v32 = vpop.f32.mrb[3].mxu0  ;;  %v174_v36 = vmul.f32 %v132_v26, %v132_v26  ;;  %v162_v43 = vsel %vm82_vm0, %v132_v26, 0.0 }
  0xe5   :  { %v212_v33 = vpack.c.bf16 %v124_v28, %v124_v28  ;;  %v172_v34 = vmul.f32 %v124_v28, %v124_v28  ;;  %v127_v35 = vadd.f32 %v203_v24, %v126_v32  ;;  %v159_v38 = vsel %vm82_vm0, %v124_v28, 0.0 }
  0xe6   :  { %157 = vst.msk [vmem:[%s329_s5 + $0x8] sm:$0xf] %vm154_vm1, %v214_v30  ;;  %v215_v37 = vpack.c.bf16 %v135_v31, %v135_v31  ;;  %v175_v45 = vmul.f32 %v135_v31, %v135_v31  ;;  %v179_v49 = vsel %vm82_vm0, %v174_v36, 0.0  ;;  %v164_v50 = vsel %vm82_vm0, %v135_v31, 0.0 }
  0xe7   :  { %155 = vst.msk [vmem:[%s329_s5] sm:$0xf] %vm154_vm1, %v212_v33  ;;  %v213_v39 = vpack.c.bf16 %v127_v35, %v127_v35  ;;  %v160_v40 = vsel %vm82_vm0, %v127_v35, 0.0  ;;  %v173_v41 = vmul.f32 %v127_v35, %v127_v35  ;;  %v176_v44 = vsel %vm82_vm0, %v172_v34, 0.0 }
  0xe8   :  { %158 = vst.msk [vmem:[%s329_s5 + $0xc] sm:$0xf] %vm154_vm1, %v215_v37  ;;  %v161_v42 = vadd.f32 %v160_v40, %v159_v38  ;;  %v181_v53 = vsel %vm82_vm0, %v175_v45, 0.0 }
  0xe9   :  { %156 = vst.msk [vmem:[%s329_s5 + $0x4] sm:$0xf] %vm154_vm1, %v213_v39  ;;  %v177_v46 = vsel %vm82_vm0, %v173_v41, 0.0 }
  0xea   :  { %v163_v47 = vadd.f32 %v162_v43, %v161_v42  ;;  %v178_v48 = vadd.f32 %v177_v46, %v176_v44 }
  0xec   :  { %v165_v51 = vadd.f32 %v164_v50, %v163_v47  ;;  %v180_v52 = vadd.f32 %v179_v49, %v178_v48 }
  0xee   :  { %v166_v54 = vrot.slane %v165_v51, 4  ;;  %v182_v55 = vadd.f32 %v181_v53, %v180_v52 }
  0xf0   :  { %v167_v56 = vadd.f32 %v166_v54, %v165_v51  ;;  %v183_v57 = vrot.slane %v182_v55, 4 }
  0xf2   :  { %v168_v58 = vrot.slane %v167_v56, 2  ;;  %v184_v59 = vadd.f32 %v183_v57, %v182_v55 }
  0xf4   :  { %v169_v60 = vadd.f32 %v168_v58, %v167_v56  ;;  %v185_v61 = vrot.slane %v184_v59, 2 }
  0xf6   :  { %v170_v62 = vrot.slane %v169_v60, 1  ;;  %v186_v63 = vadd.f32 %v185_v61, %v184_v59 }
  0xf8   :  { %v187_v0 = vrot.slane %v186_v63, 1  ;;  %v171_v1 = vadd.f32 %v170_v62, %v169_v60 }
  0xfa   :  { %v188_v2 = vadd.f32 %v187_v0, %v186_v63 }
  0xfc   :  { %v190_v3 = vsel %vm189_vm2, %v171_v1, %v188_v2 }
  0xfd   :  { %192 = vst.msk [vmem:[%s330_s6] sm:$0x3] %vm191_vm3, %v190_v3 }

// kernel: attentional_gnn_forward.16
= control target key start
LH: loop header
LB: loop body
LE: loop exit
PB: predicated region body
PF: predicated region fallthrough
CT: control target
= control target key end

     0   :  { %vm80_vm0 = vcmask 261120   ;;  %s243_s3 = inlined_call_operand.vmem [shape: bf16[32,32], index: 3, kind: input, shape index: {}]   ;;  %s244_s0 = inlined_call_operand.vmem [shape: bf16[32,32], index: 0, kind: input, shape index: {}]   ;;  %s245_s1 = inlined_call_operand.vmem [shape: f32[1,32], index: 1, kind: input, shape index: {}]   ;;  %s246_s2 = inlined_call_operand.vmem [shape: f32[1,32], index: 2, kind: input, shape index: {}]   ;;  %s247_s4 = inlined_call_operand.vmem [shape: f32[1,32], index: 4, kind: input, shape index: {}]   ;;  %s248_s5 = inlined_call_operand.vmem [shape: f32[32,32], index: 5, kind: output, shape index: {}]  }
   0x1   :  { %v172_v0 = vld [vmem:[%s243_s3] sm:$0xff]   ;;  %v173_v1 = vld [vmem:[%s243_s3 + $0x8] sm:$0xff]  }
   0x2   :  { %164 = vmatprep.subr.bf16.mxu0 %v172_v0  ;;  %v152_v2 = vld [vmem:[%s244_s0] sm:$0xff]   ;;  %v159_v3 = vld [vmem:[%s244_s0 + $0x8] sm:$0xff]  }
   0x3   :  { %v144_v4 = vld [vmem:[%s245_s1] ss:$0 sm:$0xff]  ;;  %165 = vmatpush3.bf16.msra.mxu0 %v172_v0  ;;  %v153_v5 = vunpack.c.l.bf16 %v152_v2  ;;  %v154_v6 = vunpack.c.h.bf16 %v152_v2  ;;  %v157_v7 = vunpack.c.l.bf16 %v159_v3  ;;  %v158_v8 = vunpack.c.h.bf16 %v159_v3 }
   0x4   :  { %166 = vmatprep.subr.bf16.mxu0 %v173_v1  ;;  %v145_v9 = vld [vmem:[%s246_s2] ss:$0 sm:$0xff] }
   0x5   :  { %v36_v10 = vsub.f32 %v153_v5, %v144_v4  ;;  %v37_v11 = vsub.f32 %v154_v6, %v144_v4  ;;  %v38_v12 = vsub.f32 %v157_v7, %v144_v4  ;;  %v39_v13 = vsub.f32 %v158_v8, %v144_v4  ;;  %v146_v24 = vld [vmem:[%s247_s4] ss:$0 sm:$0xff] }
   0x7   :  { %167 = vmatpush3.bf16.msra.mxu0 %v173_v1  ;;  %v47_v14 = vmul.f32 %v145_v9, %v36_v10  ;;  %v48_v15 = vmul.f32 %v145_v9, %v37_v11  ;;  %v49_v16 = vmul.f32 %v145_v9, %v38_v12  ;;  %v50_v17 = vmul.f32 %v145_v9, %v39_v13 }
   0x9   :  { %v51_v18 = vmax.f32 %v47_v14, 0.0  ;;  %v52_v19 = vmax.f32 %v48_v15, 0.0  ;;  %v53_v20 = vmax.f32 %v49_v16, 0.0  ;;  %v54_v21 = vmax.f32 %v50_v17, 0.0 }
   0xb   :  { %v55_v22 = vpack.c.bf16 %v52_v19, %v51_v18  ;;  %v56_v23 = vpack.c.bf16 %v54_v21, %v53_v20 }
   0xd   :  { %168 = vmatprep.mubr.msk.bf16.mxu0 %vm80_vm0, %v55_v22 }
   0xe   :  { %169 = vmatmul.mubr.msk.bf16.vlgmr.msra.gmra.mrb[0].mxu0 %vm80_vm0, %v56_v23 }
  0xe1   :  { %v170_v25 = vpop.f32.mrb[0].mxu0 }
  0xe2   :  { %v130_v26 = vadd.f32 %v170_v25, %v146_v24  ;;  %v121_v27 = vpop.f32.mrb[1].mxu0 }
  0xe3   :  { %v122_v28 = vadd.f32 %v146_v24, %v121_v27  ;;  %v171_v29 = vpop.f32.mrb[2].mxu0 }
  0xe4   :  { %138 = vst.msk [vmem:[%s248_s5 + $0x10] sm:$0xff] %vm80_vm0, %v130_v26  ;;  %v133_v30 = vadd.f32 %v171_v29, %v146_v24  ;;  %v124_v31 = vpop.f32.mrb[3].mxu0 }
  0xe5   :  { %136 = vst.msk [vmem:[%s248_s5] sm:$0xff] %vm80_vm0, %v122_v28  ;;  %v125_v32 = vadd.f32 %v146_v24, %v124_v31 }
  0xe6   :  { %139 = vst.msk [vmem:[%s248_s5 + $0x18] sm:$0xff] %vm80_vm0, %v133_v30 }
  0xe7   :  { %137 = vst.msk [vmem:[%s248_s5 + $0x8] sm:$0xff] %vm80_vm0, %v125_v32 }

// kernel: attentional_gnn_forward.14
= control target key start
LH: loop header
LB: loop body
LE: loop exit
PB: predicated region body
PF: predicated region fallthrough
CT: control target
= control target key end

     0   :  { %vm47_vm0 = vcmask 1040384   ;;  %vm40_vm1 = vcmask 15360   ;;  %vm112_vm2 = vcmask 261120   ;;  %vm195_vm3 = vcmask 257024   ;;  %s389_s1 = inlined_call_operand.vmem [shape: bf16[32,32], index: 1, kind: input, shape index: {}]   ;;  %s390_s3 = inlined_call_operand.vmem [shape: bf16[2,32], index: 3, kind: input, shape index: {}]   ;;  %s391_s2 = inlined_call_operand.vmem [shape: f32[32,2], index: 2, kind: input, shape index: {}]   ;;  %s392_s0 = inlined_call_operand.vmem [shape: f32[32,32], index: 0, kind: input, shape index: {}]   ;;  %s393_s4 = inlined_call_operand.vmem [shape: f32[1,32], index: 4, kind: input, shape index: {}]   ;;  %s394_s5 = inlined_call_operand.vmem [shape: bf16[32,32], index: 5, kind: output, shape index: {0}]   ;;  %s395_s6 = inlined_call_operand.vmem [shape: f32[1,2,32], index: 6, kind: output, shape index: {1}]  }
   0x1   :  { %v282_v0 = vld [vmem:[%s389_s1] sm:$0xff]   ;;  %v34_v3 = vld [vmem:[%s391_s2 + $0x8] sm:$0xff]  ;;  %v35_v7 = vld [vmem:[%s391_s2 + $0x10] sm:$0xff]  ;;  %vm231_vm4 = vcmask 254976  }
   0x2   :  { %v39_v1 = vld [vmem:[%s390_s3] sm:$0x1]  ;;  %269 = vmatprep.subr.bf16.mxu0 %v282_v0  ;;  %v283_v6 = vld [vmem:[%s389_s1 + $0x8] sm:$0xff]   ;;  %v36_v8 = vld [vmem:[%s391_s2 + $0x18] sm:$0xff] }
   0x3   :  { %v33_v2 = vld [vmem:[%s391_s2] sm:$0xff]  ;;  %281 = vmatprep.subr.msk.bf16.mxu1 %vm47_vm0, %v39_v1  ;;  %v49_v4 = vsel %vm47_vm0, %v39_v1, 0  ;;  %270 = vmatpush3.bf16.msra.mxu0 %v282_v0  ;;  %v38_v10 = vpack.c.bf16 %v36_v8, %v35_v7  ;;  %v24_v11 = vld [vmem:[%s392_s0 + $0x8] sm:$0xff]  ;;  %v25_v12 = vld [vmem:[%s392_s0 + $0x10] sm:$0xff] }
   0x4   :  { %v37_v5 = vpack.c.bf16 %v34_v3, %v33_v2  ;;  %264 = vmatpush3.bf16.msra.mxu1 %v49_v4  ;;  %v23_v9 = vld [vmem:[%s392_s0] sm:$0xff]  ;;  %271 = vmatprep.subr.bf16.mxu0 %v283_v6  ;;  %v26_v13 = vld [vmem:[%s392_s0 + $0x18] sm:$0xff] }
   0x5   :  { %v27_v14 = vpack.c.bf16 %v24_v11, %v23_v9  ;;  %v28_v15 = vpack.c.bf16 %v26_v13, %v25_v12  ;;  %v247_v21 = vld [vmem:[%s393_s4] ss:$0 sm:$0xff] }
   0x6   :  { %265 = vmatprep.mubr.msk.bf16.mxu1 %vm40_vm1, %v37_v5 }
   0x7   :  { %266 = vmatmul.mubr.msk.bf16.vlgmr.msra.gmra.mrb[0].mxu1 %vm40_vm1, %v38_v10  ;;  %272 = vmatpush3.bf16.msra.mxu0 %v283_v6 }
   0x8   :  { %273 = vmatprep.mubr.msk.bf16.mxu0 %vm112_vm2, %v27_v14 }
   0xa   :  { %274 = vmatmul.mubr.msk.bf16.vlgmr.msra.gmra.mrb[0].mxu0 %vm112_vm2, %v28_v15 }
  0xda   :  { %v267_v16 = vpop.f32.mrb[0].mxu1 }
  0xdb   :  { %v85_v17 = vpop.f32.mrb[1].mxu1 }
  0xdc   :  { %v268_v18 = vpop.f32.mrb[2].mxu1 }
  0xdd   :  { %v88_v19 = vpop.f32.mrb[3].mxu1  ;;  %v275_v20 = vpop.f32.mrb[0].mxu0 }
  0xde   :  { %v162_v22 = vadd.f32 %v275_v20, %v267_v16  ;;  %v153_v23 = vpop.f32.mrb[1].mxu0 }
  0xdf   :  { %v154_v24 = vadd.f32 %v153_v23, %v85_v17  ;;  %v276_v25 = vpop.f32.mrb[2].mxu0 }
  0xe0   :  { %v177_v26 = vadd.f32 %v247_v21, %v162_v22  ;;  %v165_v27 = vadd.f32 %v276_v25, %v268_v18  ;;  %v156_v28 = vpop.f32.mrb[3].mxu0 }
  0xe1   :  { %v175_v29 = vadd.f32 %v247_v21, %v154_v24  ;;  %v157_v30 = vadd.f32 %v156_v28, %v88_v19 }
  0xe2   :  { %v254_v31 = vpack.c.bf16 %v177_v26, %v177_v26  ;;  %v178_v32 = vadd.f32 %v247_v21, %v165_v27  ;;  %v215_v36 = vmul.f32 %v177_v26, %v177_v26  ;;  %v203_v43 = vsel %vm112_vm2, %v177_v26, 0.0 }
  0xe3   :  { %v252_v33 = vpack.c.bf16 %v175_v29, %v175_v29  ;;  %v213_v34 = vmul.f32 %v175_v29, %v175_v29  ;;  %v176_v35 = vadd.f32 %v247_v21, %v157_v30  ;;  %v200_v38 = vsel %vm112_vm2, %v175_v29, 0.0 }
  0xe4   :  { %198 = vst.msk [vmem:[%s394_s5 + $0x8] sm:$0xf] %vm195_vm3, %v254_v31  ;;  %v255_v37 = vpack.c.bf16 %v178_v32, %v178_v32  ;;  %v216_v45 = vmul.f32 %v178_v32, %v178_v32  ;;  %v220_v49 = vsel %vm112_vm2, %v215_v36, 0.0  ;;  %v205_v50 = vsel %vm112_vm2, %v178_v32, 0.0 }
  0xe5   :  { %196 = vst.msk [vmem:[%s394_s5] sm:$0xf] %vm195_vm3, %v252_v33  ;;  %v253_v39 = vpack.c.bf16 %v176_v35, %v176_v35  ;;  %v201_v40 = vsel %vm112_vm2, %v176_v35, 0.0  ;;  %v214_v41 = vmul.f32 %v176_v35, %v176_v35  ;;  %v217_v44 = vsel %vm112_vm2, %v213_v34, 0.0 }
  0xe6   :  { %199 = vst.msk [vmem:[%s394_s5 + $0xc] sm:$0xf] %vm195_vm3, %v255_v37  ;;  %v202_v42 = vadd.f32 %v201_v40, %v200_v38  ;;  %v222_v53 = vsel %vm112_vm2, %v216_v45, 0.0 }
  0xe7   :  { %197 = vst.msk [vmem:[%s394_s5 + $0x4] sm:$0xf] %vm195_vm3, %v253_v39  ;;  %v218_v46 = vsel %vm112_vm2, %v214_v41, 0.0 }
  0xe8   :  { %v204_v47 = vadd.f32 %v203_v43, %v202_v42  ;;  %v219_v48 = vadd.f32 %v218_v46, %v217_v44 }
  0xea   :  { %v206_v51 = vadd.f32 %v205_v50, %v204_v47  ;;  %v221_v52 = vadd.f32 %v220_v49, %v219_v48 }
  0xec   :  { %v207_v54 = vrot.slane %v206_v51, 4  ;;  %v223_v55 = vadd.f32 %v222_v53, %v221_v52 }
  0xee   :  { %v208_v56 = vadd.f32 %v207_v54, %v206_v51  ;;  %v224_v57 = vrot.slane %v223_v55, 4 }
  0xf0   :  { %v209_v58 = vrot.slane %v208_v56, 2  ;;  %v225_v59 = vadd.f32 %v224_v57, %v223_v55 }
  0xf2   :  { %v210_v60 = vadd.f32 %v209_v58, %v208_v56  ;;  %v226_v61 = vrot.slane %v225_v59, 2 }
  0xf4   :  { %v211_v62 = vrot.slane %v210_v60, 1  ;;  %v227_v63 = vadd.f32 %v226_v61, %v225_v59 }
  0xf6   :  { %v228_v0 = vrot.slane %v227_v63, 1  ;;  %v212_v1 = vadd.f32 %v211_v62, %v210_v60 }
  0xf8   :  { %v229_v2 = vadd.f32 %v228_v0, %v227_v63 }
  0xfa   :  { %v230_v3 = vsel %vm47_vm0, %v212_v1, %v229_v2 }
  0xfb   :  { %232 = vst.msk [vmem:[%s395_s6] sm:$0x3] %vm231_vm4, %v230_v3 }

// kernel: attentional_gnn_forward.17
= control target key start
LH: loop header
LB: loop body
LE: loop exit
PB: predicated region body
PF: predicated region fallthrough
CT: control target
= control target key end

     0   :  { %vm52_vm0 = vcmask 261120   ;;  %vm124_vm1 = vcmask 257024   ;;  %vm217_vm2 = vcmask 519168   ;;  %s381_s1 = inlined_call_operand.vmem [shape: bf16[32,32], index: 1, kind: input, shape index: {}]   ;;  %s382_s3 = inlined_call_operand.vmem [shape: bf16[32,64], index: 3, kind: input, shape index: {}]   ;;  %s383_s0 = inlined_call_operand.vmem [shape: f32[32,32], index: 0, kind: input, shape index: {}]   ;;  %s384_s2 = inlined_call_operand.vmem [shape: f32[1,32], index: 2, kind: input, shape index: {}]   ;;  %s385_s4 = inlined_call_operand.vmem [shape: f32[1,64], index: 4, kind: input, shape index: {}]   ;;  %s386_s5 = inlined_call_operand.vmem [shape: bf16[32,32], index: 5, kind: output, shape index: {0}]   ;;  %s387_s6 = inlined_call_operand.vmem [shape: bf16[32,64], index: 6, kind: output, shape index: {1}]  }
   0x1   :  { %v280_v0 = vld [vmem:[%s381_s1] sm:$0xff]   ;;  %v282_v2 = vld [vmem:[%s381_s1 + $0x8] sm:$0xff]   ;;  %v25_v6 = vld [vmem:[%s383_s0 + $0x10] sm:$0xff] }
   0x2   :  { %v281_v1 = vld [vmem:[%s382_s3] sm:$0xff]   ;;  %264 = vmatprep.subr.bf16.mxu0 %v280_v0  ;;  %v283_v3 = vld [vmem:[%s382_s3 + $0x8] sm:$0xff]   ;;  %v26_v8 = vld [vmem:[%s383_s0 + $0x18] sm:$0xff] }
   0x3   :  { %272 = vmatprep.subr.bf16.mxu1 %v281_v1  ;;  %265 = vmatpush3.bf16.msra.mxu0 %v280_v0  ;;  %v23_v4 = vld [vmem:[%s383_s0] sm:$0xff]  ;;  %v24_v5 = vld [vmem:[%s383_s0 + $0x8] sm:$0xff]  ;;  %v28_v9 = vpack.c.bf16 %v26_v8, %v25_v6 }
   0x4   :  { %273 = vmatpush3.bf16.msra.mxu1 %v281_v1  ;;  %266 = vmatprep.subr.bf16.mxu0 %v282_v2  ;;  %v27_v7 = vpack.c.bf16 %v24_v5, %v23_v4  ;;  %v230_v10 = vld [vmem:[%s384_s2] ss:$0 sm:$0xff] }
   0x5   :  { %274 = vmatprep.subr.bf16.mxu1 %v283_v3  ;;  %v239_v11 = vld [vmem:[%s385_s4] ss:$0 sm:$0xff] }
   0x6   :  { %268 = vmatprep.mubr.msk.bf16.mxu0 %vm52_vm0, %v27_v7  ;;  %276 = vmatprep.mubr.msk.bf16.mxu1 %vm52_vm0, %v27_v7 }
   0x7   :  { %267 = vmatpush3.bf16.msra.mxu0 %v282_v2 }
   0x8   :  { %275 = vmatpush3.bf16.msra.mxu1 %v283_v3 }
   0xa   :  { %269 = vmatmul.mubr.msk.bf16.vlgmr.msra.gmra.mrb[0].mxu0 %vm52_vm0, %v28_v9 }
   0xb   :  { %277 = vmatmul.mubr.msk.bf16.vlgmr.msra.gmra.mrb[0].mxu1 %vm52_vm0, %v28_v9 }
  0xdd   :  { %v270_v12 = vpop.f32.mrb[0].mxu0 }
  0xde   :  { %v102_v13 = vadd.f32 %v270_v12, %v230_v10  ;;  %v278_v14 = vpop.f32.mrb[0].mxu1  ;;  %v93_v15 = vpop.f32.mrb[1].mxu0 }
  0xdf   :  { %v195_v16 = vadd.f32 %v278_v14, %v239_v11  ;;  %v94_v17 = vadd.f32 %v230_v10, %v93_v15  ;;  %v186_v18 = vpop.f32.mrb[1].mxu1  ;;  %v271_v19 = vpop.f32.mrb[2].mxu0 }
  0xe0   :  { %v250_v20 = vpack.c.bf16 %v102_v13, %v102_v13  ;;  %v187_v21 = vadd.f32 %v239_v11, %v186_v18  ;;  %v105_v22 = vadd.f32 %v271_v19, %v230_v10  ;;  %v279_v23 = vpop.f32.mrb[2].mxu1  ;;  %v96_v24 = vpop.f32.mrb[3].mxu0 }
  0xe1   :  { %v254_v25 = vpack.c.bf16 %v195_v16, %v195_v16  ;;  %v248_v26 = vpack.c.bf16 %v94_v17, %v94_v17  ;;  %v198_v27 = vadd.f32 %v279_v23, %v239_v11  ;;  %v97_v28 = vadd.f32 %v230_v10, %v96_v24  ;;  %v189_v29 = vpop.f32.mrb[3].mxu1 }
  0xe2   :  { %127 = vst.msk [vmem:[%s386_s5 + $0x8] sm:$0xf] %vm124_vm1, %v250_v20  ;;  %v252_v30 = vpack.c.bf16 %v187_v21, %v187_v21  ;;  %v251_v31 = vpack.c.bf16 %v105_v22, %v105_v22  ;;  %v190_v32 = vadd.f32 %v239_v11, %v189_v29 }
  0xe3   :  { %220 = vst.msk [vmem:[%s387_s6 + $0x8] sm:$0xf] %vm217_vm2, %v254_v25  ;;  %v255_v33 = vpack.c.bf16 %v198_v27, %v198_v27  ;;  %v249_v34 = vpack.c.bf16 %v97_v28, %v97_v28 }
  0xe4   :  { %125 = vst.msk [vmem:[%s386_s5] sm:$0xf] %vm124_vm1, %v248_v26  ;;  %128 = vst.msk [vmem:[%s386_s5 + $0xc] sm:$0xf] %vm124_vm1, %v251_v31  ;;  %v253_v35 = vpack.c.bf16 %v190_v32, %v190_v32 }
  0xe5   :  { %218 = vst.msk [vmem:[%s387_s6] sm:$0xf] %vm217_vm2, %v252_v30  ;;  %221 = vst.msk [vmem:[%s387_s6 + $0xc] sm:$0xf] %vm217_vm2, %v255_v33 }
  0xe6   :  { %126 = vst.msk [vmem:[%s386_s5 + $0x4] sm:$0xf] %vm124_vm1, %v249_v34 }
  0xe7   :  { %219 = vst.msk [vmem:[%s387_s6 + $0x4] sm:$0xf] %vm217_vm2, %v253_v35 }

// kernel: attentional_gnn_forward.19
= control target key start
LH: loop header
LB: loop body
LE: loop exit
PB: predicated region body
PF: predicated region fallthrough
CT: control target
= control target key end

     0   :  { %vm99_vm0 = vcmask 523264   ;;  %vm163_vm1 = vcmask 261120   ;;  %s298_s3 = inlined_call_operand.vmem [shape: bf16[64,32], index: 3, kind: input, shape index: {}]   ;;  %s299_s0 = inlined_call_operand.vmem [shape: bf16[32,64], index: 0, kind: input, shape index: {}]   ;;  %s300_s1 = inlined_call_operand.vmem [shape: f32[1,64], index: 1, kind: input, shape index: {}]   ;;  %s301_s2 = inlined_call_operand.vmem [shape: f32[1,64], index: 2, kind: input, shape index: {}]   ;;  %s302_s4 = inlined_call_operand.vmem [shape: f32[1,32], index: 4, kind: input, shape index: {}]   ;;  %s303_s5 = inlined_call_operand.vmem [shape: f32[32,32], index: 5, kind: input, shape index: {}]   ;;  %s304_s6 = inlined_call_operand.vmem [shape: f32[32,32], index: 6, kind: output, shape index: {}]  }
   0x1   :  { %v208_v0 = vld [vmem:[%s298_s3] sm:$0xff]   ;;  %v209_v1 = vld [vmem:[%s298_s3 + $0x8] sm:$0xff]   ;;  %v210_v2 = vld [vmem:[%s298_s3 + $0x10] sm:$0xff]  }
   0x2   :  { %196 = vmatprep.subr.bf16.mxu0 %v208_v0  ;;  %v182_v3 = vld [vmem:[%s299_s0] sm:$0xff]   ;;  %v189_v4 = vld [vmem:[%s299_s0 + $0x8] sm:$0xff]   ;;  %v211_v15 = vld [vmem:[%s298_s3 + $0x18] sm:$0xff]  }
   0x3   :  { %197 = vmatpush3.bf16.msra.mxu0 %v208_v0  ;;  %v172_v5 = vld [vmem:[%s300_s1] ss:$0 sm:$0xff]  ;;  %v183_v6 = vunpack.c.l.bf16 %v182_v3  ;;  %v184_v7 = vunpack.c.h.bf16 %v182_v3  ;;  %v187_v8 = vunpack.c.l.bf16 %v189_v4  ;;  %v188_v9 = vunpack.c.h.bf16 %v189_v4  ;;  %v157_v28 = vld [vmem:[%s303_s5 + $0x10] sm:$0xff]  ;;  %v158_v34 = vld [vmem:[%s303_s5 + $0x18] sm:$0xff] }
   0x4   :  { %198 = vmatprep.subr.bf16.mxu0 %v209_v1  ;;  %v173_v10 = vld [vmem:[%s301_s2] ss:$0 sm:$0xff]  ;;  %v156_v38 = vld [vmem:[%s303_s5 + $0x8] sm:$0xff] }
   0x5   :  { %v39_v11 = vsub.f32 %v183_v6, %v172_v5  ;;  %v40_v12 = vsub.f32 %v184_v7, %v172_v5  ;;  %v41_v13 = vsub.f32 %v187_v8, %v172_v5  ;;  %v42_v14 = vsub.f32 %v188_v9, %v172_v5  ;;  %v174_v26 = vld [vmem:[%s302_s4] ss:$0 sm:$0xff] }
   0x6   :  { %v155_v31 = vld [vmem:[%s303_s5] sm:$0xff] }
   0x7   :  { %199 = vmatpush3.bf16.msra.mxu0 %v209_v1  ;;  %v50_v16 = vmul.f32 %v173_v10, %v39_v11  ;;  %v51_v17 = vmul.f32 %v173_v10, %v40_v12  ;;  %v52_v18 = vmul.f32 %v173_v10, %v41_v13  ;;  %v53_v19 = vmul.f32 %v173_v10, %v42_v14 }
   0x8   :  { %200 = vmatprep.subr.bf16.mxu0 %v210_v2 }
   0x9   :  { %v54_v20 = vmax.f32 %v50_v16, 0.0  ;;  %v55_v21 = vmax.f32 %v51_v17, 0.0  ;;  %v56_v22 = vmax.f32 %v52_v18, 0.0  ;;  %v57_v23 = vmax.f32 %v53_v19, 0.0 }
   0xb   :  { %201 = vmatpush3.bf16.msra.mxu0 %v210_v2  ;;  %v58_v24 = vpack.c.bf16 %v55_v21, %v54_v20  ;;  %v59_v25 = vpack.c.bf16 %v57_v23, %v56_v22 }
   0xc   :  { %202 = vmatprep.subr.bf16.mxu0 %v211_v15 }
   0xd   :  { %204 = vmatprep.mubr.msk.bf16.mxu0 %vm99_vm0, %v58_v24 }
   0xf   :  { %203 = vmatpush3.bf16.msra.mxu0 %v211_v15 }
  0x12   :  { %205 = vmatmul.mubr.msk.bf16.vlgmr.msra.gmra.mrb[0].mxu0 %vm99_vm0, %v59_v25 }
  0xe5   :  { %v206_v27 = vpop.f32.mrb[0].mxu0 }
  0xe6   :  { %v149_v29 = vadd.f32 %v206_v27, %v174_v26  ;;  %v140_v30 = vpop.f32.mrb[1].mxu0 }
  0xe7   :  { %v141_v32 = vadd.f32 %v174_v26, %v140_v30  ;;  %v207_v33 = vpop.f32.mrb[2].mxu0 }
  0xe8   :  { %v161_v35 = vadd.f32 %v157_v28, %v149_v29  ;;  %v152_v36 = vadd.f32 %v207_v33, %v174_v26  ;;  %v143_v37 = vpop.f32.mrb[3].mxu0 }
  0xe9   :  { %v159_v39 = vadd.f32 %v155_v31, %v141_v32  ;;  %v144_v40 = vadd.f32 %v174_v26, %v143_v37 }
  0xea   :  { %166 = vst.msk [vmem:[%s304_s6 + $0x10] sm:$0xff] %vm163_vm1, %v161_v35  ;;  %v162_v41 = vadd.f32 %v158_v34, %v152_v36 }
  0xeb   :  { %164 = vst.msk [vmem:[%s304_s6] sm:$0xff] %vm163_vm1, %v159_v39  ;;  %v160_v42 = vadd.f32 %v156_v38, %v144_v40 }
  0xec   :  { %167 = vst.msk [vmem:[%s304_s6 + $0x18] sm:$0xff] %vm163_vm1, %v162_v41 }
  0xed   :  { %165 = vst.msk [vmem:[%s304_s6 + $0x8] sm:$0xff] %vm163_vm1, %v160_v42 }

// kernel: attentional_gnn_forward.23
= control target key start
LH: loop header
LB: loop body
LE: loop exit
PB: predicated region body
PF: predicated region fallthrough
CT: control target
= control target key end

     0   :  { %vm54_vm0 = vcmask 261120   ;;  %vm198_vm1 = vcmask 257024   ;;  %vm253_vm2 = vcmask 1040384   ;;  %vm255_vm3 = vcmask 254976   ;;  %s492_s1 = inlined_call_operand.vmem [shape: bf16[32,32], index: 1, kind: input, shape index: {}]   ;;  %s493_s3 = inlined_call_operand.vmem [shape: bf16[32,32], index: 3, kind: input, shape index: {}]   ;;  %s494_s0 = inlined_call_operand.vmem [shape: f32[32,32], index: 0, kind: input, shape index: {}]   ;;  %s495_s2 = inlined_call_operand.vmem [shape: f32[1,32], index: 2, kind: input, shape index: {}]   ;;  %s496_s4 = inlined_call_operand.vmem [shape: f32[1,32], index: 4, kind: input, shape index: {}]   ;;  %s497_s5 = inlined_call_operand.vmem [shape: bf16[32,32], index: 5, kind: output, shape index: {0}]   ;;  %s498_s7 = inlined_call_operand.vmem [shape: bf16[32,32], index: 7, kind: output, shape index: {2}]   ;;  %s499_s6 = inlined_call_operand.vmem [shape: f32[1,2,32], index: 6, kind: output, shape index: {1}]   ;;  %s500_s8 = inlined_call_operand.vmem [shape: f32[1,2,32], index: 8, kind: output, shape index: {3}]  }
   0x1   :  { %v355_v0 = vld [vmem:[%s492_s1] sm:$0xff]   ;;  %v357_v2 = vld [vmem:[%s492_s1 + $0x8] sm:$0xff]   ;;  %v27_v6 = vld [vmem:[%s494_s0 + $0x10] sm:$0xff] }
   0x2   :  { %v356_v1 = vld [vmem:[%s493_s3] sm:$0xff]   ;;  %339 = vmatprep.subr.bf16.mxu0 %v355_v0  ;;  %v358_v3 = vld [vmem:[%s493_s3 + $0x8] sm:$0xff]   ;;  %v28_v8 = vld [vmem:[%s494_s0 + $0x18] sm:$0xff] }
   0x3   :  { %347 = vmatprep.subr.bf16.mxu1 %v356_v1  ;;  %340 = vmatpush3.bf16.msra.mxu0 %v355_v0  ;;  %v25_v4 = vld [vmem:[%s494_s0] sm:$0xff]  ;;  %v26_v5 = vld [vmem:[%s494_s0 + $0x8] sm:$0xff]  ;;  %v30_v9 = vpack.c.bf16 %v28_v8, %v27_v6 }
   0x4   :  { %348 = vmatpush3.bf16.msra.mxu1 %v356_v1  ;;  %341 = vmatprep.subr.bf16.mxu0 %v357_v2  ;;  %v29_v7 = vpack.c.bf16 %v26_v5, %v25_v4  ;;  %v305_v10 = vld [vmem:[%s495_s2] ss:$0 sm:$0xff] }
   0x5   :  { %349 = vmatprep.subr.bf16.mxu1 %v358_v3  ;;  %v310_v11 = vld [vmem:[%s496_s4] ss:$0 sm:$0xff] }
   0x6   :  { %343 = vmatprep.mubr.msk.bf16.mxu0 %vm54_vm0, %v29_v7  ;;  %351 = vmatprep.mubr.msk.bf16.mxu1 %vm54_vm0, %v29_v7 }
   0x7   :  { %342 = vmatpush3.bf16.msra.mxu0 %v357_v2 }
   0x8   :  { %350 = vmatpush3.bf16.msra.mxu1 %v358_v3 }
   0xa   :  { %344 = vmatmul.mubr.msk.bf16.vlgmr.msra.gmra.mrb[0].mxu0 %vm54_vm0, %v30_v9 }
   0xb   :  { %352 = vmatmul.mubr.msk.bf16.vlgmr.msra.gmra.mrb[0].mxu1 %vm54_vm0, %v30_v9 }
  0xdd   :  { %v345_v12 = vpop.f32.mrb[0].mxu0 }
  0xde   :  { %v104_v13 = vadd.f32 %v345_v12, %v305_v10  ;;  %v353_v14 = vpop.f32.mrb[0].mxu1  ;;  %v95_v15 = vpop.f32.mrb[1].mxu0 }
  0xdf   :  { %v176_v16 = vadd.f32 %v353_v14, %v310_v11  ;;  %v96_v17 = vadd.f32 %v305_v10, %v95_v15  ;;  %v167_v18 = vpop.f32.mrb[1].mxu1  ;;  %v346_v19 = vpop.f32.mrb[2].mxu0 }
  0xe0   :  { %v325_v20 = vpack.c.bf16 %v104_v13, %v104_v13  ;;  %v168_v21 = vadd.f32 %v310_v11, %v167_v18  ;;  %v354_v22 = vpop.f32.mrb[2].mxu1  ;;  %v98_v23 = vpop.f32.mrb[3].mxu0  ;;  %v226_v28 = vsel %vm54_vm0, %v104_v13, 0.0  ;;  %v107_v29 = vadd.f32 %v346_v19, %v305_v10 }
  0xe1   :  { %v329_v24 = vpack.c.bf16 %v176_v16, %v176_v16  ;;  %v323_v25 = vpack.c.bf16 %v96_v17, %v96_v17  ;;  %v170_v26 = vpop.f32.mrb[3].mxu1  ;;  %v236_v30 = vmul.f32 %v96_v17, %v96_v17  ;;  %v179_v31 = vadd.f32 %v354_v22, %v310_v11 }
  0xe2   :  { %201 = vst.msk [vmem:[%s497_s5 + $0x8] sm:$0xf] %vm198_vm1, %v325_v20  ;;  %v327_v27 = vpack.c.bf16 %v168_v21, %v168_v21  ;;  %v99_v32 = vadd.f32 %v305_v10, %v98_v23  ;;  %v171_v33 = vadd.f32 %v310_v11, %v170_v26  ;;  %v238_v34 = vmul.f32 %v104_v13, %v104_v13 }
  0xe3   :  { %221 = vst.msk [vmem:[%s498_s7 + $0x8] sm:$0xf] %vm198_vm1, %v329_v24  ;;  %199 = vst.msk [vmem:[%s497_s5] sm:$0xf] %vm198_vm1, %v323_v25  ;;  %v260_v35 = vsel %vm54_vm0, %v176_v16, 0.0  ;;  %v270_v36 = vmul.f32 %v168_v21, %v168_v21  ;;  %v326_v37 = vpack.c.bf16 %v107_v29, %v107_v29  ;;  %v272_v38 = vmul.f32 %v176_v16, %v176_v16 }
  0xe4   :  { %219 = vst.msk [vmem:[%s498_s7] sm:$0xf] %vm198_vm1, %v327_v27  ;;  %v223_v39 = vsel %vm54_vm0, %v96_v17, 0.0  ;;  %v330_v40 = vpack.c.bf16 %v179_v31, %v179_v31  ;;  %v324_v41 = vpack.c.bf16 %v99_v32, %v99_v32  ;;  %v257_v42 = vsel %vm54_vm0, %v168_v21, 0.0 }
  0xe5   :  { %202 = vst.msk [vmem:[%s497_s5 + $0xc] sm:$0xf] %vm198_vm1, %v326_v37  ;;  %v224_v43 = vsel %vm54_vm0, %v99_v32, 0.0  ;;  %v237_v44 = vmul.f32 %v99_v32, %v99_v32  ;;  %v328_v45 = vpack.c.bf16 %v171_v33, %v171_v33  ;;  %v240_v46 = vsel %vm54_vm0, %v236_v30, 0.0 }
  0xe6   :  { %222 = vst.msk [vmem:[%s498_s7 + $0xc] sm:$0xf] %vm198_vm1, %v330_v40  ;;  %200 = vst.msk [vmem:[%s497_s5 + $0x4] sm:$0xf] %vm198_vm1, %v324_v41  ;;  %v225_v47 = vadd.f32 %v224_v43, %v223_v39  ;;  %v258_v48 = vsel %vm54_vm0, %v171_v33, 0.0  ;;  %v271_v49 = vmul.f32 %v171_v33, %v171_v33  ;;  %v274_v50 = vsel %vm54_vm0, %v270_v36, 0.0 }
  0xe7   :  { %v239_v51 = vmul.f32 %v107_v29, %v107_v29  ;;  %v241_v52 = vsel %vm54_vm0, %v237_v44, 0.0  ;;  %220 = vst.msk [vmem:[%s498_s7 + $0x4] sm:$0xf] %vm198_vm1, %v328_v45  ;;  %v259_v53 = vadd.f32 %v258_v48, %v257_v42  ;;  %v273_v54 = vmul.f32 %v179_v31, %v179_v31 }
  0xe8   :  { %v227_v55 = vadd.f32 %v226_v28, %v225_v47  ;;  %v242_v56 = vadd.f32 %v241_v52, %v240_v46  ;;  %v275_v57 = vsel %vm54_vm0, %v271_v49, 0.0  ;;  %v243_v58 = vsel %vm54_vm0, %v238_v34, 0.0 }
  0xe9   :  { %v228_v59 = vsel %vm54_vm0, %v107_v29, 0.0  ;;  %v261_v60 = vadd.f32 %v260_v35, %v259_v53  ;;  %v276_v61 = vadd.f32 %v275_v57, %v274_v50  ;;  %v277_v62 = vsel %vm54_vm0, %v272_v38, 0.0 }
  0xea   :  { %v262_v63 = vsel %vm54_vm0, %v179_v31, 0.0  ;;  %v229_v0 = vadd.f32 %v228_v59, %v227_v55  ;;  %v244_v1 = vadd.f32 %v243_v58, %v242_v56  ;;  %v245_v2 = vsel %vm54_vm0, %v239_v51, 0.0 }
  0xeb   :  { %v263_v3 = vadd.f32 %v262_v63, %v261_v60  ;;  %v278_v4 = vadd.f32 %v277_v62, %v276_v61  ;;  %v279_v5 = vsel %vm54_vm0, %v273_v54, 0.0 }
  0xec   :  { %v230_v6 = vrot.slane %v229_v0, 4  ;;  %v246_v7 = vadd.f32 %v245_v2, %v244_v1 }
  0xed   :  { %v264_v8 = vrot.slane %v263_v3, 4  ;;  %v280_v9 = vadd.f32 %v279_v5, %v278_v4 }
  0xee   :  { %v231_v10 = vadd.f32 %v230_v6, %v229_v0  ;;  %v247_v11 = vrot.slane %v246_v7, 4 }
  0xef   :  { %v265_v12 = vadd.f32 %v264_v8, %v263_v3  ;;  %v281_v13 = vrot.slane %v280_v9, 4 }
  0xf0   :  { %v232_v14 = vrot.slane %v231_v10, 2  ;;  %v248_v15 = vadd.f32 %v247_v11, %v246_v7 }
  0xf1   :  { %v266_v16 = vrot.slane %v265_v12, 2  ;;  %v282_v17 = vadd.f32 %v281_v13, %v280_v9 }
  0xf2   :  { %v233_v18 = vadd.f32 %v232_v14, %v231_v10  ;;  %v249_v19 = vrot.slane %v248_v15, 2 }
  0xf3   :  { %v267_v20 = vadd.f32 %v266_v16, %v265_v12  ;;  %v283_v21 = vrot.slane %v282_v17, 2 }
  0xf4   :  { %v234_v22 = vrot.slane %v233_v18, 1  ;;  %v250_v23 = vadd.f32 %v249_v19, %v248_v15 }
  0xf5   :  { %v268_v24 = vrot.slane %v267_v20, 1  ;;  %v284_v25 = vadd.f32 %v283_v21, %v282_v17 }
  0xf6   :  { %v251_v26 = vrot.slane %v250_v23, 1  ;;  %v235_v28 = vadd.f32 %v234_v22, %v233_v18 }
  0xf7   :  { %v285_v27 = vrot.slane %v284_v25, 1  ;;  %v269_v30 = vadd.f32 %v268_v24, %v267_v20 }
  0xf8   :  { %v252_v29 = vadd.f32 %v251_v26, %v250_v23 }
  0xf9   :  { %v286_v31 = vadd.f32 %v285_v27, %v284_v25 }
  0xfa   :  { %v254_v32 = vsel %vm253_vm2, %v235_v28, %v252_v29 }
  0xfb   :  { %256 = vst.msk [vmem:[%s499_s6] sm:$0x3] %vm255_vm3, %v254_v32  ;;  %v287_v33 = vsel %vm253_vm2, %v269_v30, %v286_v31 }
  0xfc   :  { %288 = vst.msk [vmem:[%s500_s8] sm:$0x3] %vm255_vm3, %v287_v33 }

// kernel: attentional_gnn_forward.27
= control target key start
LH: loop header
LB: loop body
LE: loop exit
PB: predicated region body
PF: predicated region fallthrough
CT: control target
= control target key end

     0   :  { %vm80_vm0 = vcmask 261120   ;;  %s249_s3 = inlined_call_operand.vmem [shape: bf16[32,128], index: 3, kind: input, shape index: {}]   ;;  %s250_s0 = inlined_call_operand.vmem [shape: bf16[32,32], index: 0, kind: input, shape index: {}]   ;;  %s251_s1 = inlined_call_operand.vmem [shape: f32[1,32], index: 1, kind: input, shape index: {}]   ;;  %s252_s2 = inlined_call_operand.vmem [shape: f32[1,32], index: 2, kind: input, shape index: {}]   ;;  %s253_s4 = inlined_call_operand.vmem [shape: f32[1,128], index: 4, kind: input, shape index: {}]   ;;  %s254_s5 = inlined_call_operand.vmem [shape: f32[32,128], index: 5, kind: output, shape index: {}]  }
   0x1   :  { %v184_v0 = vld [vmem:[%s249_s3] sm:$0xff]   ;;  %v185_v1 = vld [vmem:[%s249_s3 + $0x8] sm:$0xff]  }
   0x2   :  { %176 = vmatprep.subr.bf16.mxu0 %v184_v0  ;;  %v164_v2 = vld [vmem:[%s250_s0] sm:$0xff]   ;;  %v171_v3 = vld [vmem:[%s250_s0 + $0x8] sm:$0xff]  }
   0x3   :  { %v152_v4 = vld [vmem:[%s251_s1] ss:$0 sm:$0xff]  ;;  %177 = vmatpush3.bf16.msra.mxu0 %v184_v0  ;;  %v165_v5 = vunpack.c.l.bf16 %v164_v2  ;;  %v166_v6 = vunpack.c.h.bf16 %v164_v2  ;;  %v169_v7 = vunpack.c.l.bf16 %v171_v3  ;;  %v170_v8 = vunpack.c.h.bf16 %v171_v3 }
   0x4   :  { %178 = vmatprep.subr.bf16.mxu0 %v185_v1  ;;  %v153_v9 = vld [vmem:[%s252_s2] ss:$0 sm:$0xff] }
   0x5   :  { %v36_v10 = vsub.f32 %v165_v5, %v152_v4  ;;  %v37_v11 = vsub.f32 %v166_v6, %v152_v4  ;;  %v38_v12 = vsub.f32 %v169_v7, %v152_v4  ;;  %v39_v13 = vsub.f32 %v170_v8, %v152_v4  ;;  %v154_v24 = vld [vmem:[%s253_s4] ss:$0 sm:$0xff] }
   0x7   :  { %179 = vmatpush3.bf16.msra.mxu0 %v185_v1  ;;  %v47_v14 = vmul.f32 %v153_v9, %v36_v10  ;;  %v48_v15 = vmul.f32 %v153_v9, %v37_v11  ;;  %v49_v16 = vmul.f32 %v153_v9, %v38_v12  ;;  %v50_v17 = vmul.f32 %v153_v9, %v39_v13 }
   0x9   :  { %v51_v18 = vmax.f32 %v47_v14, 0.0  ;;  %v52_v19 = vmax.f32 %v48_v15, 0.0  ;;  %v53_v20 = vmax.f32 %v49_v16, 0.0  ;;  %v54_v21 = vmax.f32 %v50_v17, 0.0 }
   0xb   :  { %v55_v22 = vpack.c.bf16 %v52_v19, %v51_v18  ;;  %v56_v23 = vpack.c.bf16 %v54_v21, %v53_v20 }
   0xd   :  { %180 = vmatprep.mubr.msk.bf16.mxu0 %vm80_vm0, %v55_v22 }
   0xe   :  { %181 = vmatmul.mubr.msk.bf16.vlgmr.msra.gmra.mrb[0].mxu0 %vm80_vm0, %v56_v23 }
  0xe1   :  { %v182_v25 = vpop.f32.mrb[0].mxu0 }
  0xe2   :  { %v130_v26 = vadd.f32 %v182_v25, %v154_v24  ;;  %v121_v27 = vpop.f32.mrb[1].mxu0 }
  0xe3   :  { %v122_v28 = vadd.f32 %v154_v24, %v121_v27  ;;  %v183_v29 = vpop.f32.mrb[2].mxu0 }
  0xe4   :  { %v161_v30 = vclamps-f32 %v130_v26, 1.0  ;;  %v133_v31 = vadd.f32 %v183_v29, %v154_v24  ;;  %v124_v32 = vpop.f32.mrb[3].mxu0 }
  0xe5   :  { %v159_v33 = vclamps-f32 %v122_v28, 1.0  ;;  %v125_v34 = vadd.f32 %v154_v24, %v124_v32 }
  0xe6   :  { %146 = vst [vmem:[%s254_s5 + $0x10] sm:$0xff] %v161_v30  ;;  %v162_v35 = vclamps-f32 %v133_v31, 1.0 }
  0xe7   :  { %144 = vst [vmem:[%s254_s5] sm:$0xff] %v159_v33  ;;  %v160_v36 = vclamps-f32 %v125_v34, 1.0 }
  0xe8   :  { %147 = vst [vmem:[%s254_s5 + $0x18] sm:$0xff] %v162_v35 }
  0xe9   :  { %145 = vst [vmem:[%s254_s5 + $0x8] sm:$0xff] %v160_v36 }

// kernel: attentional_gnn_forward.18
= control target key start
LH: loop header
LB: loop body
LE: loop exit
PB: predicated region body
PF: predicated region fallthrough
CT: control target
= control target key end

     0   :  { %s1872_s30 = smov 0   ;;  %s1874_s10 = smov 0   ;;  %s2118_s0 = inlined_call_operand.vmem [shape: f32[2,16,32], index: 0, kind: input, shape index: {}]   ;;  %s2119_s1 = inlined_call_operand.vmem [shape: bf16[2,16,32], index: 1, kind: input, shape index: {}]   ;;  %s2120_s2 = inlined_call_operand.vmem [shape: bf16[2,16,64], index: 2, kind: input, shape index: {}]   ;;  %s2121_s3 = inlined_call_operand.vmem [shape: bf16[32,32], index: 3, kind: input, shape index: {}]   ;;  %s2122_s4 = inlined_call_operand.vmem [shape: f32[1,32], index: 4, kind: input, shape index: {}]   ;;  %s2123_s5 = inlined_call_operand.vmem [shape: bf16[32,64], index: 5, kind: input, shape index: {}]   ;;  %s2124_s6 = inlined_call_operand.vmem [shape: bf16[32,64], index: 6, kind: input, shape index: {}]   ;;  %s2125_s7 = inlined_call_operand.vmem [shape: f32[1,64], index: 7, kind: input, shape index: {}]   ;;  %s2126_s8 = inlined_call_operand.vmem [shape: bf16[2,16,64], index: 8, kind: output, shape index: {0}]   ;;  %s2127_s9 = inlined_call_operand.vmem [shape: f32[2,1,2,64], index: 9, kind: output, shape index: {1}]  }
   0x1   :  { %s1876_s11 = smov 0  }
   0x2 LB: > { %s32_s12 = sadd.s32 1, %s1807_s10  ;;  %p1542_p0 = scmp.ge.s32.totalorder %s1811_s11, 1  ;;  %s1811_s11 = sphi %s1876_s11, %s20_s11   ;;  %s1807_s10 = sphi %s1874_s10, %s2129_s10   ;;  %s1803_s30 = sphi %s1872_s30, %s2128_s30  }
   0x3   : > { %p34_p1 = scmp.ge.s32.totalorder %s32_s12, 2  ;;  %p340_p2 = scmp.lt.s32.totalorder %s1811_s11, 3 }
   0x5   : > { %s2131_s12 = smov (%p34_p1, %s32_s12), 0  ;;  %p341_p3 = pnand %p1542_p0, %p340_p2 }
   0x6   : > { %p406_p4 = scmp.lt.s32.totalorder (!%p341_p3), %s1803_s30, 1  ;;  %v1813_v0 = vmov (!%p341_p3), 0.0   ;;  %vm1814_vm0 = vmmov (!%p341_p3), 0   ;;  %vm464_vm1 = vcmask (!%p341_p3), 64512   ;;  %s1815_s20 = smov (!%p341_p3), 96   ;;  %vm512_vm2 = vcmask (!%p341_p3), 130048  }
   0x7   : > { %344 = sbr.rel (%p341_p3) target bundleno = 1524 (0x5f4), region = 52  ;;  %1614 = vmatprep.subr.bf16.mxu0 (!%p341_p3), %v1813_v0  ;;  %1616 = vmatprep.mubr.msk.bf16.mxu0 (!%p341_p3), %vm1814_vm0, %v1813_v0  ;;  %s1816_s21 = smov (!%p341_p3), 120   ;;  %vm1001_vm3 = vcmask (!%p341_p3), 1043456   ;;  %vm1234_vm4 = vcmask (!%p341_p3), 261120   ;;  %vm1352_vm5 = vcmask (!%p341_p3), 519168   ;;  %vm1355_vm6 = vcmask (!%p341_p3), 523264  }
   0x8   : > { %1620 = vmatprep.subr.bf16.mxu1 (!%p341_p3), %v1813_v0  ;;  %1622 = vmatprep.mubr.msk.bf16.mxu1 (!%p341_p3), %vm1814_vm0, %v1813_v0  ;;  %s1817_s22 = smov (!%p341_p3), 112   ;;  %s1818_s23 = smov (!%p341_p3), 104   ;;  %vm1376_vm7 = vcmask (!%p341_p3), 1040384   ;;  %vm1378_vm8 = vcmask (!%p341_p3), 517120  }
   0x9   : > { %s1819_s24 = smov (!%p341_p3), 88   ;;  %s1820_s25 = smov (!%p341_p3), 80  }
   0xa   : > { %s1821_s26 = smov (!%p341_p3), 72  }
   0xe   : > { %s2133_s30 = smov (!%p406_p4, %s1803_s30), 1 }
   0xf   : > { %s1899_s13 = sshll.u32 %s2133_s30, 3 }
  0x10   : > { %s429_s16 = scalar_lea.vmem %s2120_s2, %s1899_s13  ;;  %s423_s19 = scalar_lea.vmem %s2119_s1, %s1899_s13 }
  0x11   : > { %v1905_v1 = vld [vmem:[%s429_s16] sm:$0xff]  }
  0x12   : > { %v469_v2 = vsel %vm464_vm1, %v1905_v1, 0  ;;  %v1736_v3 = vld [vmem:[%s423_s19] sm:$0xff]   ;;  %544 = vrot.lane.b32.xlu1 %v1905_v1, %s1815_s20 }
  0x13   : > { %1615 = vmatpush3.bf16.xpose.msra.mxu0 %v469_v2 }
  0x14   : > { %1632 = vmatprep.subr.bf16.mxu0 %v1813_v0 }
  0x16   : > { %595 = vrot.lane.b32.xlu1 %v1905_v1, %s1816_s21 }
  0x1a   : > { %1617 = vmatmul.mubr.msk.bf16.vlgmr.msra.gmra.mrb[0].mxu0 %vm464_vm1, %v1736_v3  ;;  %726 = vrot.lane.b32.xlu1 %v1905_v1, %s1817_s22 }
  0x1b   : > { %1634 = vmatprep.mubr.msk.bf16.mxu0 %vm1814_vm0, %v1813_v0 }
  0x1e   : > { %724 = vrot.lane.b32.xlu1 %v1736_v3, %s1817_s22 }
  0x22   : > { %857 = vrot.lane.b32.xlu1 %v1905_v1, %s1818_s23 }
  0x26   : > { %855 = vrot.lane.b32.xlu1 %v1736_v3, %s1818_s23 }
  0x84   : > { %v545_v10 = vpop.permute.xlu1 %544 }
  0x85   : > { %1621 = vmatpush3.bf16.msra.mxu1 %v545_v10 }
  0x86   : > { %1626 = vmatprep.subr.bf16.mxu1 %v1813_v0 }
  0x88   : > { %v596_v19 = vpop.permute.xlu1 %595 }
  0x89   : > { %v601_v22 = vsel %vm464_vm1, %v596_v19, 0 }
  0x8c   : > { %v727_v24 = vpop.permute.xlu1 %726 }
  0x8d   : > { %v732_v27 = vsel %vm464_vm1, %v727_v24, 0 }
  0x90   : > { %v725_v26 = vpop.permute.xlu1 %724 }
  0x94   : > { %v858_v28 = vpop.permute.xlu1 %857 }
  0x95   : > { %v863_v29 = vsel %vm464_vm1, %v858_v28, 0 }
  0x98   : > { %v856_v30 = vpop.permute.xlu1 %855 }
  0xed   : > { %v505_v4 = vpop.f32.mrb[0].mxu0 }
  0xee   : > { %v1618_v5 = vpop.f32.mrb[1].mxu0  ;;  %v513_v6 = vsel %vm512_vm2, %v505_v4, -inf }
  0xef   : > { %514 = vmax.xlane.f32.xlu0 %v513_v6  ;;  %v508_v7 = vpop.f32.mrb[2].mxu0 }
  0xf0   : > { %v1619_v8 = vpop.f32.mrb[3].mxu0  ;;  %v516_v9 = vsel %vm512_vm2, %v508_v7, -inf }
  0xf3   : > { %517 = vmax.xlane.f32.xlu0 %v516_v9 }
 0x109   : > { %593 = vrot.lane.b32.xlu0 %v1736_v3, %s1816_s21  ;;  %s438_s21 = scalar_lea.vmem %s2126_s8, %s1899_s13  ;;  %s1551_s13 = sshll.u32 %s2133_s30, 1 }
 0x17c   : > { %v515_v11 = vpop.xlane.xlu0 %514 }
 0x17d   : > { %v519_v12 = vmax.f32 %v515_v11, -1e+30 }
 0x17f   : > { %v527_v13 = vsub.f32 %v505_v4, %v519_v12  ;;  %v521_v31 = vsub.f32 -1e+30, %v519_v12 }
 0x180   : > { %v518_v14 = vpop.xlane.xlu0 %517 }
 0x181   : > { %v520_v15 = vmax.f32 %v518_v14, -1e+30  ;;  %v529_v16 = vmul.f32 1.442695, %v527_v13  ;;  %v523_v33 = vmul.f32 1.442695, %v521_v31 }
 0x183   : > { %v528_v17 = vsub.f32 %v508_v7, %v520_v15  ;;  %1741 = vpow2.f32 %v529_v16  ;;  %v522_v32 = vsub.f32 -1e+30, %v520_v15 }
 0x184   : > { %v594_v25 = vpop.permute.xlu0 %593 }
 0x185   : > { %v531_v18 = vmul.f32 1.442695, %v528_v17  ;;  %v525_v34 = vmul.f32 1.442695, %v522_v32 }
 0x187   : > { %1743 = vpow2.f32 %v531_v18 }
 0x188   : > { %1745 = vpow2.f32 %v523_v33 }
 0x189   : > { %1747 = vpow2.f32 %v525_v34 }
 0x18d   : > { %v1924_v20 = vpop.eup %1741 }
 0x191   : > { %v1926_v21 = vpop.eup %1743 }
 0x192   : > { %v543_v23 = vpack.c.bf16 %v1926_v21, %v1924_v20  ;;  %v1746_v35 = vpop.eup %1745 }
 0x193   : > { %v1748_v36 = vpop.eup %1747  ;;  %v1948_v37 = vmul.f32 0.0, %v1746_v35 }
 0x194   : > { %1623 = vmatmul.mubr.msk.bf16.vlgmr.msra.gmra.mrb[0].mxu1 %vm512_vm2, %v543_v23  ;;  %v1953_v41 = vmul.f32 0.0, %v1748_v36 }
 0x195   : > { %1627 = vmatpush3.bf16.xpose.msra.mxu1 %v601_v22  ;;  %1628 = vmatprep.mubr.msk.bf16.mxu1 %vm1814_vm0, %v1813_v0 }
 0x196   : > { %1638 = vmatprep.subr.bf16.mxu1 %v1813_v0 }
 0x19c   : > { %1629 = vmatmul.mubr.msk.bf16.vlgmr.msra.gmra.mrb[4].mxu1 %vm464_vm1, %v594_v25  ;;  %v538_v25 = vsel %vm512_vm2, %v1926_v21, 0.0 }
 0x19d   : > { %1639 = vmatpush3.bf16.xpose.msra.mxu1 %v732_v27  ;;  %1640 = vmatprep.mubr.msk.bf16.mxu1 %vm1814_vm0, %v1813_v0 }
 0x19e   : > { %1650 = vmatprep.subr.bf16.mxu1 %v1813_v0 }
 0x1a4   : > { %1641 = vmatmul.mubr.msk.bf16.vlgmr.msra.gmra.mrb[8].mxu1 %vm464_vm1, %v725_v26  ;;  %v535_v26 = vsel %vm512_vm2, %v1924_v20, 0.0 }
 0x1a5   : > { %1651 = vmatpush3.bf16.xpose.msra.mxu1 %v863_v29  ;;  %1652 = vmatprep.mubr.msk.bf16.mxu1 %vm1814_vm0, %v1813_v0 }
 0x1a6   : > { %1662 = vmatprep.subr.bf16.mxu1 %v1813_v0 }
 0x1ac   : > { %1653 = vmatmul.mubr.msk.bf16.vlgmr.msra.gmra.mrb[12].mxu1 %vm464_vm1, %v856_v30 }
 0x1ad   : > { %1664 = vmatprep.mubr.msk.bf16.mxu1 %vm1814_vm0, %v1813_v0 }
 0x267   : > { %v584_v38 = vpop.f32.mrb[0].mxu1 }
 0x268   : > { %v1951_v39 = vadd.f32 %v584_v38, %v1948_v37  ;;  %v1624_v40 = vpop.f32.mrb[1].mxu1 }
 0x269   : > { %v587_v42 = vpop.f32.mrb[2].mxu1 }
 0x26a   : > { %v1956_v43 = vadd.f32 %v587_v42, %v1953_v41  ;;  %v1625_v44 = vpop.f32.mrb[3].mxu1 }
 0x26f   : > { %v637_v45 = vpop.f32.mrb[4].mxu1 }
 0x270   : > { %v1630_v46 = vpop.f32.mrb[5].mxu1  ;;  %v644_v47 = vsel %vm512_vm2, %v637_v45, -inf }
 0x271   : > { %645 = vmax.xlane.f32.xlu1 %v644_v47  ;;  %v640_v48 = vpop.f32.mrb[6].mxu1 }
 0x272   : > { %v1631_v49 = vpop.f32.mrb[7].mxu1  ;;  %v647_v50 = vsel %vm512_vm2, %v640_v48, -inf }
 0x273   : > { %648 = vmax.xlane.f32.xlu0 %v647_v50  ;;  %v997_v50 = vld [vmem:[%s2121_s3 + $0x4] sm:$0xf] }
 0x277   : > { %v1960_v51 = vpop.f32.mrb[8].mxu1 }
 0x278   : > { %v1642_v52 = vpop.f32.mrb[9].mxu1  ;;  %v775_v61 = vsel %vm512_vm2, %v1960_v51, -inf }
 0x279   : > { %v771_v53 = vpop.f32.mrb[10].mxu1 }
 0x27a   : > { %v778_v54 = vsel %vm512_vm2, %v771_v53, -inf  ;;  %v1643_v55 = vpop.f32.mrb[11].mxu1 }
 0x27b   : > { %779 = vmax.xlane.f32.xlu0 %v778_v54 }
 0x27f   : > { %v1963_v56 = vpop.f32.mrb[12].mxu1 }
 0x280   : > { %v1654_v57 = vpop.f32.mrb[13].mxu1  ;;  %v906_v62 = vsel %vm512_vm2, %v1963_v56, -inf }
 0x281   : > { %v902_v58 = vpop.f32.mrb[14].mxu1 }
 0x282   : > { %675 = vrot.lane.b32.xlu1 %v1905_v1, %s1819_s24  ;;  %v909_v59 = vsel %vm512_vm2, %v902_v58, -inf  ;;  %v1655_v60 = vpop.f32.mrb[15].mxu1  ;;  %s446_s24 = scalar_lea.vmem %s2127_s9, %s1551_s13 }
 0x283   : > { %910 = vmax.xlane.f32.xlu0 %v909_v59 }
 0x299   : > { %806 = vrot.lane.b32.xlu0 %v1905_v1, %s1820_s25  ;;  %s1578_s25 = sshll.u32 %s2133_s30, 4 }
 0x29a   : > { %s413_s28 = scalar_lea.vmem %s2118_s0, %s1578_s25 }
 0x2a6   : > { %776 = vmax.xlane.f32.xlu1 %v775_v61  ;;  %v1153_v61 = vld [vmem:[%s2121_s3 + $0xc] sm:$0xf] }
 0x2aa   : > { %907 = vmax.xlane.f32.xlu1 %v906_v62 }
 0x2bb   : > { %937 = vrot.lane.b32.xlu1 %v1905_v1, %s1821_s26 }
 0x2fe   : > { %v1973_v63 = vpop.xlane.xlu1 %645 }
 0x2ff   : > { %v650_v2 = vmax.f32 %v1973_v63, -1e+30 }
 0x300   : > { %v1976_v3 = vpop.xlane.xlu0 %648 }
 0x301   : > { %v658_v4 = vsub.f32 %v637_v45, %v650_v2  ;;  %v651_v5 = vmax.f32 %v1976_v3, -1e+30 }
 0x302   : > { %v676_v6 = vpop.permute.xlu1 %675 }
 0x303   : > { %v660_v7 = vmul.f32 1.442695, %v658_v4  ;;  %v659_v8 = vsub.f32 %v640_v48, %v651_v5  ;;  %1633 = vmatpush3.bf16.msra.mxu0 %v676_v6  ;;  %v991_v48 = vld [vmem:[%s2121_s3] sm:$0xf]  ;;  %v1158_v6 = vsel %vm1001_vm3, %v1153_v61, 0 }
 0x304   : > { %1644 = vmatprep.subr.bf16.mxu0 %v1813_v0  ;;  %v1050_v49 = vsel %vm1001_vm3, %v991_v48, 0 }
 0x305   : > { %v662_v1 = vmul.f32 1.442695, %v659_v8  ;;  %1749 = vpow2.f32 %v660_v7 }
 0x307   : > { %1751 = vpow2.f32 %v662_v1 }
 0x308   : > { %v1984_v9 = vpop.xlane.xlu0 %779 }
 0x309   : > { %v782_v10 = vmax.f32 %v1984_v9, -1e+30 }
 0x30b   : > { %v790_v11 = vsub.f32 %v771_v53, %v782_v10 }
 0x30d   : > { %v793_v12 = vmul.f32 1.442695, %v790_v11 }
 0x30f   : > { %v1750_v13 = vpop.eup %1749  ;;  %1753 = vpow2.f32 %v793_v12 }
 0x310   : > { %v1989_v14 = vpop.xlane.xlu0 %910  ;;  %v666_v16 = vsel %vm512_vm2, %v1750_v13, 0.0 }
 0x311   : > { %v913_v15 = vmax.f32 %v1989_v14, -1e+30  ;;  %v1752_v17 = vpop.eup %1751  ;;  %667 = vadd.xlane.f32.xlu1 %v666_v16 }
 0x312   : > { %v669_v19 = vsel %vm512_vm2, %v1752_v17, 0.0  ;;  %v674_v22 = vpack.c.bf16 %v1752_v17, %v1750_v13 }
 0x313   : > { %v921_v18 = vsub.f32 %v902_v58, %v913_v15  ;;  %670 = vadd.xlane.f32.xlu0 %v669_v19 }
 0x314   : > { %v807_v23 = vpop.permute.xlu0 %806  ;;  %1635 = vmatmul.mubr.msk.bf16.vlgmr.msra.gmra.mrb[4].mxu0 %vm512_vm2, %v674_v22 }
 0x315   : > { %v924_v24 = vmul.f32 1.442695, %v921_v18  ;;  %539 = vadd.xlane.f32.xlu1 %v538_v25  ;;  %1645 = vmatpush3.bf16.msra.mxu0 %v807_v23  ;;  %v1098_v23 = vld [vmem:[%s2121_s3 + $0x8] sm:$0xf] }
 0x316   : > { %1646 = vmatprep.mubr.msk.bf16.mxu0 %vm1814_vm0, %v1813_v0  ;;  %1656 = vmatprep.subr.bf16.mxu0 %v1813_v0 }
 0x317   : > { %1755 = vpow2.f32 %v924_v24  ;;  %536 = vadd.xlane.f32.xlu0 %v535_v26  ;;  %v1103_v26 = vsel %vm1001_vm3, %v1098_v23, 0 }
 0x319   : > { %v1754_v27 = vpop.eup %1753 }
 0x31a   : > { %v800_v28 = vsel %vm512_vm2, %v1754_v27, 0.0 }
 0x31b   : > { %801 = vadd.xlane.f32.xlu1 %v800_v28  ;;  %v784_v28 = vsub.f32 -1e+30, %v782_v10 }
 0x321   : > { %v1756_v29 = vpop.eup %1755 }
 0x322   : > { %v931_v30 = vsel %vm512_vm2, %v1756_v29, 0.0 }
 0x323   : > { %932 = vadd.xlane.f32.xlu1 %v931_v30  ;;  %v787_v30 = vmul.f32 1.442695, %v784_v28 }
 0x333   : > { %v2006_v21 = vpop.xlane.xlu1 %776 }
 0x334   : > { %v781_v31 = vmax.f32 %v2006_v21, -1e+30 }
 0x336   : > { %v789_v20 = vsub.f32 %v1960_v51, %v781_v31  ;;  %v1003_v51 = vsel %vm1001_vm3, %v997_v50, 0 }
 0x337   : > { %v2012_v32 = vpop.xlane.xlu1 %907  ;;  %1663 = vmatpush3.bf16.msra.mxu1 %v1003_v51 }
 0x338   : > { %v791_v33 = vmul.f32 1.442695, %v789_v20  ;;  %v912_v34 = vmax.f32 %v2012_v32, -1e+30  ;;  %1674 = vmatprep.subr.bf16.mxu1 %v1813_v0 }
 0x33a   : > { %v920_v35 = vsub.f32 %v1963_v56, %v912_v34  ;;  %1757 = vpow2.f32 %v791_v33  ;;  %v914_v20 = vsub.f32 -1e+30, %v912_v34  ;;  %v915_v33 = vsub.f32 -1e+30, %v913_v15 }
 0x33b   : > { %v938_v40 = vpop.permute.xlu1 %937 }
 0x33c   : > { %v922_v36 = vmul.f32 1.442695, %v920_v35  ;;  %v916_v35 = vmul.f32 1.442695, %v914_v20 }
 0x33e   : > { %1759 = vpow2.f32 %v922_v36  ;;  %v918_v36 = vmul.f32 1.442695, %v915_v33 }
 0x344   : > { %v1758_v38 = vpop.eup %1757 }
 0x345   : > { %v797_v42 = vsel %vm512_vm2, %v1758_v38, 0.0  ;;  %v805_v44 = vpack.c.bf16 %v1754_v27, %v1758_v38  ;;  %v783_v27 = vsub.f32 -1e+30, %v781_v31 }
 0x346   : > { %798 = vadd.xlane.f32.xlu0 %v797_v42 }
 0x347   : > { %1647 = vmatmul.mubr.msk.bf16.vlgmr.msra.gmra.mrb[8].mxu0 %vm512_vm2, %v805_v44 }
 0x348   : > { %v1760_v45 = vpop.eup %1759  ;;  %1657 = vmatpush3.bf16.msra.mxu0 %v938_v40  ;;  %1658 = vmatprep.mubr.msk.bf16.mxu0 %vm1814_vm0, %v1813_v0 }
 0x349   : > { %v928_v46 = vsel %vm512_vm2, %v1760_v45, 0.0  ;;  %v936_v47 = vpack.c.bf16 %v1756_v29, %v1760_v45  ;;  %1668 = vmatprep.subr.bf16.mxu0 %v1813_v0  ;;  %v785_v29 = vmul.f32 1.442695, %v783_v27 }
 0x34a   : > { %929 = vadd.xlane.f32.xlu0 %v928_v46 }
 0x34f   : > { %1659 = vmatmul.mubr.msk.bf16.vlgmr.msra.gmra.mrb[12].mxu0 %vm512_vm2, %v936_v47 }
 0x350   : > { %1669 = vmatpush3.bf16.msra.mxu0 %v1050_v49  ;;  %1670 = vmatprep.mubr.msk.bf16.mxu0 %vm1814_vm0, %v1813_v0 }
 0x351   : > { %1680 = vmatprep.subr.bf16.mxu0 %v1813_v0 }
 0x39e   : > { %v668_v52 = vpop.xlane.xlu1 %667 }
 0x3a0   : > { %v671_v53 = vpop.xlane.xlu0 %670 }
 0x3a2   : > { %v540_v54 = vpop.xlane.xlu1 %539 }
 0x3a3   : > { %v542_v55 = vadd.f32 %v540_v54, %v1953_v41  ;;  %v653_v41 = vsub.f32 -1e+30, %v651_v5 }
 0x3a4   : > { %v537_v56 = vpop.xlane.xlu0 %536 }
 0x3a5   : > { %1761 = vrcp.f32 %v542_v55  ;;  %v541_v57 = vadd.f32 %v537_v56, %v1948_v37  ;;  %v652_v37 = vsub.f32 -1e+30, %v650_v2  ;;  %v656_v7 = vmul.f32 1.442695, %v653_v41 }
 0x3a7   : > { %1763 = vrcp.f32 %v541_v57 }
 0x3a8   : > { %v802_v9 = vpop.xlane.xlu1 %801 }
 0x3af   : > { %v1762_v58 = vpop.eup %1761 }
 0x3b0   : > { %v989_v59 = vmul.f32 %v1762_v58, %v1956_v43  ;;  %v654_v43 = vmul.f32 1.442695, %v652_v37  ;;  %v933_v14 = vpop.xlane.xlu1 %932 }
 0x3b1   : > { %v1764_v60 = vpop.eup %1763 }
 0x3b2   : > { %v988_v62 = vmul.f32 %v1764_v60, %v1951_v39  ;;  %1765 = vpow2.f32 %v654_v43 }
 0x3b3   : > { %1767 = vpow2.f32 %v656_v7 }
 0x3b4   : > { %v990_v4 = vpack.c.bf16 %v989_v59, %v988_v62 }
 0x3b6   : > { %1671 = vmatmul.mubr.msk.bf16.vlgmr.msra.gmra.mrb[16].mxu0 %vm464_vm1, %v990_v4 }
 0x3b7   : > { %1681 = vmatpush3.bf16.msra.mxu0 %v1158_v6  ;;  %1682 = vmatprep.mubr.msk.bf16.mxu0 %vm1814_vm0, %v1813_v0 }
 0x3b8   : > { %1694 = vmatprep.subr.bf16.mxu0 %v1813_v0 }
 0x3bc   : > { %v1766_v39 = vpop.eup %1765 }
 0x3bd   : > { %v1768_v8 = vpop.eup %1767  ;;  %v664_v1 = vmul.f32 0.0, %v1766_v39 }
 0x3be   : > { %v665_v12 = vmul.f32 0.0, %v1768_v8 }
 0x3bf   : > { %v672_v11 = vadd.f32 %v668_v52, %v664_v1 }
 0x3c0   : > { %v673_v13 = vadd.f32 %v671_v53, %v665_v12 }
 0x3c1   : > { %1769 = vrcp.f32 %v672_v11  ;;  %v1738_v11 = vld [vmem:[%s2124_s6] sm:$0xff]  }
 0x3c2   : > { %1771 = vrcp.f32 %v673_v13  ;;  %v448_v13 = vld [vmem:[%s413_s28] sm:$0xff] }
 0x3c3   : > { %1773 = vpow2.f32 %v785_v29 }
 0x3c4   : > { %1775 = vpow2.f32 %v787_v30 }
 0x3c5   : > { %1777 = vpow2.f32 %v916_v35 }
 0x3c6   : > { %1779 = vpow2.f32 %v918_v36 }
 0x3cb   : > { %v1770_v63 = vpop.eup %1769 }
 0x3cc   : > { %v1772_v22 = vpop.eup %1771 }
 0x3cd   : > { %v1774_v38 = vpop.eup %1773 }
 0x3ce   : > { %v1776_v21 = vpop.eup %1775  ;;  %v795_v40 = vmul.f32 0.0, %v1774_v38  ;;  %v1566_v38 = vld [vmem:[%s2122_s4] ss:$0 sm:$0xff] }
 0x3cf   : > { %v796_v10 = vmul.f32 0.0, %v1776_v21  ;;  %v1778_v45 = vpop.eup %1777 }
 0x3d0   : > { %v1780_v32 = vpop.eup %1779  ;;  %v926_v46 = vmul.f32 0.0, %v1778_v45 }
 0x3d1   : > { %v804_v44 = vadd.f32 %v802_v9, %v796_v10  ;;  %v927_v15 = vmul.f32 0.0, %v1780_v32 }
 0x3d3   : > { %v799_v31 = vpop.xlane.xlu0 %798  ;;  %v935_v48 = vadd.f32 %v933_v14, %v927_v15  ;;  %v1573_v14 = vld [vmem:[%s2125_s7] ss:$0 sm:$0xff] }
 0x3d4   : > { %v803_v42 = vadd.f32 %v799_v31, %v795_v40 }
 0x3d6   : > { %1781 = vrcp.f32 %v803_v42 }
 0x3d7   : > { %v930_v34 = vpop.xlane.xlu0 %929  ;;  %1783 = vrcp.f32 %v804_v44 }
 0x3d8   : > { %v934_v47 = vadd.f32 %v930_v34, %v926_v46 }
 0x3da   : > { %1785 = vrcp.f32 %v934_v47 }
 0x3db   : > { %1787 = vrcp.f32 %v935_v48 }
 0x3e0   : > { %v1782_v52 = vpop.eup %1781 }
 0x3e1   : > { %v1784_v57 = vpop.eup %1783 }
 0x3e4   : > { %v1786_v4 = vpop.eup %1785 }
 0x3e5   : > { %v1788_v7 = vpop.eup %1787 }
 0x3e7   : > { %v715_v16 = vpop.f32.mrb[4].mxu0 }
 0x3e8   : > { %v722_v17 = vadd.f32 %v715_v16, %v664_v1  ;;  %v1636_v18 = vpop.f32.mrb[5].mxu0  ;;  %v1737_v1 = vld [vmem:[%s2123_s5] sm:$0xff]   ;;  %v449_v16 = vld [vmem:[%s413_s28 + $0x8] sm:$0xff] }
 0x3e9   : > { %v718_v2 = vpop.f32.mrb[6].mxu0  ;;  %v1212_v18 = vpack.c.bf16 %v449_v16, %v448_v13 }
 0x3ea   : > { %v994_v19 = vmul.f32 %v1770_v63, %v722_v17  ;;  %v723_v3 = vadd.f32 %v718_v2, %v665_v12  ;;  %v1637_v5 = vpop.f32.mrb[7].mxu0  ;;  %v1739_v12 = vld [vmem:[%s2123_s5 + $0x8] sm:$0xff]  }
 0x3eb   : > { %v1740_v17 = vld [vmem:[%s2124_s6 + $0x8] sm:$0xff]  }
 0x3ec   : > { %v995_v24 = vmul.f32 %v1772_v22, %v723_v3 }
 0x3ee   : > { %v996_v25 = vpack.c.bf16 %v995_v24, %v994_v19 }
 0x3f0   : > { %1665 = vmatmul.mubr.msk.bf16.vlgmr.msra.gmra.mrb[16].mxu1 %vm464_vm1, %v996_v25 }
 0x3f1   : > { %1675 = vmatpush3.bf16.msra.mxu1 %v1103_v26  ;;  %1676 = vmatprep.mubr.msk.bf16.mxu1 %vm1814_vm0, %v1813_v0 }
 0x3f2   : > { %1686 = vmatprep.subr.bf16.mxu1 %v1813_v0 }
 0x41a   : > { %v846_v49 = vpop.f32.mrb[8].mxu0 }
 0x41b   : > { %v853_v50 = vadd.f32 %v846_v49, %v795_v40  ;;  %v1648_v51 = vpop.f32.mrb[9].mxu0 }
 0x41c   : > { %v849_v53 = vpop.f32.mrb[10].mxu0 }
 0x41d   : > { %v1095_v54 = vmul.f32 %v1782_v52, %v853_v50  ;;  %v854_v55 = vadd.f32 %v849_v53, %v796_v10  ;;  %v1649_v56 = vpop.f32.mrb[11].mxu0 }
 0x41f   : > { %v1096_v58 = vmul.f32 %v1784_v57, %v854_v55 }
 0x421   : > { %v1097_v59 = vpack.c.bf16 %v1096_v58, %v1095_v54 }
 0x422   : > { %v977_v60 = vpop.f32.mrb[12].mxu0 }
 0x423   : > { %v984_v61 = vadd.f32 %v977_v60, %v926_v46  ;;  %v1660_v62 = vpop.f32.mrb[13].mxu0  ;;  %1677 = vmatmul.mubr.msk.bf16.vlgmr.msra.gmra.mrb[20].mxu1 %vm464_vm1, %v1097_v59 }
 0x424   : > { %v980_v6 = vpop.f32.mrb[14].mxu0  ;;  %1690 = vmatprep.mubr.msk.bf16.mxu1 %vm1814_vm0, %v1813_v0  ;;  %1687 = vmatpush3.bf16.msra.mxu1 %v1738_v11 }
 0x425   : > { %v1150_v37 = vmul.f32 %v1786_v4, %v984_v61  ;;  %v985_v41 = vadd.f32 %v980_v6, %v927_v15  ;;  %v1661_v43 = vpop.f32.mrb[15].mxu0  ;;  %1688 = vmatprep.subr.bf16.mxu1 %v1813_v0 }
 0x427   : > { %v1151_v39 = vmul.f32 %v1788_v7, %v985_v41 }
 0x428   : > { %1689 = vmatpush3.bf16.msra.mxu1 %v1740_v17 }
 0x429   : > { %v1152_v8 = vpack.c.bf16 %v1151_v39, %v1150_v37 }
 0x42b   : > { %1683 = vmatmul.mubr.msk.bf16.vlgmr.msra.gmra.mrb[20].mxu0 %vm464_vm1, %v1152_v8 }
 0x42c   : > { %1698 = vmatprep.mubr.msk.bf16.mxu0 %vm1814_vm0, %v1813_v0  ;;  %1695 = vmatpush3.bf16.msra.mxu0 %v1737_v1 }
 0x42d   : > { %1696 = vmatprep.subr.bf16.mxu0 %v1813_v0 }
 0x430   : > { %1697 = vmatpush3.bf16.msra.mxu0 %v1739_v12 }
 0x433   : > { %1699 = vmatmul.mubr.msk.bf16.vlgmr.msra.gmra.mrb[24].mxu0 %vm1234_vm4, %v1212_v18 }
 0x489   : > { %v1086_v63 = vpop.f32.mrb[16].mxu0 }
 0x48a   : > { %v1672_v2 = vpop.f32.mrb[17].mxu0 }
 0x48b   : > { %v1089_v19 = vpop.f32.mrb[18].mxu0 }
 0x48c   : > { %v1673_v3 = vpop.f32.mrb[19].mxu0 }
 0x4c3   : > { %v1039_v5 = vpop.f32.mrb[16].mxu1 }
 0x4c4   : > { %v1087_v22 = vadd.f32 %v1086_v63, %v1039_v5  ;;  %v1666_v23 = vpop.f32.mrb[17].mxu1 }
 0x4c5   : > { %v1042_v24 = vpop.f32.mrb[18].mxu1 }
 0x4c6   : > { %v1090_v0 = vadd.f32 %v1089_v19, %v1042_v24  ;;  %v1667_v25 = vpop.f32.mrb[19].mxu1 }
 0x4f6   : > { %v1139_v26 = vpop.f32.mrb[20].mxu1 }
 0x4f7   : > { %v1146_v27 = vadd.f32 %v1139_v26, %v1087_v22  ;;  %v1678_v28 = vpop.f32.mrb[21].mxu1 }
 0x4f8   : > { %v1142_v29 = vpop.f32.mrb[22].mxu1 }
 0x4f9   : > { %v1147_v30 = vadd.f32 %v1142_v29, %v1090_v0  ;;  %v1679_v20 = vpop.f32.mrb[23].mxu1 }
 0x4fe   : > { %v1194_v33 = vpop.f32.mrb[20].mxu0 }
 0x4ff   : > { %v1201_v35 = vadd.f32 %v1194_v33, %v1146_v27  ;;  %v1684_v36 = vpop.f32.mrb[21].mxu0 }
 0x500   : > { %v1197_v21 = vpop.f32.mrb[22].mxu0 }
 0x501   : > { %v1202_v31 = vadd.f32 %v1197_v21, %v1147_v30  ;;  %v1685_v40 = vpop.f32.mrb[23].mxu0  ;;  %v1210_v9 = vadd.f32 %v1566_v38, %v1201_v35 }
 0x503   : > { %v1211_v10 = vadd.f32 %v1566_v38, %v1202_v31 }
 0x505   : > { %v1217_v42 = vpack.c.bf16 %v1211_v10, %v1210_v9 }
 0x506   : > { %v1328_v44 = vpop.f32.mrb[24].mxu0 }
 0x507   : > { %1691 = vmatmul.mubr.msk.bf16.vlgmr.msra.gmra.mrb[24].mxu1 %vm1234_vm4, %v1217_v42  ;;  %v1700_v45 = vpop.f32.mrb[25].mxu0 }
 0x508   : > { %v1331_v32 = vpop.f32.mrb[26].mxu0 }
 0x509   : > { %v1701_v34 = vpop.f32.mrb[27].mxu0 }
 0x5da   : > { %v1272_v46 = vpop.f32.mrb[24].mxu1 }
 0x5db   : > { %v1329_v15 = vadd.f32 %v1328_v44, %v1272_v46  ;;  %v1692_v47 = vpop.f32.mrb[25].mxu1 }
 0x5dc   : > { %v1275_v48 = vpop.f32.mrb[26].mxu1 }
 0x5dd   : > { %v1342_v49 = vadd.f32 %v1573_v14, %v1329_v15  ;;  %v1332_v50 = vadd.f32 %v1331_v32, %v1275_v48  ;;  %v1693_v51 = vpop.f32.mrb[27].mxu1 }
 0x5df   : > { %v1582_v52 = vpack.c.bf16 %v1342_v49, %v1342_v49  ;;  %v1365_v53 = vmul.f32 %v1342_v49, %v1342_v49  ;;  %v1343_v54 = vadd.f32 %v1573_v14, %v1332_v50  ;;  %v1356_v55 = vsel %vm1355_vm6, %v1342_v49, 0.0 }
 0x5e1   : > { %1353 = vst.msk [vmem:[%s438_s21] sm:$0xf] %vm1352_vm5, %v1582_v52  ;;  %v1583_v56 = vpack.c.bf16 %v1343_v54, %v1343_v54  ;;  %v1357_v57 = vsel %vm1355_vm6, %v1343_v54, 0.0  ;;  %v1366_v58 = vmul.f32 %v1343_v54, %v1343_v54  ;;  %v1367_v60 = vsel %vm1355_vm6, %v1365_v53, 0.0 }
 0x5e2   : > { %v1358_v59 = vadd.f32 %v1357_v57, %v1356_v55 }
 0x5e3   : > { %1354 = vst.msk [vmem:[%s438_s21 + $0x4] sm:$0xf] %vm1352_vm5, %v1583_v56  ;;  %v1368_v61 = vsel %vm1355_vm6, %v1366_v58, 0.0 }
 0x5e4   : > { %v1359_v62 = vrot.slane %v1358_v59, 4  ;;  %v1369_v4 = vadd.f32 %v1368_v61, %v1367_v60 }
 0x5e6   : > { %v1360_v6 = vadd.f32 %v1359_v62, %v1358_v59  ;;  %v1370_v37 = vrot.slane %v1369_v4, 4 }
 0x5e8   : > { %v1361_v41 = vrot.slane %v1360_v6, 2  ;;  %v1371_v43 = vadd.f32 %v1370_v37, %v1369_v4 }
 0x5ea   : > { %v1362_v7 = vadd.f32 %v1361_v41, %v1360_v6  ;;  %v1372_v39 = vrot.slane %v1371_v43, 2 }
 0x5ec   : > { %v1363_v8 = vrot.slane %v1362_v7, 1  ;;  %v1373_v1 = vadd.f32 %v1372_v39, %v1371_v43 }
 0x5ee   : > { %v1374_v11 = vrot.slane %v1373_v1, 1  ;;  %v1364_v12 = vadd.f32 %v1363_v8, %v1362_v7 }
 0x5f0   : > { %v1375_v13 = vadd.f32 %v1374_v11, %v1373_v1 }
 0x5f2   : > { %v1377_v16 = vsel %vm1376_vm7, %v1364_v12, %v1375_v13 }
 0x5f3   : > { %1379 = vst.msk [vmem:[%s446_s24] sm:$0x3] %vm1378_vm8, %v1377_v16 }
 0x5f4 PF: > { %s20_s11 = sadd.s32 1, %s1811_s11   ;;  %s2128_s30 = smov %s1807_s10 }
 0x5f5   : > { %p17_p5 = scmp.ge.s32.totalorder %s20_s11, 4   ;;  %s2129_s10 = smov %s2131_s12 }
 0x5f7   :  { %19 = sbr.rel (!%p17_p5) target bundleno = 2 (0x2), region = 100 }

// kernel: attentional_gnn_forward.25
= control target key start
LH: loop header
LB: loop body
LE: loop exit
PB: predicated region body
PF: predicated region fallthrough
CT: control target
= control target key end

     0   :  { %s155_s0 = inlined_call_operand.vmem [shape: bf16[32,32], index: 0, kind: input, shape index: {}]   ;;  %s156_s1 = inlined_call_operand.vmem [shape: f32[1,32], index: 1, kind: input, shape index: {}]   ;;  %s157_s2 = inlined_call_operand.vmem [shape: f32[1,32], index: 2, kind: input, shape index: {}]   ;;  %s158_s3 = inlined_call_operand.hbm [shape: f32[32,32], index: 3, kind: output, shape index: {}]  }
   0x1   :  { %v73_v0 = vld [vmem:[%s155_s0] sm:$0xff]   ;;  %v80_v4 = vld [vmem:[%s155_s0 + $0x8] sm:$0xff]  }
   0x2   :  { %v70_v1 = vld [vmem:[%s156_s1] ss:$0 sm:$0xff]  ;;  %v74_v2 = vunpack.c.l.bf16 %v73_v0  ;;  %v75_v3 = vunpack.c.h.bf16 %v73_v0 }
   0x3   :  { %8 = vsyncpa [#allocation3], 0  ;;  %v71_v5 = vld [vmem:[%s157_s2] ss:$0 sm:$0xff]  ;;  %v78_v6 = vunpack.c.l.bf16 %v80_v4  ;;  %v79_v7 = vunpack.c.h.bf16 %v80_v4  ;;  %s108_s1 = smov [#allocation2]   ;;  %vm49_vm0 = vcmask 261120  }
   0x4   :  { %v30_v8 = vsub.f32 %v74_v2, %v70_v1  ;;  %v31_v9 = vsub.f32 %v75_v3, %v70_v1  ;;  %s59_s20 = sshll.u32 %s108_s1, 4  ;;  %s60_s20 = int_to_ptr.vmem [resolvable:$true] %s59_s20 }
   0x5   :  { %v32_v10 = vsub.f32 %v78_v6, %v70_v1  ;;  %v33_v11 = vsub.f32 %v79_v7, %v70_v1  ;;  %s84_s0 = scalar_lea.vmem %s60_s20, 512  ;;  %p89_p1 = scmp.lt.s32.totalorder %s60_s20, %s60_s20 }
   0x6   :  { %v41_v12 = vmul.f32 %v71_v5, %v30_v8  ;;  %v42_v13 = vmul.f32 %v71_v5, %v31_v9  ;;  %p85_p0 = scmp.ne.s32.totalorder %s60_s20, %s84_s0  ;;  %p90_p2 = scmp.lt.s32.totalorder %s84_s0, %s84_s0 }
   0x7   :  { %v43_v14 = vmul.f32 %v71_v5, %v32_v10  ;;  %v44_v15 = vmul.f32 %v71_v5, %v33_v11 }
   0x8   :  { %v45_v16 = vmax.f32 %v41_v12, 0.0  ;;  %v46_v17 = vmax.f32 %v42_v13, 0.0  ;;  %p91_p3 = por %p90_p2, %p89_p1 }
   0x9   :  { %v47_v18 = vmax.f32 %v43_v14, 0.0  ;;  %v48_v19 = vmax.f32 %v44_v15, 0.0 }
   0xa   :  { %50 = vst.msk [vmem:[#allocation2] sm:$0xff] %vm49_vm0, %v45_v16  ;;  %51 = vst.msk [vmem:[#allocation2 + $0x8] sm:$0xff] %vm49_vm0, %v46_v17  ;;  %p92_p4 = pnand %p91_p3, %p85_p0 }
   0xb   :  { %52 = vst.msk [vmem:[#allocation2 + $0x10] sm:$0xff] %vm49_vm0, %v47_v18  ;;  %53 = vst.msk [vmem:[#allocation2 + $0x18] sm:$0xff] %vm49_vm0, %v48_v19 }
   0xc   :  { %95 = shalt.err (!%p92_p4)
}
   0xd   :  { %s96_s22 = scalar_lea.hbm %s158_s3, 512 }
   0xe   :  { %p97_p5 = scmp.ne.s32.totalorder %s158_s3, %s96_s22  ;;  %p100_p6 = scmp.lt.u32.totalorder %s96_s22, %s158_s3 }
  0x10   :  { %p102_p7 = pnand %p100_p6, %p97_p5 }
  0x12   :  { %105 = shalt.err (!%p102_p7)
}
  0x13   :  { %s109_s27 = smov 128   ;;  %s110_s28 = smov 8  }
  0x14   :  { %65 = dma.vmem_to_hbm [thread:$0]  %s60_s20, 512, %s158_s3, [#allocation3], %s109_s27, %s109_s27, %s110_s28  }
  0x15   :  { %106 = dma.done.wait [#allocation3], 512  }
  0x16   :  { %107 = vsyncadd [#allocation3], 4294966784 }
  0x17   :  { %69 = vsyncpa [#allocation3], 1 }

</bundles_post_ra>
